<compile_context>
chip_gen: v5e
topology: v5e:2x2
jax: 0.10.0
libtpu: 0.0.40
codegen_flags: <defaults>
</compile_context>

<pallas_src>
import jax
import jax.numpy as jnp
from jax import lax
from jax.experimental import pallas as pl
from jax.experimental.pallas import tpu as pltpu

# ----------------------------- configuration --------------------------------
B = 2                 # batch
T_TXT = 8             # text sequence length
T_IMG = 1             # number of media per sample
V_TOK = 4             # visual tokens per media
VIS_DIM = 32          # visual feature dim (vis_dim)
LANG_DIM = 32         # language hidden dim (lang_dim)
VOCAB = 128           # lane-dense LM-head output (multiple of 128)
HEADS = 2
DHEAD = 16
INNER = HEADS * DHEAD
FF_MULT = 4
FF_DIM = FF_MULT * LANG_DIM      # 128
FF_DIM_V = FF_MULT * VIS_DIM     # 128
N_LANG_LAYERS = 2
CROSS_ATTN_EVERY = 1             # cross-attn before every decoder layer
PERC_DEPTH = 2
N_LATENTS = 4
NUM_ORGAN = 9
NUM_DIAG = 38
CLS_PAD = 128                    # lane-dense padded width for the cls heads
MEDIA_TOKEN_ID = 3
EOC_TOKEN_ID = 4
CLS1_TOKEN_ID = 5
CLS2_TOKEN_ID = 6
NEG_INF = -1e9
SCALE = DHEAD ** -0.5


# --------------------------- in-kernel helpers --------------------------------
def _ln(x, g, b, eps=1e-5):
    """LayerNorm over the last axis.  x: [M, D], g/b: [1, D]."""
    mu = jnp.mean(x, axis=-1, keepdims=True)
    var = jnp.mean((x - mu) ** 2, axis=-1, keepdims=True)
    return (x - mu) * lax.rsqrt(var + eps) * g + b


def _mha(q_src, kv_src, wq_ref, wk_ref, wv_ref, wo_ref, bias, b, tq, tk,
         qkv_bias=None):
    """Multi-head attention with the out-projection accumulated per head.

    q_src:  [b*tq, Dq]  bf16 (already LayerNormed)
    kv_src: [b*tk, Dkv] bf16
    wq/wk/wv refs: [1, H, D*, dh] bf16 (wq pre-scaled by 1/sqrt(dh) at init)
    wo ref:        [1, H, dh, Dout] bf16
    bias:   additive score bias broadcastable to [b, tq, tk] (f32)
    qkv_bias: optional ([H, dh], [H, dh], [H, dh]) f32 per-head biases
    Returns [b*tq, Dout] f32.  No lane slicing of activations anywhere: heads
    are selected on a LEADING weight axis and batch lives in a 1-batch-dim
    einsum.
    """
    dout = wo_ref.shape[-1]
    out = jnp.zeros((b * tq, dout), jnp.float32)
    # TODO(synk): at real head counts (32+) turn this Python unroll into a
    # head grid axis / lax.fori_loop and tile the scores flash-style.
    for h in range(HEADS):
        q = jnp.dot(q_src, wq_ref[0, h], preferred_element_type=jnp.float32)
        k = jnp.dot(kv_src, wk_ref[0, h], preferred_element_type=jnp.float32)
        v = jnp.dot(kv_src, wv_ref[0, h], preferred_element_type=jnp.float32)
        if qkv_bias is not None:
            bq, bk, bv = qkv_bias
            q = q + bq[h:h + 1]
            k = k + bk[h:h + 1]
            v = v + bv[h:h + 1]
        q = q.reshape(b, tq, DHEAD).astype(jnp.bfloat16)
        k = k.reshape(b, tk, DHEAD).astype(jnp.bfloat16)
        v = v.reshape(b, tk, DHEAD).astype(jnp.bfloat16)
        s = jnp.einsum("bqd,bkd->bqk", q, k,
                       preferred_element_type=jnp.float32) + bias
        s = s - jnp.max(s, axis=-1, keepdims=True)
        p = jnp.exp(s)
        p = p / jnp.sum(p, axis=-1, keepdims=True)       # exact softmax
        o = jnp.einsum("bqk,bkd->bqd", p.astype(jnp.bfloat16), v,
                       preferred_element_type=jnp.float32)
        out = out + jnp.dot(o.reshape(b * tq, DHEAD).astype(jnp.bfloat16),
                            wo_ref[0, h], preferred_element_type=jnp.float32)
    return out


def _perc_attn(latn, xn, wq_ref, wk_ref, wv_ref, wo_ref, bt, n_lat, n_med):
    """PerceiverAttention: queries from latents, keys/values over the
    concatenation of (media tokens, latents) handled as TWO sources with a
    joint softmax (no in-kernel concatenate)."""
    dout = wo_ref.shape[-1]
    out = jnp.zeros((bt * n_lat, dout), jnp.float32)
    for h in range(HEADS):
        q = jnp.dot(latn, wq_ref[0, h], preferred_element_type=jnp.float32)
        kx = jnp.dot(xn, wk_ref[0, h], preferred_element_type=jnp.float32)
        vx = jnp.dot(xn, wv_ref[0, h], preferred_element_type=jnp.float32)
        kl = jnp.dot(latn, wk_ref[0, h], preferred_element_type=jnp.float32)
        vl = jnp.dot(latn, wv_ref[0, h], preferred_element_type=jnp.float32)
        q = q.reshape(bt, n_lat, DHEAD).astype(jnp.bfloat16)
        kx = kx.reshape(bt, n_med, DHEAD).astype(jnp.bfloat16)
        vx = vx.reshape(bt, n_med, DHEAD).astype(jnp.bfloat16)
        kl = kl.reshape(bt, n_lat, DHEAD).astype(jnp.bfloat16)
        vl = vl.reshape(bt, n_lat, DHEAD).astype(jnp.bfloat16)
        s_x = jnp.einsum("bqd,bkd->bqk", q, kx, preferred_element_type=jnp.float32)
        s_l = jnp.einsum("bqd,bkd->bqk", q, kl, preferred_element_type=jnp.float32)
        m = jnp.maximum(jnp.max(s_x, axis=-1, keepdims=True),
                        jnp.max(s_l, axis=-1, keepdims=True))
        p_x = jnp.exp(s_x - m)
        p_l = jnp.exp(s_l - m)
        denom = (jnp.sum(p_x, axis=-1, keepdims=True)
                 + jnp.sum(p_l, axis=-1, keepdims=True))
        o = (jnp.einsum("bqk,bkd->bqd", p_x.astype(jnp.bfloat16), vx,
                        preferred_element_type=jnp.float32)
             + jnp.einsum("bqk,bkd->bqd", p_l.astype(jnp.bfloat16), vl,
                          preferred_element_type=jnp.float32)) / denom
        out = out + jnp.dot(o.reshape(bt * n_lat, DHEAD).astype(jnp.bfloat16),
                            wo_ref[0, h], preferred_element_type=jnp.float32)
    return out


# ------------------------------ Pallas kernels ------------------------------
def _perceiver_stack_kernel(xv_ref, lat0_ref, prow_ref, pwq_ref, pwk_ref,
                            pwv_ref, pwo_ref, pfw1_ref, pfw2_ref, pfin_ref,
                            out_ref, lat_vmem):
    """All PerceiverResampler layers fused; grid = (depth,), latents carried
    in a VMEM scratch across the layer loop."""
    li = pl.program_id(0)
    n_layers = pl.num_programs(0)
    bt, nv, d = xv_ref.shape
    n_lat = lat0_ref.shape[0]

    @pl.when(li == 0)
    def _():
        lat_vmem[...] = jnp.broadcast_to(lat0_ref[...][None], (bt, n_lat, d))

    lat2 = lat_vmem[...].reshape(bt * n_lat, d)
    pr = prow_ref[0]                                     # [6, d] packed LN rows

    xn2 = _ln(xv_ref[...].reshape(bt * nv, d), pr[0:1], pr[1:2]).astype(jnp.bfloat16)
    latn2 = _ln(lat2, pr[2:3], pr[3:4]).astype(jnp.bfloat16)

    lat2 = lat2 + _perc_attn(latn2, xn2, pwq_ref, pwk_ref, pwv_ref, pwo_ref,
                             bt, n_lat, nv)

    h2 = _ln(lat2, pr[4:5], pr[5:6]).astype(jnp.bfloat16)
    # TODO(synk): torch nn.GELU() defaults to exact erf; tanh approximation used
    # here (EUP-friendly).
    h2 = jax.nn.gelu(jnp.dot(h2, pfw1_ref[0], preferred_element_type=jnp.float32),
                     approximate=True).astype(jnp.bfloat16)
    lat2 = lat2 + jnp.dot(h2, pfw2_ref[0], preferred_element_type=jnp.float32)

    lat_vmem[...] = lat2.reshape(bt, n_lat, d)

    @pl.when(li == n_layers - 1)
    def _():
        fr = pfin_ref[...]
        out_ref[...] = _ln(lat2, fr[0:1], fr[1:2]).reshape(bt, n_lat, d)


def _lm_stack_kernel(emb_ref, media_ref, tt_ref, mt_ref, gates_ref,
                     xrow_ref, xwq_ref, xwk_ref, xwv_ref, xwo_ref,
                     xfw1_ref, xfw2_ref,
                     drow_ref, dwq_ref, dwk_ref, dwv_ref, dbqkv_ref,
                     dwo_ref, dw1_ref, db1_ref, dw2_ref,
                     fin_ref, lmw_ref, lmb_ref,
                     hid_ref, logit_ref, x_vmem):
    """One (gated cross-attn block + causal decoder layer) per grid step,
    residual stream carried in VMEM scratch; final LN + LM head fused into the
    last step.  Batch is folded into the block (batched einsum attention)."""
    li = pl.program_id(0)
    n_layers = pl.num_programs(0)
    b, t, d = x_vmem.shape
    tmn = media_ref.shape[1]

    @pl.when(li == 0)
    def _():
        x_vmem[...] = emb_ref[...]

    x2 = x_vmem[...].reshape(b * t, d)

    # immediate-media mask built in-kernel from tiny int32 tables
    tt = tt_ref[...]                                     # [b, t, 1]
    mt = mt_ref[...][None]                               # [1, 1, tmn]
    xbias = jnp.where(tt == mt, 0.0, NEG_INF)            # [b, t, tmn]
    has_media = (tt > 0).astype(jnp.float32).reshape(b * t, 1)

    # ---------------- gated cross-attention block ----------------
    xr = xrow_ref[0]                                     # [4, d] packed LN rows
    g_attn = gates_ref[li, 0]                            # tanh(attn_gate), SMEM
    g_ff = gates_ref[li, 1]                              # tanh(ff_gate),   SMEM

    xn2 = _ln(x2, xr[0:1], xr[1:2]).astype(jnp.bfloat16)
    media2 = media_ref[...].reshape(b * tmn, media_ref.shape[2]).astype(jnp.bfloat16)
    attn = _mha(xn2, media2, xwq_ref, xwk_ref, xwv_ref, xwo_ref, xbias, b, t, tmn)
    x2 = x2 + g_attn * (attn * has_media)

    h2 = _ln(x2, xr[2:3], xr[3:4]).astype(jnp.bfloat16)
    h2 = jax.nn.gelu(jnp.dot(h2, xfw1_ref[0], preferred_element_type=jnp.float32),
                     approximate=True).astype(jnp.bfloat16)
    x2 = x2 + g_ff * jnp.dot(h2, xfw2_ref[0], preferred_element_type=jnp.float32)

    # ------------------- causal decoder layer --------------------
    dr = drow_ref[0]                                     # [6, d] packed rows
    hn2 = _ln(x2, dr[0:1], dr[1:2]).astype(jnp.bfloat16)

    row = lax.broadcasted_iota(jnp.int32, (t, t), 0)
    col = lax.broadcasted_iota(jnp.int32, (t, t), 1)
    causal = jnp.where(row >= col, 0.0, NEG_INF)[None]   # [1, t, t]
    # TODO(synk): at real seq length tile this flash-style (Tq x Tk grid,
    # per-tile iota offset by program_id, pl.when early-out on masked tiles).

    sattn = _mha(hn2, hn2, dwq_ref, dwk_ref, dwv_ref, dwo_ref, causal, b, t, t,
                 qkv_bias=(dbqkv_ref[0, 0], dbqkv_ref[0, 1], dbqkv_ref[0, 2]))
    x2 = x2 + sattn + dr[4:5]                            # + out-proj bias

    h2 = _ln(x2, dr[2:3], dr[3:4]).astype(jnp.bfloat16)
    h2 = jax.nn.gelu(jnp.dot(h2, dw1_ref[0], preferred_element_type=jnp.float32)
                     + db1_ref[0], approximate=True).astype(jnp.bfloat16)
    x2 = x2 + jnp.dot(h2, dw2_ref[0], preferred_element_type=jnp.float32) + dr[5:6]

    x_vmem[...] = x2.reshape(b, t, d)

    # ------------- final LN + LM head on the last layer -----------
    @pl.when(li == n_layers - 1)
    def _():
        fr = fin_ref[...]                                # [2, d]
        hfin = _ln(x2, fr[0:1], fr[1:2])
        hid_ref[...] = hfin.reshape(b, t, d)
        logits = jnp.dot(hfin.astype(jnp.bfloat16), lmw_ref[...],
                         preferred_element_type=jnp.float32) + lmb_ref[...]
        logit_ref[...] = logits.reshape(b, t, lmw_ref.shape[1])


def _cls_heads_kernel(f1_ref, f2_ref, w1_ref, b1_ref, w2_ref, b2_ref,
                      o1_ref, o2_ref):
    """Both classification heads; weights padded to 128 lanes (lane-dense)."""
    o1_ref[...] = jnp.dot(f1_ref[...].astype(jnp.bfloat16), w1_ref[...],
                          preferred_element_type=jnp.float32) + b1_ref[...]
    o2_ref[...] = jnp.dot(f2_ref[...].astype(jnp.bfloat16), w2_ref[...],
                          preferred_element_type=jnp.float32) + b2_ref[...]


# ------------------------------ pallas_call wrappers -------------------------
def _resident_spec(shape):
    """Whole-array block, DMA'd once and kept resident across the layer loop."""
    nd = len(shape)
    return pl.BlockSpec(tuple(shape), lambda l: (0,) * nd)


def _per_layer_spec(shape):
    """Leading axis indexed by the layer grid step; rest of the array per block."""
    nd = len(shape)
    return pl.BlockSpec((1,) + tuple(shape[1:]),
                        lambda l: (l,) + (0,) * (nd - 1))


def perceiver_call(xv, p):
    bt, nv, d = xv.shape
    n_lat = p["latents"].shape[0]
    depth = p["pwq"].shape[0]
    resident = [xv, p["latents"]]
    per_layer = [p["rows"], p["pwq"], p["pwk"], p["pwv"], p["pwo"],
                 p["pfw1"], p["pfw2"]]
    tail = [p["final_rows"]]
    in_specs = ([_resident_spec(a.shape) for a in resident]
                + [_per_layer_spec(a.shape) for a in per_layer]
                + [_resident_spec(a.shape) for a in tail])
    return pl.pallas_call(
        _perceiver_stack_kernel,
        out_shape=jax.ShapeDtypeStruct((bt, n_lat, d), jnp.float32),
        grid=(depth,),
        in_specs=in_specs,
        out_specs=_resident_spec((bt, n_lat, d)),
        scratch_shapes=[pltpu.VMEM((bt, n_lat, d), jnp.float32)],
        compiler_params=pltpu.CompilerParams(dimension_semantics=("arbitrary",)),
    )(*(resident + per_layer + tail))


def lm_stack_call(emb, media, ttime, mtime, gates, lp, head):
    b, t, d = emb.shape
    vocab = head["lm_w"].shape[1]
    n_layers = lp["xwq"].shape[0]

    resident = [emb, media, ttime, mtime]
    per_layer = [lp["xrows"], lp["xwq"], lp["xwk"], lp["xwv"], lp["xwo"],
                 lp["xfw1"], lp["xfw2"],
                 lp["drows"], lp["dwq"], lp["dwk"], lp["dwv"], lp["dbqkv"],
                 lp["dwo"], lp["dw1"], lp["db1"], lp["dw2"]]
    tail = [head["fin_rows"], head["lm_w"], head["lm_b"]]

    in_specs = ([_resident_spec(a.shape) for a in resident]
                + [pl.BlockSpec(memory_space=pltpu.MemorySpace.SMEM)]
                + [_per_layer_spec(a.shape) for a in per_layer]
                + [_resident_spec(a.shape) for a in tail])

    return pl.pallas_call(
        _lm_stack_kernel,
        out_shape=(jax.ShapeDtypeStruct((b, t, d), jnp.float32),
                   jax.ShapeDtypeStruct((b, t, vocab), jnp.float32)),
        grid=(n_layers,),
        in_specs=in_specs,
        out_specs=(_resident_spec((b, t, d)), _resident_spec((b, t, vocab))),
        scratch_shapes=[pltpu.VMEM((b, t, d), jnp.float32)],
        compiler_params=pltpu.CompilerParams(dimension_semantics=("arbitrary",)),
    )(*(resident + [gates] + per_layer + tail))


def cls_heads_call(feats1, feats2, head):
    b, d = feats1.shape
    args = [feats1, feats2, head["cls1_w"], head["cls1_b"],
            head["cls2_w"], head["cls2_b"]]
    return pl.pallas_call(
        _cls_heads_kernel,
        out_shape=(jax.ShapeDtypeStruct((b, CLS_PAD), jnp.float32),
                   jax.ShapeDtypeStruct((b, CLS_PAD), jnp.float32)),
        grid=(1,),
        in_specs=[_resident_spec(a.shape) for a in args],
        out_specs=(_resident_spec((b, CLS_PAD)), _resident_spec((b, CLS_PAD))),
    )(*args)


# ------------------------------- Flamingo forward ----------------------------
def flamingo_forward(params, vision_x, lang_x):
    """
    vision_x: [B, T_img, V, D_vis]  (precomputed image embeddings)
    lang_x:   [B, T_txt] int32 token ids
    Returns dict with 'logits', 'hidden_states', 'cls_logits1', 'cls_logits2'
    (cls_type='both').
    """
    bb, tm, v, d = vision_x.shape
    tt = lang_x.shape[1]

    # ---- _encode_vision_x: PerceiverResampler (all layers in one kernel) ----
    xv = vision_x.reshape(bb * tm, v, d)                 # F=1 folded into V
    media = perceiver_call(xv, params["perceiver"])      # [B*Tm, n, D]
    media = media.reshape(bb, tm * N_LATENTS, d)

    # ---- _condition_media_locations: tiny scalar tables ----
    media_locations = lang_x == MEDIA_TOKEN_ID
    text_time = jnp.cumsum(media_locations.astype(jnp.int32), axis=1)
    ttime = text_time.reshape(bb, tt, 1)                           # [B, Tt, 1]
    mtime = jnp.repeat(jnp.arange(1, tm + 1, dtype=jnp.int32),
                       N_LATENTS).reshape(1, tm * N_LATENTS)       # [1, Tm*n]

    # tanh of the per-layer gates (2*L scalar ops) -> one SMEM table
    gates = jnp.tanh(params["lang"]["gates"])

    # token embedding
    # TODO(synk): fuse this gather into the LM kernel via PrefetchScalarGridSpec
    # + pl.Element row-gather on tok_emb at real T/D.
    emb = jnp.take(params["tok_emb"], lang_x, axis=0)              # [B, Tt, D]

    # ---- language stack (xattn + decoder per layer + final LN + LM head) ----
    hidden, logits = lm_stack_call(emb, media, ttime, mtime, gates,
                                   params["lang"], params["head"])

    # ---- classification heads (cls_type == 'both') ----
    # TODO(synk): torch raises ValueError if a <cls> token is missing; argmax
    # silently returns position 0 - the caller must guarantee one per sample.
    cls1_pos = jnp.argmax((lang_x == CLS1_TOKEN_ID).astype(jnp.int32), axis=1)
    cls2_pos = jnp.argmax((lang_x == CLS2_TOKEN_ID).astype(jnp.int32), axis=1)
    feats1 = jnp.take_along_axis(hidden, cls1_pos[:, None, None], axis=1)[:, 0, :]
    feats2 = jnp.take_along_axis(hidden, cls2_pos[:, None, None], axis=1)[:, 0, :]
    o1p, o2p = cls_heads_call(feats1, feats2, params["head"])

    # TODO(synk): HF generate()/KV-cache/tokenizer plumbing, attention_mask and
    # AR loss (labels) have no Pallas equivalent; only the dense forward is here.
    return {
        "logits": logits,
        "hidden_states": hidden,
        "cls_logits1": o1p[:, :NUM_ORGAN],
        "cls_logits2": o2p[:, :NUM_DIAG],
    }


# ------------------------------- parameter init ------------------------------
def init_params(key):
    keys = iter(jax.random.split(key, 64))

    def nrm_f32(shape, std=0.02):
        return jax.random.normal(next(keys), shape, jnp.float32) * std

    def nrm(shape, std=0.02):
        return nrm_f32(shape, std).astype(jnp.bfloat16)

    ones = lambda n: jnp.ones((n,), jnp.float32)
    zeros = lambda n: jnp.zeros((n,), jnp.float32)

    # packed LayerNorm rows: [ln_m_g, ln_m_b, ln_l_g, ln_l_b, ff_ln_g, ff_ln_b]
    p_row = jnp.stack([ones(VIS_DIM), zeros(VIS_DIM)] * 3)
    perceiver = {
        "latents": nrm_f32((N_LATENTS, VIS_DIM), std=1.0),
        "rows": jnp.tile(p_row[None], (PERC_DEPTH, 1, 1)),
        "pwq": (nrm_f32((PERC_DEPTH, HEADS, VIS_DIM, DHEAD)) * SCALE).astype(jnp.bfloat16),
        "pwk": nrm((PERC_DEPTH, HEADS, VIS_DIM, DHEAD)),
        "pwv": nrm((PERC_DEPTH, HEADS, VIS_DIM, DHEAD)),
        "pwo": nrm((PERC_DEPTH, HEADS, DHEAD, VIS_DIM)),
        "pfw1": nrm((PERC_DEPTH, VIS_DIM, FF_DIM_V)),
        "pfw2": nrm((PERC_DEPTH, FF_DIM_V, VIS_DIM)),
        "final_rows": jnp.stack([ones(VIS_DIM), zeros(VIS_DIM)]),
    }

    # packed rows: xattn [ln_g, ln_b, ff_ln_g, ff_ln_b]
    x_row = jnp.stack([ones(LANG_DIM), zeros(LANG_DIM)] * 2)
    # decoder [ln1_g, ln1_b, ln2_g, ln2_b, bo, b2]
    d_row = jnp.stack([ones(LANG_DIM), zeros(LANG_DIM), ones(LANG_DIM),
                       zeros(LANG_DIM), zeros(LANG_DIM), zeros(LANG_DIM)])
    L = N_LANG_LAYERS
    lang = {
        # torch initializes the tanh-gated residual gates to 0 (no-op cross-attn)
        "gates": jnp.zeros((L, 2), jnp.float32),
        "xrows": jnp.tile(x_row[None], (L, 1, 1)),
        "xwq": (nrm_f32((L, HEADS, LANG_DIM, DHEAD)) * SCALE).astype(jnp.bfloat16),
        "xwk": nrm((L, HEADS, VIS_DIM, DHEAD)),
        "xwv": nrm((L, HEADS, VIS_DIM, DHEAD)),
        "xwo": nrm((L, HEADS, DHEAD, LANG_DIM)),
        "xfw1": nrm((L, LANG_DIM, FF_DIM)),
        "xfw2": nrm((L, FF_DIM, LANG_DIM)),
        "drows": jnp.tile(d_row[None], (L, 1, 1)),
        "dwq": (nrm_f32((L, HEADS, LANG_DIM, DHEAD)) * SCALE).astype(jnp.bfloat16),
        "dwk": nrm((L, HEADS, LANG_DIM, DHEAD)),
        "dwv": nrm((L, HEADS, LANG_DIM, DHEAD)),
        "dbqkv": jnp.zeros((L, 3, HEADS, DHEAD), jnp.float32),  # q-bias pre-scaled (=0)
        "dwo": nrm((L, HEADS, DHEAD, LANG_DIM)),
        "dw1": nrm((L, LANG_DIM, FF_DIM)),
        "db1": jnp.zeros((L, 1, FF_DIM), jnp.float32),
        "dw2": nrm((L, FF_DIM, LANG_DIM)),
    }

    head = {
        "fin_rows": jnp.stack([ones(LANG_DIM), zeros(LANG_DIM)]),
        "lm_w": nrm((LANG_DIM, VOCAB)),
        "lm_b": jnp.zeros((1, VOCAB), jnp.float32),
        "cls1_w": jnp.pad(nrm_f32((LANG_DIM, NUM_ORGAN)),
                          ((0, 0), (0, CLS_PAD - NUM_ORGAN))).astype(jnp.bfloat16),
        "cls1_b": jnp.zeros((1, CLS_PAD), jnp.float32),
        "cls2_w": jnp.pad(nrm_f32((LANG_DIM, NUM_DIAG)),
                          ((0, 0), (0, CLS_PAD - NUM_DIAG))).astype(jnp.bfloat16),
        "cls2_b": jnp.zeros((1, CLS_PAD), jnp.float32),
    }

    return {
        "perceiver": perceiver,
        "tok_emb": nrm_f32((VOCAB, LANG_DIM)),
        "lang": lang,
        "head": head,
    }


# ----------------------------------- main ------------------------------------
if __name__ == "__main__":
    key = jax.random.PRNGKey(0)
    k_params, k_vis = jax.random.split(key)

    params = init_params(k_params)
    # torch initializes the tanh gates to 0 (cross-attn contributes nothing at
    # init); bump them here so this smoke test exercises the gated path.
    params["lang"]["gates"] = jnp.full((N_LANG_LAYERS, 2), 0.5, jnp.float32)

    # vision_x: precomputed image embeddings [B, T_img, V, D]
    vision_x = jax.random.normal(k_vis, (B, T_IMG, V_TOK, VIS_DIM), jnp.float32)

    # lang_x: <image> at pos 0, <cls1> at pos 6, <cls2> at pos 7
    lang_x = jnp.array(
        [[MEDIA_TOKEN_ID, 10, 11, 12, 13, 14, CLS1_TOKEN_ID, CLS2_TOKEN_ID],
         [MEDIA_TOKEN_ID, 20, 21, 22, 23, 24, CLS1_TOKEN_ID, CLS2_TOKEN_ID]],
        dtype=jnp.int32,
    )

    fwd = jax.jit(flamingo_forward)
    out = fwd(params, vision_x, lang_x)
    jax.block_until_ready(out)

    assert out["logits"].shape == (B, T_TXT, VOCAB)
    assert out["hidden_states"].shape == (B, T_TXT, LANG_DIM)
    assert out["cls_logits1"].shape == (B, NUM_ORGAN)
    assert out["cls_logits2"].shape == (B, NUM_DIAG)
    assert bool(jnp.all(jnp.isfinite(out["logits"])))
    assert bool(jnp.all(jnp.isfinite(out["hidden_states"])))
    assert bool(jnp.all(jnp.isfinite(out["cls_logits1"])))
    assert bool(jnp.all(jnp.isfinite(out["cls_logits2"])))

    print("KERNEL_OK")
</pallas_src>

<mosaic_0001>
module attributes {stable_mosaic.version = 11 : i64} {
  func.func @_perceiver_stack_kernel(%arg0: i32, %arg1: memref<2x4x32xf32, #tpu.memory_space<vmem>>, %arg2: memref<4x32xf32, #tpu.memory_space<vmem>>, %arg3: memref<1x6x32xf32, #tpu.memory_space<vmem>>, %arg4: memref<1x2x32x16xbf16, #tpu.memory_space<vmem>>, %arg5: memref<1x2x32x16xbf16, #tpu.memory_space<vmem>>, %arg6: memref<1x2x32x16xbf16, #tpu.memory_space<vmem>>, %arg7: memref<1x2x16x32xbf16, #tpu.memory_space<vmem>>, %arg8: memref<1x32x128xbf16, #tpu.memory_space<vmem>>, %arg9: memref<1x128x32xbf16, #tpu.memory_space<vmem>>, %arg10: memref<2x32xf32, #tpu.memory_space<vmem>>, %arg11: memref<2x4x32xf32, #tpu.memory_space<vmem>>, %arg12: memref<2x4x32xf32, #tpu.memory_space<vmem>>) attributes {dimension_semantics = [#tpu.dimension_semantics<arbitrary>], iteration_bounds = array<i64: 2>, scalar_prefetch = 0 : i64, scratch_operands = 1 : i64, tpu.core_type = #tpu.core_type<tc>, window_params = [{pipeline_mode = #tpu.pipeline_mode<synchronous>, transform_indices = @transform_0, window_bounds = array<i64: 2, 4, 32>}, {pipeline_mode = #tpu.pipeline_mode<synchronous>, transform_indices = @transform_1, window_bounds = array<i64: 4, 32>}, {transform_indices = @transform_2, window_bounds = array<i64: 1, 6, 32>}, {transform_indices = @transform_3, window_bounds = array<i64: 1, 2, 32, 16>}, {transform_indices = @transform_4, window_bounds = array<i64: 1, 2, 32, 16>}, {transform_indices = @transform_5, window_bounds = array<i64: 1, 2, 32, 16>}, {transform_indices = @transform_6, window_bounds = array<i64: 1, 2, 16, 32>}, {transform_indices = @transform_7, window_bounds = array<i64: 1, 32, 128>}, {transform_indices = @transform_8, window_bounds = array<i64: 1, 128, 32>}, {pipeline_mode = #tpu.pipeline_mode<synchronous>, transform_indices = @transform_9, window_bounds = array<i64: 2, 32>}, {pipeline_mode = #tpu.pipeline_mode<synchronous>, transform_indices = @transform_10, window_bounds = array<i64: 2, 4, 32>}]} {
    %c0_i32 = arith.constant 0 : i32
    %0 = arith.cmpi eq, %arg0, %c0_i32 : i32
    %1 = arith.extui %0 : i1 to i32
    %c0_i32_0 = arith.constant 0 : i32
    %2 = arith.cmpi ne, %1, %c0_i32_0 : i32
    scf.if %2 {
      %c0_115 = arith.constant 0 : index
      %c0_116 = arith.constant 0 : index
      %224 = vector.load %arg2[%c0_115, %c0_116] : memref<4x32xf32, #tpu.memory_space<vmem>>, vector<4x32xf32>
      %225 = vector.shape_cast %224 : vector<4x32xf32> to vector<1x4x32xf32>
      %226 = vector.shape_cast %225 : vector<1x4x32xf32> to vector<1x4x32xf32>
      %227 = vector.broadcast %226 : vector<1x4x32xf32> to vector<2x4x32xf32>
      %c0_117 = arith.constant 0 : index
      %c0_118 = arith.constant 0 : index
      %c0_119 = arith.constant 0 : index
      %228 = vector.load %arg12[%c0_117, %c0_118, %c0_119] : memref<2x4x32xf32, #tpu.memory_space<vmem>>, vector<2x4x32xf32>
      tpu.vector_store %arg12[%c0_117, %c0_118, %c0_119], %227 {strides = array<i32>} : memref<2x4x32xf32, #tpu.memory_space<vmem>>, vector<2x4x32xf32>,
    } else {
    }
    %c0 = arith.constant 0 : index
    %c0_1 = arith.constant 0 : index
    %c0_2 = arith.constant 0 : index
    %3 = vector.load %arg12[%c0, %c0_1, %c0_2] : memref<2x4x32xf32, #tpu.memory_space<vmem>>, vector<2x4x32xf32>
    %4 = vector.shape_cast %3 : vector<2x4x32xf32> to vector<8x32xf32>
    %c0_3 = arith.constant 0 : index
    %c0_4 = arith.constant 0 : index
    %c0_5 = arith.constant 0 : index
    %5 = vector.load %arg3[%c0_3, %c0_4, %c0_5] : memref<1x6x32xf32, #tpu.memory_space<vmem>>, vector<1x6x32xf32>
    %6 = vector.shape_cast %5 : vector<1x6x32xf32> to vector<6x32xf32>
    %c0_6 = arith.constant 0 : index
    %c0_7 = arith.constant 0 : index
    %c0_8 = arith.constant 0 : index
    %7 = vector.load %arg1[%c0_6, %c0_7, %c0_8] : memref<2x4x32xf32, #tpu.memory_space<vmem>>, vector<2x4x32xf32>
    %8 = vector.shape_cast %7 : vector<2x4x32xf32> to vector<8x32xf32>
    %9 = vector.extract_strided_slice %6 {offsets = [0, 0], sizes = [1, 32], strides = [1, 1]} : vector<6x32xf32> to vector<1x32xf32>
    %10 = vector.extract_strided_slice %6 {offsets = [1, 0], sizes = [1, 32], strides = [1, 1]} : vector<6x32xf32> to vector<1x32xf32>
    %cst = arith.constant dense<0.000000e+00> : vector<8xf32>
    %11 = vector.multi_reduction <add>, %8, %cst [1] : vector<8x32xf32> to vector<8xf32>
    %12 = vector.shape_cast %11 : vector<8xf32> to vector<8x1xf32>
    %cst_9 = arith.constant 3.200000e+01 : f32
    %13 = vector.broadcast %cst_9 : f32 to vector<8x1xf32>
    %14 = arith.divf %12, %13 : vector<8x1xf32>
    %15 = vector.broadcast %14 : vector<8x1xf32> to vector<8x32xf32>
    %16 = arith.subf %8, %15 : vector<8x32xf32>
    %17 = arith.mulf %16, %16 : vector<8x32xf32>
    %cst_10 = arith.constant dense<0.000000e+00> : vector<8xf32>
    %18 = vector.multi_reduction <add>, %17, %cst_10 [1] : vector<8x32xf32> to vector<8xf32>
    %19 = vector.shape_cast %18 : vector<8xf32> to vector<8x1xf32>
    %cst_11 = arith.constant 3.200000e+01 : f32
    %20 = vector.broadcast %cst_11 : f32 to vector<8x1xf32>
    %21 = arith.divf %19, %20 : vector<8x1xf32>
    %22 = vector.broadcast %14 : vector<8x1xf32> to vector<8x32xf32>
    %23 = arith.subf %8, %22 : vector<8x32xf32>
    %cst_12 = arith.constant 9.99999974E-6 : f32
    %24 = vector.broadcast %cst_12 : f32 to vector<8x1xf32>
    %25 = arith.addf %21, %24 : vector<8x1xf32>
    %26 = math.rsqrt %25 : vector<8x1xf32>
    %27 = vector.broadcast %26 : vector<8x1xf32> to vector<8x32xf32>
    %28 = arith.mulf %23, %27 : vector<8x32xf32>
    %29 = vector.broadcast %9 : vector<1x32xf32> to vector<8x32xf32>
    %30 = arith.mulf %28, %29 : vector<8x32xf32>
    %31 = vector.broadcast %10 : vector<1x32xf32> to vector<8x32xf32>
    %32 = arith.addf %30, %31 : vector<8x32xf32>
    %33 = arith.truncf %32 : vector<8x32xf32> to vector<8x32xbf16>
    %34 = vector.extract_strided_slice %6 {offsets = [2, 0], sizes = [1, 32], strides = [1, 1]} : vector<6x32xf32> to vector<1x32xf32>
    %35 = vector.extract_strided_slice %6 {offsets = [3, 0], sizes = [1, 32], strides = [1, 1]} : vector<6x32xf32> to vector<1x32xf32>
    %cst_13 = arith.constant dense<0.000000e+00> : vector<8xf32>
    %36 = vector.multi_reduction <add>, %4, %cst_13 [1] : vector<8x32xf32> to vector<8xf32>
    %37 = vector.shape_cast %36 : vector<8xf32> to vector<8x1xf32>
    %cst_14 = arith.constant 3.200000e+01 : f32
    %38 = vector.broadcast %cst_14 : f32 to vector<8x1xf32>
    %39 = arith.divf %37, %38 : vector<8x1xf32>
    %40 = vector.broadcast %39 : vector<8x1xf32> to vector<8x32xf32>
    %41 = arith.subf %4, %40 : vector<8x32xf32>
    %42 = arith.mulf %41, %41 : vector<8x32xf32>
    %cst_15 = arith.constant dense<0.000000e+00> : vector<8xf32>
    %43 = vector.multi_reduction <add>, %42, %cst_15 [1] : vector<8x32xf32> to vector<8xf32>
    %44 = vector.shape_cast %43 : vector<8xf32> to vector<8x1xf32>
    %cst_16 = arith.constant 3.200000e+01 : f32
    %45 = vector.broadcast %cst_16 : f32 to vector<8x1xf32>
    %46 = arith.divf %44, %45 : vector<8x1xf32>
    %47 = vector.broadcast %39 : vector<8x1xf32> to vector<8x32xf32>
    %48 = arith.subf %4, %47 : vector<8x32xf32>
    %cst_17 = arith.constant 9.99999974E-6 : f32
    %49 = vector.broadcast %cst_17 : f32 to vector<8x1xf32>
    %50 = arith.addf %46, %49 : vector<8x1xf32>
    %51 = math.rsqrt %50 : vector<8x1xf32>
    %52 = vector.broadcast %51 : vector<8x1xf32> to vector<8x32xf32>
    %53 = arith.mulf %48, %52 : vector<8x32xf32>
    %54 = vector.broadcast %34 : vector<1x32xf32> to vector<8x32xf32>
    %55 = arith.mulf %53, %54 : vector<8x32xf32>
    %56 = vector.broadcast %35 : vector<1x32xf32> to vector<8x32xf32>
    %57 = arith.addf %55, %56 : vector<8x32xf32>
    %58 = arith.truncf %57 : vector<8x32xf32> to vector<8x32xbf16>
    %cst_18 = arith.constant 0.000000e+00 : f32
    %59 = vector.broadcast %cst_18 : f32 to vector<8x32xf32>
    %c0_19 = arith.constant 0 : index
    %c0_20 = arith.constant 0 : index
    %c0_21 = arith.constant 0 : index
    %c0_22 = arith.constant 0 : index
    %60 = vector.load %arg4[%c0_19, %c0_20, %c0_21, %c0_22] : memref<1x2x32x16xbf16, #tpu.memory_space<vmem>>, vector<1x1x32x16xbf16>
    %61 = vector.shape_cast %60 : vector<1x1x32x16xbf16> to vector<32x16xbf16>
    %cst_23 = arith.constant dense<0.000000e+00> : vector<8x16xf32>
    %62 = tpu.matmul %58, %61, %cst_23 {dimension_numbers = #tpu.dot_dimension_numbers<[1], [0], [0], [1], [0, 0, 1, 1], [], []>} : vector<8x32xbf16>, vector<32x16xbf16>, vector<8x16xf32> -> vector<8x16xf32>
    %c0_24 = arith.constant 0 : index
    %c0_25 = arith.constant 0 : index
    %c0_26 = arith.constant 0 : index
    %c0_27 = arith.constant 0 : index
    %63 = vector.load %arg5[%c0_24, %c0_25, %c0_26, %c0_27] : memref<1x2x32x16xbf16, #tpu.memory_space<vmem>>, vector<1x1x32x16xbf16>
    %64 = vector.shape_cast %63 : vector<1x1x32x16xbf16> to vector<32x16xbf16>
    %cst_28 = arith.constant dense<0.000000e+00> : vector<8x16xf32>
    %65 = tpu.matmul %33, %64, %cst_28 {dimension_numbers = #tpu.dot_dimension_numbers<[1], [0], [0], [1], [0, 0, 1, 1], [], []>} : vector<8x32xbf16>, vector<32x16xbf16>, vector<8x16xf32> -> vector<8x16xf32>
    %c0_29 = arith.constant 0 : index
    %c0_30 = arith.constant 0 : index
    %c0_31 = arith.constant 0 : index
    %c0_32 = arith.constant 0 : index
    %66 = vector.load %arg6[%c0_29, %c0_30, %c0_31, %c0_32] : memref<1x2x32x16xbf16, #tpu.memory_space<vmem>>, vector<1x1x32x16xbf16>
    %67 = vector.shape_cast %66 : vector<1x1x32x16xbf16> to vector<32x16xbf16>
    %cst_33 = arith.constant dense<0.000000e+00> : vector<8x16xf32>
    %68 = tpu.matmul %33, %67, %cst_33 {dimension_numbers = #tpu.dot_dimension_numbers<[1], [0], [0], [1], [0, 0, 1, 1], [], []>} : vector<8x32xbf16>, vector<32x16xbf16>, vector<8x16xf32> -> vector<8x16xf32>
    %c0_34 = arith.constant 0 : index
    %c0_35 = arith.constant 0 : index
    %c0_36 = arith.constant 0 : index
    %c0_37 = arith.constant 0 : index
    %69 = vector.load %arg5[%c0_34, %c0_35, %c0_36, %c0_37] : memref<1x2x32x16xbf16, #tpu.memory_space<vmem>>, vector<1x1x32x16xbf16>
    %70 = vector.shape_cast %69 : vector<1x1x32x16xbf16> to vector<32x16xbf16>
    %cst_38 = arith.constant dense<0.000000e+00> : vector<8x16xf32>
    %71 = tpu.matmul %58, %70, %cst_38 {dimension_numbers = #tpu.dot_dimension_numbers<[1], [0], [0], [1], [0, 0, 1, 1], [], []>} : vector<8x32xbf16>, vector<32x16xbf16>, vector<8x16xf32> -> vector<8x16xf32>
    %c0_39 = arith.constant 0 : index
    %c0_40 = arith.constant 0 : index
    %c0_41 = arith.constant 0 : index
    %c0_42 = arith.constant 0 : index
    %72 = vector.load %arg6[%c0_39, %c0_40, %c0_41, %c0_42] : memref<1x2x32x16xbf16, #tpu.memory_space<vmem>>, vector<1x1x32x16xbf16>
    %73 = vector.shape_cast %72 : vector<1x1x32x16xbf16> to vector<32x16xbf16>
    %cst_43 = arith.constant dense<0.000000e+00> : vector<8x16xf32>
    %74 = tpu.matmul %58, %73, %cst_43 {dimension_numbers = #tpu.dot_dimension_numbers<[1], [0], [0], [1], [0, 0, 1, 1], [], []>} : vector<8x32xbf16>, vector<32x16xbf16>, vector<8x16xf32> -> vector<8x16xf32>
    %75 = vector.shape_cast %62 : vector<8x16xf32> to vector<2x4x16xf32>
    %76 = arith.truncf %75 : vector<2x4x16xf32> to vector<2x4x16xbf16>
    %77 = vector.shape_cast %65 : vector<8x16xf32> to vector<2x4x16xf32>
    %78 = arith.truncf %77 : vector<2x4x16xf32> to vector<2x4x16xbf16>
    %79 = vector.shape_cast %68 : vector<8x16xf32> to vector<2x4x16xf32>
    %80 = arith.truncf %79 : vector<2x4x16xf32> to vector<2x4x16xbf16>
    %81 = vector.shape_cast %71 : vector<8x16xf32> to vector<2x4x16xf32>
    %82 = arith.truncf %81 : vector<2x4x16xf32> to vector<2x4x16xbf16>
    %83 = vector.shape_cast %74 : vector<8x16xf32> to vector<2x4x16xf32>
    %84 = arith.truncf %83 : vector<2x4x16xf32> to vector<2x4x16xbf16>
    "tpu.trace_start"() <{level = 10 : i32, message = "bqd,bkd->bqk"}> : () -> ()
    %cst_44 = arith.constant dense<0.000000e+00> : vector<2x4x4xf32>
    %85 = tpu.matmul %76, %78, %cst_44 {dimension_numbers = #tpu.dot_dimension_numbers<[2], [2], [1], [1], [0, 0, 0, 1, 1, 1], [0], [0]>} : vector<2x4x16xbf16>, vector<2x4x16xbf16>, vector<2x4x4xf32> -> vector<2x4x4xf32>
    %cst_45 = arith.constant dense<0.000000e+00> : vector<2x4x4xf32>
    %86 = tpu.matmul %76, %82, %cst_45 {dimension_numbers = #tpu.dot_dimension_numbers<[2], [2], [1], [1], [0, 0, 0, 1, 1, 1], [0], [0]>} : vector<2x4x16xbf16>, vector<2x4x16xbf16>, vector<2x4x4xf32> -> vector<2x4x4xf32>
    "tpu.trace_stop"() : () -> ()
    %cst_46 = arith.constant dense<0xFF800000> : vector<2x4xf32>
    %87 = vector.multi_reduction <maximumf>, %85, %cst_46 [2] : vector<2x4x4xf32> to vector<2x4xf32>
    %88 = vector.shape_cast %87 : vector<2x4xf32> to vector<2x4x1xf32>
    %cst_47 = arith.constant dense<0xFF800000> : vector<2x4xf32>
    %89 = vector.multi_reduction <maximumf>, %86, %cst_47 [2] : vector<2x4x4xf32> to vector<2x4xf32>
    %90 = vector.shape_cast %89 : vector<2x4xf32> to vector<2x4x1xf32>
    %91 = arith.maximumf %88, %90 : vector<2x4x1xf32>
    %92 = vector.broadcast %91 : vector<2x4x1xf32> to vector<2x4x4xf32>
    %93 = arith.subf %85, %92 : vector<2x4x4xf32>
    %94 = math.exp %93 : vector<2x4x4xf32>
    %95 = vector.broadcast %91 : vector<2x4x1xf32> to vector<2x4x4xf32>
    %96 = arith.subf %86, %95 : vector<2x4x4xf32>
    %97 = math.exp %96 : vector<2x4x4xf32>
    %cst_48 = arith.constant dense<0.000000e+00> : vector<2x4xf32>
    %98 = vector.multi_reduction <add>, %94, %cst_48 [2] : vector<2x4x4xf32> to vector<2x4xf32>
    %99 = vector.shape_cast %98 : vector<2x4xf32> to vector<2x4x1xf32>
    %cst_49 = arith.constant dense<0.000000e+00> : vector<2x4xf32>
    %100 = vector.multi_reduction <add>, %97, %cst_49 [2] : vector<2x4x4xf32> to vector<2x4xf32>
    %101 = vector.shape_cast %100 : vector<2x4xf32> to vector<2x4x1xf32>
    %102 = arith.addf %99, %101 : vector<2x4x1xf32>
    %103 = arith.truncf %94 : vector<2x4x4xf32> to vector<2x4x4xbf16>
    "tpu.trace_start"() <{level = 10 : i32, message = "bqk,bkd->bqd"}> : () -> ()
    %cst_50 = arith.constant dense<0.000000e+00> : vector<2x4x16xf32>
    %104 = tpu.matmul %103, %80, %cst_50 {dimension_numbers = #tpu.dot_dimension_numbers<[2], [1], [1], [2], [0, 0, 0, 1, 1, 2], [0], [0]>} : vector<2x4x4xbf16>, vector<2x4x16xbf16>, vector<2x4x16xf32> -> vector<2x4x16xf32>
    "tpu.trace_stop"() : () -> ()
    %105 = arith.truncf %97 : vector<2x4x4xf32> to vector<2x4x4xbf16>
    "tpu.trace_start"() <{level = 10 : i32, message = "bqk,bkd->bqd"}> : () -> ()
    %cst_51 = arith.constant dense<0.000000e+00> : vector<2x4x16xf32>
    %106 = tpu.matmul %105, %84, %cst_51 {dimension_numbers = #tpu.dot_dimension_numbers<[2], [1], [1], [2], [0, 0, 0, 1, 1, 2], [0], [0]>} : vector<2x4x4xbf16>, vector<2x4x16xbf16>, vector<2x4x16xf32> -> vector<2x4x16xf32>
    "tpu.trace_stop"() : () -> ()
    %107 = arith.addf %104, %106 : vector<2x4x16xf32>
    %108 = vector.broadcast %102 : vector<2x4x1xf32> to vector<2x4x16xf32>
    %109 = arith.divf %107, %108 : vector<2x4x16xf32>
    %110 = vector.shape_cast %109 : vector<2x4x16xf32> to vector<8x16xf32>
    %111 = arith.truncf %110 : vector<8x16xf32> to vector<8x16xbf16>
    %c0_52 = arith.constant 0 : index
    %c0_53 = arith.constant 0 : index
    %c0_54 = arith.constant 0 : index
    %c0_55 = arith.constant 0 : index
    %112 = vector.load %arg7[%c0_52, %c0_53, %c0_54, %c0_55] : memref<1x2x16x32xbf16, #tpu.memory_space<vmem>>, vector<1x1x16x32xbf16>
    %113 = vector.shape_cast %112 : vector<1x1x16x32xbf16> to vector<16x32xbf16>
    %cst_56 = arith.constant dense<0.000000e+00> : vector<8x32xf32>
    %114 = tpu.matmul %111, %113, %cst_56 {dimension_numbers = #tpu.dot_dimension_numbers<[1], [0], [0], [1], [0, 0, 1, 1], [], []>} : vector<8x16xbf16>, vector<16x32xbf16>, vector<8x32xf32> -> vector<8x32xf32>
    %115 = arith.addf %59, %114 : vector<8x32xf32>
    %c0_57 = arith.constant 0 : index
    %c1 = arith.constant 1 : index
    %c0_58 = arith.constant 0 : index
    %c0_59 = arith.constant 0 : index
    %116 = vector.load %arg4[%c0_57, %c1, %c0_58, %c0_59] : memref<1x2x32x16xbf16, #tpu.memory_space<vmem>>, vector<1x1x32x16xbf16>
    %117 = vector.shape_cast %116 : vector<1x1x32x16xbf16> to vector<32x16xbf16>
    %cst_60 = arith.constant dense<0.000000e+00> : vector<8x16xf32>
    %118 = tpu.matmul %58, %117, %cst_60 {dimension_numbers = #tpu.dot_dimension_numbers<[1], [0], [0], [1], [0, 0, 1, 1], [], []>} : vector<8x32xbf16>, vector<32x16xbf16>, vector<8x16xf32> -> vector<8x16xf32>
    %c0_61 = arith.constant 0 : index
    %c1_62 = arith.constant 1 : index
    %c0_63 = arith.constant 0 : index
    %c0_64 = arith.constant 0 : index
    %119 = vector.load %arg5[%c0_61, %c1_62, %c0_63, %c0_64] : memref<1x2x32x16xbf16, #tpu.memory_space<vmem>>, vector<1x1x32x16xbf16>
    %120 = vector.shape_cast %119 : vector<1x1x32x16xbf16> to vector<32x16xbf16>
    %cst_65 = arith.constant dense<0.000000e+00> : vector<8x16xf32>
    %121 = tpu.matmul %33, %120, %cst_65 {dimension_numbers = #tpu.dot_dimension_numbers<[1], [0], [0], [1], [0, 0, 1, 1], [], []>} : vector<8x32xbf16>, vector<32x16xbf16>, vector<8x16xf32> -> vector<8x16xf32>
    %c0_66 = arith.constant 0 : index
    %c1_67 = arith.constant 1 : index
    %c0_68 = arith.constant 0 : index
    %c0_69 = arith.constant 0 : index
    %122 = vector.load %arg6[%c0_66, %c1_67, %c0_68, %c0_69] : memref<1x2x32x16xbf16, #tpu.memory_space<vmem>>, vector<1x1x32x16xbf16>
    %123 = vector.shape_cast %122 : vector<1x1x32x16xbf16> to vector<32x16xbf16>
    %cst_70 = arith.constant dense<0.000000e+00> : vector<8x16xf32>
    %124 = tpu.matmul %33, %123, %cst_70 {dimension_numbers = #tpu.dot_dimension_numbers<[1], [0], [0], [1], [0, 0, 1, 1], [], []>} : vector<8x32xbf16>, vector<32x16xbf16>, vector<8x16xf32> -> vector<8x16xf32>
    %c0_71 = arith.constant 0 : index
    %c1_72 = arith.constant 1 : index
    %c0_73 = arith.constant 0 : index
    %c0_74 = arith.constant 0 : index
    %125 = vector.load %arg5[%c0_71, %c1_72, %c0_73, %c0_74] : memref<1x2x32x16xbf16, #tpu.memory_space<vmem>>, vector<1x1x32x16xbf16>
    %126 = vector.shape_cast %125 : vector<1x1x32x16xbf16> to vector<32x16xbf16>
    %cst_75 = arith.constant dense<0.000000e+00> : vector<8x16xf32>
    %127 = tpu.matmul %58, %126, %cst_75 {dimension_numbers = #tpu.dot_dimension_numbers<[1], [0], [0], [1], [0, 0, 1, 1], [], []>} : vector<8x32xbf16>, vector<32x16xbf16>, vector<8x16xf32> -> vector<8x16xf32>
    %c0_76 = arith.constant 0 : index
    %c1_77 = arith.constant 1 : index
    %c0_78 = arith.constant 0 : index
    %c0_79 = arith.constant 0 : index
    %128 = vector.load %arg6[%c0_76, %c1_77, %c0_78, %c0_79] : memref<1x2x32x16xbf16, #tpu.memory_space<vmem>>, vector<1x1x32x16xbf16>
    %129 = vector.shape_cast %128 : vector<1x1x32x16xbf16> to vector<32x16xbf16>
    %cst_80 = arith.constant dense<0.000000e+00> : vector<8x16xf32>
    %130 = tpu.matmul %58, %129, %cst_80 {dimension_numbers = #tpu.dot_dimension_numbers<[1], [0], [0], [1], [0, 0, 1, 1], [], []>} : vector<8x32xbf16>, vector<32x16xbf16>, vector<8x16xf32> -> vector<8x16xf32>
    %131 = vector.shape_cast %118 : vector<8x16xf32> to vector<2x4x16xf32>
    %132 = arith.truncf %131 : vector<2x4x16xf32> to vector<2x4x16xbf16>
    %133 = vector.shape_cast %121 : vector<8x16xf32> to vector<2x4x16xf32>
    %134 = arith.truncf %133 : vector<2x4x16xf32> to vector<2x4x16xbf16>
    %135 = vector.shape_cast %124 : vector<8x16xf32> to vector<2x4x16xf32>
    %136 = arith.truncf %135 : vector<2x4x16xf32> to vector<2x4x16xbf16>
    %137 = vector.shape_cast %127 : vector<8x16xf32> to vector<2x4x16xf32>
    %138 = arith.truncf %137 : vector<2x4x16xf32> to vector<2x4x16xbf16>
    %139 = vector.shape_cast %130 : vector<8x16xf32> to vector<2x4x16xf32>
    %140 = arith.truncf %139 : vector<2x4x16xf32> to vector<2x4x16xbf16>
    "tpu.trace_start"() <{level = 10 : i32, message = "bqd,bkd->bqk"}> : () -> ()
    %cst_81 = arith.constant dense<0.000000e+00> : vector<2x4x4xf32>
    %141 = tpu.matmul %132, %134, %cst_81 {dimension_numbers = #tpu.dot_dimension_numbers<[2], [2], [1], [1], [0, 0, 0, 1, 1, 1], [0], [0]>} : vector<2x4x16xbf16>, vector<2x4x16xbf16>, vector<2x4x4xf32> -> vector<2x4x4xf32>
    %cst_82 = arith.constant dense<0.000000e+00> : vector<2x4x4xf32>
    %142 = tpu.matmul %132, %138, %cst_82 {dimension_numbers = #tpu.dot_dimension_numbers<[2], [2], [1], [1], [0, 0, 0, 1, 1, 1], [0], [0]>} : vector<2x4x16xbf16>, vector<2x4x16xbf16>, vector<2x4x4xf32> -> vector<2x4x4xf32>
    "tpu.trace_stop"() : () -> ()
    %cst_83 = arith.constant dense<0xFF800000> : vector<2x4xf32>
    %143 = vector.multi_reduction <maximumf>, %141, %cst_83 [2] : vector<2x4x4xf32> to vector<2x4xf32>
    %144 = vector.shape_cast %143 : vector<2x4xf32> to vector<2x4x1xf32>
    %cst_84 = arith.constant dense<0xFF800000> : vector<2x4xf32>
    %145 = vector.multi_reduction <maximumf>, %142, %cst_84 [2] : vector<2x4x4xf32> to vector<2x4xf32>
    %146 = vector.shape_cast %145 : vector<2x4xf32> to vector<2x4x1xf32>
    %147 = arith.maximumf %144, %146 : vector<2x4x1xf32>
    %148 = vector.broadcast %147 : vector<2x4x1xf32> to vector<2x4x4xf32>
    %149 = arith.subf %141, %148 : vector<2x4x4xf32>
    %150 = math.exp %149 : vector<2x4x4xf32>
    %151 = vector.broadcast %147 : vector<2x4x1xf32> to vector<2x4x4xf32>
    %152 = arith.subf %142, %151 : vector<2x4x4xf32>
    %153 = math.exp %152 : vector<2x4x4xf32>
    %cst_85 = arith.constant dense<0.000000e+00> : vector<2x4xf32>
    %154 = vector.multi_reduction <add>, %150, %cst_85 [2] : vector<2x4x4xf32> to vector<2x4xf32>
    %155 = vector.shape_cast %154 : vector<2x4xf32> to vector<2x4x1xf32>
    %cst_86 = arith.constant dense<0.000000e+00> : vector<2x4xf32>
    %156 = vector.multi_reduction <add>, %153, %cst_86 [2] : vector<2x4x4xf32> to vector<2x4xf32>
    %157 = vector.shape_cast %156 : vector<2x4xf32> to vector<2x4x1xf32>
    %158 = arith.addf %155, %157 : vector<2x4x1xf32>
    %159 = arith.truncf %150 : vector<2x4x4xf32> to vector<2x4x4xbf16>
    "tpu.trace_start"() <{level = 10 : i32, message = "bqk,bkd->bqd"}> : () -> ()
    %cst_87 = arith.constant dense<0.000000e+00> : vector<2x4x16xf32>
    %160 = tpu.matmul %159, %136, %cst_87 {dimension_numbers = #tpu.dot_dimension_numbers<[2], [1], [1], [2], [0, 0, 0, 1, 1, 2], [0], [0]>} : vector<2x4x4xbf16>, vector<2x4x16xbf16>, vector<2x4x16xf32> -> vector<2x4x16xf32>
    "tpu.trace_stop"() : () -> ()
    %161 = arith.truncf %153 : vector<2x4x4xf32> to vector<2x4x4xbf16>
    "tpu.trace_start"() <{level = 10 : i32, message = "bqk,bkd->bqd"}> : () -> ()
    %cst_88 = arith.constant dense<0.000000e+00> : vector<2x4x16xf32>
    %162 = tpu.matmul %161, %140, %cst_88 {dimension_numbers = #tpu.dot_dimension_numbers<[2], [1], [1], [2], [0, 0, 0, 1, 1, 2], [0], [0]>} : vector<2x4x4xbf16>, vector<2x4x16xbf16>, vector<2x4x16xf32> -> vector<2x4x16xf32>
    "tpu.trace_stop"() : () -> ()
    %163 = arith.addf %160, %162 : vector<2x4x16xf32>
    %164 = vector.broadcast %158 : vector<2x4x1xf32> to vector<2x4x16xf32>
    %165 = arith.divf %163, %164 : vector<2x4x16xf32>
    %166 = vector.shape_cast %165 : vector<2x4x16xf32> to vector<8x16xf32>
    %167 = arith.truncf %166 : vector<8x16xf32> to vector<8x16xbf16>
    %c0_89 = arith.constant 0 : index
    %c1_90 = arith.constant 1 : index
    %c0_91 = arith.constant 0 : index
    %c0_92 = arith.constant 0 : index
    %168 = vector.load %arg7[%c0_89, %c1_90, %c0_91, %c0_92] : memref<1x2x16x32xbf16, #tpu.memory_space<vmem>>, vector<1x1x16x32xbf16>
    %169 = vector.shape_cast %168 : vector<1x1x16x32xbf16> to vector<16x32xbf16>
    %cst_93 = arith.constant dense<0.000000e+00> : vector<8x32xf32>
    %170 = tpu.matmul %167, %169, %cst_93 {dimension_numbers = #tpu.dot_dimension_numbers<[1], [0], [0], [1], [0, 0, 1, 1], [], []>} : vector<8x16xbf16>, vector<16x32xbf16>, vector<8x32xf32> -> vector<8x32xf32>
    %171 = arith.addf %115, %170 : vector<8x32xf32>
    %172 = arith.addf %4, %171 : vector<8x32xf32>
    %173 = vector.extract_strided_slice %6 {offsets = [4, 0], sizes = [1, 32], strides = [1, 1]} : vector<6x32xf32> to vector<1x32xf32>
    %174 = vector.extract_strided_slice %6 {offsets = [5, 0], sizes = [1, 32], strides = [1, 1]} : vector<6x32xf32> to vector<1x32xf32>
    %cst_94 = arith.constant dense<0.000000e+00> : vector<8xf32>
    %175 = vector.multi_reduction <add>, %172, %cst_94 [1] : vector<8x32xf32> to vector<8xf32>
    %176 = vector.shape_cast %175 : vector<8xf32> to vector<8x1xf32>
    %cst_95 = arith.constant 3.200000e+01 : f32
    %177 = vector.broadcast %cst_95 : f32 to vector<8x1xf32>
    %178 = arith.divf %176, %177 : vector<8x1xf32>
    %179 = vector.broadcast %178 : vector<8x1xf32> to vector<8x32xf32>
    %180 = arith.subf %172, %179 : vector<8x32xf32>
    %181 = arith.mulf %180, %180 : vector<8x32xf32>
    %cst_96 = arith.constant dense<0.000000e+00> : vector<8xf32>
    %182 = vector.multi_reduction <add>, %181, %cst_96 [1] : vector<8x32xf32> to vector<8xf32>
    %183 = vector.shape_cast %182 : vector<8xf32> to vector<8x1xf32>
    %cst_97 = arith.constant 3.200000e+01 : f32
    %184 = vector.broadcast %cst_97 : f32 to vector<8x1xf32>
    %185 = arith.divf %183, %184 : vector<8x1xf32>
    %186 = vector.broadcast %178 : vector<8x1xf32> to vector<8x32xf32>
    %187 = arith.subf %172, %186 : vector<8x32xf32>
    %cst_98 = arith.constant 9.99999974E-6 : f32
    %188 = vector.broadcast %cst_98 : f32 to vector<8x1xf32>
    %189 = arith.addf %185, %188 : vector<8x1xf32>
    %190 = math.rsqrt %189 : vector<8x1xf32>
    %191 = vector.broadcast %190 : vector<8x1xf32> to vector<8x32xf32>
    %192 = arith.mulf %187, %191 : vector<8x32xf32>
    %193 = vector.broadcast %173 : vector<1x32xf32> to vector<8x32xf32>
    %194 = arith.mulf %192, %193 : vector<8x32xf32>
    %195 = vector.broadcast %174 : vector<1x32xf32> to vector<8x32xf32>
    %196 = arith.addf %194, %195 : vector<8x32xf32>
    %197 = arith.truncf %196 : vector<8x32xf32> to vector<8x32xbf16>
    %c0_99 = arith.constant 0 : index
    %c0_100 = arith.constant 0 : index
    %c0_101 = arith.constant 0 : index
    %198 = vector.load %arg8[%c0_99, %c0_100, %c0_101] : memref<1x32x128xbf16, #tpu.memory_space<vmem>>, vector<1x32x128xbf16>
    %199 = vector.shape_cast %198 : vector<1x32x128xbf16> to vector<32x128xbf16>
    %cst_102 = arith.constant dense<0.000000e+00> : vector<8x128xf32>
    %200 = tpu.matmul %197, %199, %cst_102 {dimension_numbers = #tpu.dot_dimension_numbers<[1], [0], [0], [1], [0, 0, 1, 1], [], []>} : vector<8x32xbf16>, vector<32x128xbf16>, vector<8x128xf32> -> vector<8x128xf32>
    %201 = arith.mulf %200, %200 : vector<8x128xf32>
    %202 = arith.mulf %200, %201 : vector<8x128xf32>
    %cst_103 = arith.constant 4.471500e-02 : f32
    %203 = vector.broadcast %cst_103 : f32 to vector<8x128xf32>
    %204 = arith.mulf %203, %202 : vector<8x128xf32>
    %205 = arith.addf %200, %204 : vector<8x128xf32>
    %cst_104 = arith.constant 0.797884583 : f32
    %206 = vector.broadcast %cst_104 : f32 to vector<8x128xf32>
    %207 = arith.mulf %206, %205 : vector<8x128xf32>
    %208 = math.tanh %207 : vector<8x128xf32>
    %cst_105 = arith.constant 1.000000e+00 : f32
    %209 = vector.broadcast %cst_105 : f32 to vector<8x128xf32>
    %210 = arith.addf %209, %208 : vector<8x128xf32>
    %cst_106 = arith.constant 5.000000e-01 : f32
    %211 = vector.broadcast %cst_106 : f32 to vector<8x128xf32>
    %212 = arith.mulf %211, %210 : vector<8x128xf32>
    %213 = arith.mulf %200, %212 : vector<8x128xf32>
    %214 = arith.truncf %213 : vector<8x128xf32> to vector<8x128xbf16>
    %c0_107 = arith.constant 0 : index
    %c0_108 = arith.constant 0 : index
    %c0_109 = arith.constant 0 : index
    %215 = vector.load %arg9[%c0_107, %c0_108, %c0_109] : memref<1x128x32xbf16, #tpu.memory_space<vmem>>, vector<1x128x32xbf16>
    %216 = vector.shape_cast %215 : vector<1x128x32xbf16> to vector<128x32xbf16>
    %cst_110 = arith.constant dense<0.000000e+00> : vector<8x32xf32>
    %217 = tpu.matmul %214, %216, %cst_110 {dimension_numbers = #tpu.dot_dimension_numbers<[1], [0], [0], [1], [0, 0, 1, 1], [], []>} : vector<8x128xbf16>, vector<128x32xbf16>, vector<8x32xf32> -> vector<8x32xf32>
    %218 = arith.addf %172, %217 : vector<8x32xf32>
    %219 = vector.shape_cast %218 : vector<8x32xf32> to vector<2x4x32xf32>
    %c0_111 = arith.constant 0 : index
    %c0_112 = arith.constant 0 : index
    %c0_113 = arith.constant 0 : index
    %220 = vector.load %arg12[%c0_111, %c0_112, %c0_113] : memref<2x4x32xf32, #tpu.memory_space<vmem>>, vector<2x4x32xf32>
    tpu.vector_store %arg12[%c0_111, %c0_112, %c0_113], %219 {strides = array<i32>} : memref<2x4x32xf32, #tpu.memory_space<vmem>>, vector<2x4x32xf32>,
    %c1_i32 = arith.constant 1 : i32
    %221 = arith.cmpi eq, %arg0, %c1_i32 : i32
    %222 = arith.extui %221 : i1 to i32
    %c0_i32_114 = arith.constant 0 : i32
    %223 = arith.cmpi ne, %222, %c0_i32_114 : i32
    scf.if %223 {
      %c0_115 = arith.constant 0 : index
      %c0_116 = arith.constant 0 : index
      %224 = vector.load %arg10[%c0_115, %c0_116] : memref<2x32xf32, #tpu.memory_space<vmem>>, vector<2x32xf32>
      %225 = vector.extract_strided_slice %224 {offsets = [0, 0], sizes = [1, 32], strides = [1, 1]} : vector<2x32xf32> to vector<1x32xf32>
      %226 = vector.extract_strided_slice %224 {offsets = [1, 0], sizes = [1, 32], strides = [1, 1]} : vector<2x32xf32> to vector<1x32xf32>
      %cst_117 = arith.constant dense<0.000000e+00> : vector<8xf32>
      %227 = vector.multi_reduction <add>, %218, %cst_117 [1] : vector<8x32xf32> to vector<8xf32>
      %228 = vector.shape_cast %227 : vector<8xf32> to vector<8x1xf32>
      %cst_118 = arith.constant 3.200000e+01 : f32
      %229 = vector.broadcast %cst_118 : f32 to vector<8x1xf32>
      %230 = arith.divf %228, %229 : vector<8x1xf32>
      %231 = vector.broadcast %230 : vector<8x1xf32> to vector<8x32xf32>
      %232 = arith.subf %218, %231 : vector<8x32xf32>
      %233 = arith.mulf %232, %232 : vector<8x32xf32>
      %cst_119 = arith.constant dense<0.000000e+00> : vector<8xf32>
      %234 = vector.multi_reduction <add>, %233, %cst_119 [1] : vector<8x32xf32> to vector<8xf32>
      %235 = vector.shape_cast %234 : vector<8xf32> to vector<8x1xf32>
      %cst_120 = arith.constant 3.200000e+01 : f32
      %236 = vector.broadcast %cst_120 : f32 to vector<8x1xf32>
      %237 = arith.divf %235, %236 : vector<8x1xf32>
      %238 = vector.broadcast %230 : vector<8x1xf32> to vector<8x32xf32>
      %239 = arith.subf %218, %238 : vector<8x32xf32>
      %cst_121 = arith.constant 9.99999974E-6 : f32
      %240 = vector.broadcast %cst_121 : f32 to vector<8x1xf32>
      %241 = arith.addf %237, %240 : vector<8x1xf32>
      %242 = math.rsqrt %241 : vector<8x1xf32>
      %243 = vector.broadcast %242 : vector<8x1xf32> to vector<8x32xf32>
      %244 = arith.mulf %239, %243 : vector<8x32xf32>
      %245 = vector.broadcast %225 : vector<1x32xf32> to vector<8x32xf32>
      %246 = arith.mulf %244, %245 : vector<8x32xf32>
      %247 = vector.broadcast %226 : vector<1x32xf32> to vector<8x32xf32>
      %248 = arith.addf %246, %247 : vector<8x32xf32>
      %249 = vector.shape_cast %248 : vector<8x32xf32> to vector<2x4x32xf32>
      %c0_122 = arith.constant 0 : index
      %c0_123 = arith.constant 0 : index
      %c0_124 = arith.constant 0 : index
      %250 = vector.load %arg11[%c0_122, %c0_123, %c0_124] : memref<2x4x32xf32, #tpu.memory_space<vmem>>, vector<2x4x32xf32>
      tpu.vector_store %arg11[%c0_122, %c0_123, %c0_124], %249 {strides = array<i32>} : memref<2x4x32xf32, #tpu.memory_space<vmem>>, vector<2x4x32xf32>,
    } else {
    }
    return
  }
  func.func @transform_0(%arg0: i32) -> (i32, i32, i32) {
    %c0_i32 = arith.constant 0 : i32
    %c0_i32_0 = arith.constant 0 : i32
    %c0_i32_1 = arith.constant 0 : i32
    %c0_i32_2 = arith.constant 0 : i32
    return %c0_i32, %c0_i32_0, %c0_i32_1 : i32, i32, i32
  }
  func.func @transform_1(%arg0: i32) -> (i32, i32) {
    %c0_i32 = arith.constant 0 : i32
    %c0_i32_0 = arith.constant 0 : i32
    %c0_i32_1 = arith.constant 0 : i32
    return %c0_i32, %c0_i32_0 : i32, i32
  }
  func.func @transform_2(%arg0: i32) -> (i32, i32, i32) {
    %c0_i32 = arith.constant 0 : i32
    %c0_i32_0 = arith.constant 0 : i32
    %c0_i32_1 = arith.constant 0 : i32
    return %arg0, %c0_i32, %c0_i32_0 : i32, i32, i32
  }
  func.func @transform_3(%arg0: i32) -> (i32, i32, i32, i32) {
    %c0_i32 = arith.constant 0 : i32
    %c0_i32_0 = arith.constant 0 : i32
    %c0_i32_1 = arith.constant 0 : i32
    %c0_i32_2 = arith.constant 0 : i32
    return %arg0, %c0_i32, %c0_i32_0, %c0_i32_1 : i32, i32, i32, i32
  }
  func.func @transform_4(%arg0: i32) -> (i32, i32, i32, i32) {
    %c0_i32 = arith.constant 0 : i32
    %c0_i32_0 = arith.constant 0 : i32
    %c0_i32_1 = arith.constant 0 : i32
    %c0_i32_2 = arith.constant 0 : i32
    return %arg0, %c0_i32, %c0_i32_0, %c0_i32_1 : i32, i32, i32, i32
  }
  func.func @transform_5(%arg0: i32) -> (i32, i32, i32, i32) {
    %c0_i32 = arith.constant 0 : i32
    %c0_i32_0 = arith.constant 0 : i32
    %c0_i32_1 = arith.constant 0 : i32
    %c0_i32_2 = arith.constant 0 : i32
    return %arg0, %c0_i32, %c0_i32_0, %c0_i32_1 : i32, i32, i32, i32
  }
  func.func @transform_6(%arg0: i32) -> (i32, i32, i32, i32) {
    %c0_i32 = arith.constant 0 : i32
    %c0_i32_0 = arith.constant 0 : i32
    %c0_i32_1 = arith.constant 0 : i32
    %c0_i32_2 = arith.constant 0 : i32
    return %arg0, %c0_i32, %c0_i32_0, %c0_i32_1 : i32, i32, i32, i32
  }
  func.func @transform_7(%arg0: i32) -> (i32, i32, i32) {
    %c0_i32 = arith.constant 0 : i32
    %c0_i32_0 = arith.constant 0 : i32
    %c0_i32_1 = arith.constant 0 : i32
    return %arg0, %c0_i32, %c0_i32_0 : i32, i32, i32
  }
  func.func @transform_8(%arg0: i32) -> (i32, i32, i32) {
    %c0_i32 = arith.constant 0 : i32
    %c0_i32_0 = arith.constant 0 : i32
    %c0_i32_1 = arith.constant 0 : i32
    return %arg0, %c0_i32, %c0_i32_0 : i32, i32, i32
  }
  func.func @transform_9(%arg0: i32) -> (i32, i32) {
    %c0_i32 = arith.constant 0 : i32
    %c0_i32_0 = arith.constant 0 : i32
    %c0_i32_1 = arith.constant 0 : i32
    return %c0_i32, %c0_i32_0 : i32, i32
  }
  func.func @transform_10(%arg0: i32) -> (i32, i32, i32) {
    %c0_i32 = arith.constant 0 : i32
    %c0_i32_0 = arith.constant 0 : i32
    %c0_i32_1 = arith.constant 0 : i32
    %c0_i32_2 = arith.constant 0 : i32
    return %c0_i32, %c0_i32_0, %c0_i32_1 : i32, i32, i32
  }
}

module attributes {stable_mosaic.version = 11 : i64} {
  func.func @_lm_stack_kernel(%arg0: i32, %arg1: memref<2x8x32xf32, #tpu.memory_space<vmem>>, %arg2: memref<2x4x32xf32, #tpu.memory_space<vmem>>, %arg3: memref<2x8x1xi32, #tpu.memory_space<vmem>>, %arg4: memref<1x4xi32, #tpu.memory_space<vmem>>, %arg5: memref<2x2xf32, #tpu.memory_space<smem>>, %arg6: memref<1x4x32xf32, #tpu.memory_space<vmem>>, %arg7: memref<1x2x32x16xbf16, #tpu.memory_space<vmem>>, %arg8: memref<1x2x32x16xbf16, #tpu.memory_space<vmem>>, %arg9: memref<1x2x32x16xbf16, #tpu.memory_space<vmem>>, %arg10: memref<1x2x16x32xbf16, #tpu.memory_space<vmem>>, %arg11: memref<1x32x128xbf16, #tpu.memory_space<vmem>>, %arg12: memref<1x128x32xbf16, #tpu.memory_space<vmem>>, %arg13: memref<1x6x32xf32, #tpu.memory_space<vmem>>, %arg14: memref<1x2x32x16xbf16, #tpu.memory_space<vmem>>, %arg15: memref<1x2x32x16xbf16, #tpu.memory_space<vmem>>, %arg16: memref<1x2x32x16xbf16, #tpu.memory_space<vmem>>, %arg17: memref<1x3x2x16xf32, #tpu.memory_space<vmem>>, %arg18: memref<1x2x16x32xbf16, #tpu.memory_space<vmem>>, %arg19: memref<1x32x128xbf16, #tpu.memory_space<vmem>>, %arg20: memref<1x1x128xf32, #tpu.memory_space<vmem>>, %arg21: memref<1x128x32xbf16, #tpu.memory_space<vmem>>, %arg22: memref<2x32xf32, #tpu.memory_space<vmem>>, %arg23: memref<32x128xbf16, #tpu.memory_space<vmem>>, %arg24: memref<1x128xf32, #tpu.memory_space<vmem>>, %arg25: memref<2x8x32xf32, #tpu.memory_space<vmem>>, %arg26: memref<2x8x128xf32, #tpu.memory_space<vmem>>, %arg27: memref<2x8x32xf32, #tpu.memory_space<vmem>>) attributes {dimension_semantics = [#tpu.dimension_semantics<arbitrary>], iteration_bounds = array<i64: 2>, scalar_prefetch = 0 : i64, scratch_operands = 1 : i64, tpu.core_type = #tpu.core_type<tc>, window_params = [{pipeline_mode = #tpu.pipeline_mode<synchronous>, transform_indices = @transform_0, window_bounds = array<i64: 2, 8, 32>}, {pipeline_mode = #tpu.pipeline_mode<synchronous>, transform_indices = @transform_1, window_bounds = array<i64: 2, 4, 32>}, {pipeline_mode = #tpu.pipeline_mode<synchronous>, transform_indices = @transform_2, window_bounds = array<i64: 2, 8, 1>}, {pipeline_mode = #tpu.pipeline_mode<synchronous>, transform_indices = @transform_3, window_bounds = array<i64: 1, 4>}, {transform_indices = @transform_4, window_bounds = array<i64: 2, 2>}, {transform_indices = @transform_5, window_bounds = array<i64: 1, 4, 32>}, {transform_indices = @transform_6, window_bounds = array<i64: 1, 2, 32, 16>}, {transform_indices = @transform_7, window_bounds = array<i64: 1, 2, 32, 16>}, {transform_indices = @transform_8, window_bounds = array<i64: 1, 2, 32, 16>}, {transform_indices = @transform_9, window_bounds = array<i64: 1, 2, 16, 32>}, {transform_indices = @transform_10, window_bounds = array<i64: 1, 32, 128>}, {transform_indices = @transform_11, window_bounds = array<i64: 1, 128, 32>}, {transform_indices = @transform_12, window_bounds = array<i64: 1, 6, 32>}, {transform_indices = @transform_13, window_bounds = array<i64: 1, 2, 32, 16>}, {transform_indices = @transform_14, window_bounds = array<i64: 1, 2, 32, 16>}, {transform_indices = @transform_15, window_bounds = array<i64: 1, 2, 32, 16>}, {transform_indices = @transform_16, window_bounds = array<i64: 1, 3, 2, 16>}, {transform_indices = @transform_17, window_bounds = array<i64: 1, 2, 16, 32>}, {transform_indices = @transform_18, window_bounds = array<i64: 1, 32, 128>}, {transform_indices = @transform_19, window_bounds = array<i64: 1, 1, 128>}, {transform_indices = @transform_20, window_bounds = array<i64: 1, 128, 32>}, {pipeline_mode = #tpu.pipeline_mode<synchronous>, transform_indices = @transform_21, window_bounds = array<i64: 2, 32>}, {pipeline_mode = #tpu.pipeline_mode<synchronous>, transform_indices = @transform_22, window_bounds = array<i64: 32, 128>}, {pipeline_mode = #tpu.pipeline_mode<synchronous>, transform_indices = @transform_23, window_bounds = array<i64: 1, 128>}, {pipeline_mode = #tpu.pipeline_mode<synchronous>, transform_indices = @transform_24, window_bounds = array<i64: 2, 8, 32>}, {pipeline_mode = #tpu.pipeline_mode<synchronous>, transform_indices = @transform_25, window_bounds = array<i64: 2, 8, 128>}]} {
    %c0_i32 = arith.constant 0 : i32
    %0 = arith.cmpi eq, %arg0, %c0_i32 : i32
    %1 = arith.extui %0 : i1 to i32
    %c0_i32_0 = arith.constant 0 : i32
    %2 = arith.cmpi ne, %1, %c0_i32_0 : i32
    scf.if %2 {
      %c0_182 = arith.constant 0 : index
      %c0_183 = arith.constant 0 : index
      %c0_184 = arith.constant 0 : index
      %366 = vector.load %arg1[%c0_182, %c0_183, %c0_184] : memref<2x8x32xf32, #tpu.memory_space<vmem>>, vector<2x8x32xf32>
      %c0_185 = arith.constant 0 : index
      %c0_186 = arith.constant 0 : index
      %c0_187 = arith.constant 0 : index
      %367 = vector.load %arg27[%c0_185, %c0_186, %c0_187] : memref<2x8x32xf32, #tpu.memory_space<vmem>>, vector<2x8x32xf32>
      tpu.vector_store %arg27[%c0_185, %c0_186, %c0_187], %366 {strides = array<i32>} : memref<2x8x32xf32, #tpu.memory_space<vmem>>, vector<2x8x32xf32>,
    } else {
    }
    %c0 = arith.constant 0 : index
    %c0_1 = arith.constant 0 : index
    %c0_2 = arith.constant 0 : index
    %3 = vector.load %arg27[%c0, %c0_1, %c0_2] : memref<2x8x32xf32, #tpu.memory_space<vmem>>, vector<2x8x32xf32>
    %4 = vector.shape_cast %3 : vector<2x8x32xf32> to vector<16x32xf32>
    %c0_3 = arith.constant 0 : index
    %c0_4 = arith.constant 0 : index
    %c0_5 = arith.constant 0 : index
    %5 = vector.load %arg3[%c0_3, %c0_4, %c0_5] : memref<2x8x1xi32, #tpu.memory_space<vmem>>, vector<2x8x1xi32>
    %c0_6 = arith.constant 0 : index
    %c0_7 = arith.constant 0 : index
    %6 = vector.load %arg4[%c0_6, %c0_7] : memref<1x4xi32, #tpu.memory_space<vmem>>, vector<1x4xi32>
    %7 = vector.shape_cast %6 : vector<1x4xi32> to vector<1x1x4xi32>
    %8 = vector.broadcast %5 : vector<2x8x1xi32> to vector<2x8x4xi32>
    %9 = vector.broadcast %7 : vector<1x1x4xi32> to vector<2x8x4xi32>
    %10 = arith.cmpi eq, %8, %9 : vector<2x8x4xi32>
    %cst = arith.constant 0.000000e+00 : f32
    %cst_8 = arith.constant -1.000000e+09 : f32
    %11 = vector.broadcast %cst : f32 to vector<2x8x4xf32>
    %12 = vector.broadcast %cst_8 : f32 to vector<2x8x4xf32>
    %13 = arith.select %10, %11, %12 : vector<2x8x4xi1>, vector<2x8x4xf32>
    %c0_i32_9 = arith.constant 0 : i32
    %14 = vector.broadcast %c0_i32_9 : i32 to vector<2x8x1xi32>
    %15 = arith.cmpi sgt, %5, %14 : vector<2x8x1xi32>
    %16 = arith.extui %15 : vector<2x8x1xi1> to vector<2x8x1xi32>
    %17 = arith.sitofp %16 : vector<2x8x1xi32> to vector<2x8x1xf32>
    %18 = vector.shape_cast %17 : vector<2x8x1xf32> to vector<16x1xf32>
    %c0_10 = arith.constant 0 : index
    %c0_11 = arith.constant 0 : index
    %c0_12 = arith.constant 0 : index
    %19 = vector.load %arg6[%c0_10, %c0_11, %c0_12] : memref<1x4x32xf32, #tpu.memory_space<vmem>>, vector<1x4x32xf32>
    %20 = vector.shape_cast %19 : vector<1x4x32xf32> to vector<4x32xf32>
    %21 = arith.index_cast %arg0 : i32 to index
    %c0_13 = arith.constant 0 : index
    %22 = memref.load %arg5[%21, %c0_13] : memref<2x2xf32, #tpu.memory_space<smem>>
    %23 = arith.index_cast %arg0 : i32 to index
    %c1 = arith.constant 1 : index
    %24 = memref.load %arg5[%23, %c1] : memref<2x2xf32, #tpu.memory_space<smem>>
    %25 = vector.extract_strided_slice %20 {offsets = [0, 0], sizes = [1, 32], strides = [1, 1]} : vector<4x32xf32> to vector<1x32xf32>
    %26 = vector.extract_strided_slice %20 {offsets = [1, 0], sizes = [1, 32], strides = [1, 1]} : vector<4x32xf32> to vector<1x32xf32>
    %cst_14 = arith.constant dense<0.000000e+00> : vector<16xf32>
    %27 = vector.multi_reduction <add>, %4, %cst_14 [1] : vector<16x32xf32> to vector<16xf32>
    %28 = vector.shape_cast %27 : vector<16xf32> to vector<16x1xf32>
    %cst_15 = arith.constant 3.200000e+01 : f32
    %29 = vector.broadcast %cst_15 : f32 to vector<16x1xf32>
    %30 = arith.divf %28, %29 : vector<16x1xf32>
    %31 = vector.broadcast %30 : vector<16x1xf32> to vector<16x32xf32>
    %32 = arith.subf %4, %31 : vector<16x32xf32>
    %33 = arith.mulf %32, %32 : vector<16x32xf32>
    %cst_16 = arith.constant dense<0.000000e+00> : vector<16xf32>
    %34 = vector.multi_reduction <add>, %33, %cst_16 [1] : vector<16x32xf32> to vector<16xf32>
    %35 = vector.shape_cast %34 : vector<16xf32> to vector<16x1xf32>
    %cst_17 = arith.constant 3.200000e+01 : f32
    %36 = vector.broadcast %cst_17 : f32 to vector<16x1xf32>
    %37 = arith.divf %35, %36 : vector<16x1xf32>
    %38 = vector.broadcast %30 : vector<16x1xf32> to vector<16x32xf32>
    %39 = arith.subf %4, %38 : vector<16x32xf32>
    %cst_18 = arith.constant 9.99999974E-6 : f32
    %40 = vector.broadcast %cst_18 : f32 to vector<16x1xf32>
    %41 = arith.addf %37, %40 : vector<16x1xf32>
    %42 = math.rsqrt %41 : vector<16x1xf32>
    %43 = vector.broadcast %42 : vector<16x1xf32> to vector<16x32xf32>
    %44 = arith.mulf %39, %43 : vector<16x32xf32>
    %45 = vector.broadcast %25 : vector<1x32xf32> to vector<16x32xf32>
    %46 = arith.mulf %44, %45 : vector<16x32xf32>
    %47 = vector.broadcast %26 : vector<1x32xf32> to vector<16x32xf32>
    %48 = arith.addf %46, %47 : vector<16x32xf32>
    %49 = arith.truncf %48 : vector<16x32xf32> to vector<16x32xbf16>
    %c0_19 = arith.constant 0 : index
    %c0_20 = arith.constant 0 : index
    %c0_21 = arith.constant 0 : index
    %50 = vector.load %arg2[%c0_19, %c0_20, %c0_21] : memref<2x4x32xf32, #tpu.memory_space<vmem>>, vector<2x4x32xf32>
    %51 = vector.shape_cast %50 : vector<2x4x32xf32> to vector<8x32xf32>
    %52 = arith.truncf %51 : vector<8x32xf32> to vector<8x32xbf16>
    %cst_22 = arith.constant 0.000000e+00 : f32
    %53 = vector.broadcast %cst_22 : f32 to vector<16x32xf32>
    %c0_23 = arith.constant 0 : index
    %c0_24 = arith.constant 0 : index
    %c0_25 = arith.constant 0 : index
    %c0_26 = arith.constant 0 : index
    %54 = vector.load %arg7[%c0_23, %c0_24, %c0_25, %c0_26] : memref<1x2x32x16xbf16, #tpu.memory_space<vmem>>, vector<1x1x32x16xbf16>
    %55 = vector.shape_cast %54 : vector<1x1x32x16xbf16> to vector<32x16xbf16>
    %cst_27 = arith.constant dense<0.000000e+00> : vector<16x16xf32>
    %56 = tpu.matmul %49, %55, %cst_27 {dimension_numbers = #tpu.dot_dimension_numbers<[1], [0], [0], [1], [0, 0, 1, 1], [], []>} : vector<16x32xbf16>, vector<32x16xbf16>, vector<16x16xf32> -> vector<16x16xf32>
    %c0_28 = arith.constant 0 : index
    %c0_29 = arith.constant 0 : index
    %c0_30 = arith.constant 0 : index
    %c0_31 = arith.constant 0 : index
    %57 = vector.load %arg8[%c0_28, %c0_29, %c0_30, %c0_31] : memref<1x2x32x16xbf16, #tpu.memory_space<vmem>>, vector<1x1x32x16xbf16>
    %58 = vector.shape_cast %57 : vector<1x1x32x16xbf16> to vector<32x16xbf16>
    %cst_32 = arith.constant dense<0.000000e+00> : vector<8x16xf32>
    %59 = tpu.matmul %52, %58, %cst_32 {dimension_numbers = #tpu.dot_dimension_numbers<[1], [0], [0], [1], [0, 0, 1, 1], [], []>} : vector<8x32xbf16>, vector<32x16xbf16>, vector<8x16xf32> -> vector<8x16xf32>
    %c0_33 = arith.constant 0 : index
    %c0_34 = arith.constant 0 : index
    %c0_35 = arith.constant 0 : index
    %c0_36 = arith.constant 0 : index
    %60 = vector.load %arg9[%c0_33, %c0_34, %c0_35, %c0_36] : memref<1x2x32x16xbf16, #tpu.memory_space<vmem>>, vector<1x1x32x16xbf16>
    %61 = vector.shape_cast %60 : vector<1x1x32x16xbf16> to vector<32x16xbf16>
    %cst_37 = arith.constant dense<0.000000e+00> : vector<8x16xf32>
    %62 = tpu.matmul %52, %61, %cst_37 {dimension_numbers = #tpu.dot_dimension_numbers<[1], [0], [0], [1], [0, 0, 1, 1], [], []>} : vector<8x32xbf16>, vector<32x16xbf16>, vector<8x16xf32> -> vector<8x16xf32>
    %63 = vector.shape_cast %56 : vector<16x16xf32> to vector<2x8x16xf32>
    %64 = arith.truncf %63 : vector<2x8x16xf32> to vector<2x8x16xbf16>
    %65 = vector.shape_cast %59 : vector<8x16xf32> to vector<2x4x16xf32>
    %66 = arith.truncf %65 : vector<2x4x16xf32> to vector<2x4x16xbf16>
    %67 = vector.shape_cast %62 : vector<8x16xf32> to vector<2x4x16xf32>
    %68 = arith.truncf %67 : vector<2x4x16xf32> to vector<2x4x16xbf16>
    "tpu.trace_start"() <{level = 10 : i32, message = "bqd,bkd->bqk"}> : () -> ()
    %cst_38 = arith.constant dense<0.000000e+00> : vector<2x8x4xf32>
    %69 = tpu.matmul %64, %66, %cst_38 {dimension_numbers = #tpu.dot_dimension_numbers<[2], [2], [1], [1], [0, 0, 0, 1, 1, 1], [0], [0]>} : vector<2x8x16xbf16>, vector<2x4x16xbf16>, vector<2x8x4xf32> -> vector<2x8x4xf32>
    "tpu.trace_stop"() : () -> ()
    %70 = arith.addf %69, %13 : vector<2x8x4xf32>
    %cst_39 = arith.constant dense<0xFF800000> : vector<2x8xf32>
    %71 = vector.multi_reduction <maximumf>, %70, %cst_39 [2] : vector<2x8x4xf32> to vector<2x8xf32>
    %72 = vector.shape_cast %71 : vector<2x8xf32> to vector<2x8x1xf32>
    %73 = vector.broadcast %72 : vector<2x8x1xf32> to vector<2x8x4xf32>
    %74 = arith.subf %70, %73 : vector<2x8x4xf32>
    %75 = math.exp %74 : vector<2x8x4xf32>
    %cst_40 = arith.constant dense<0.000000e+00> : vector<2x8xf32>
    %76 = vector.multi_reduction <add>, %75, %cst_40 [2] : vector<2x8x4xf32> to vector<2x8xf32>
    %77 = vector.shape_cast %76 : vector<2x8xf32> to vector<2x8x1xf32>
    %78 = vector.broadcast %77 : vector<2x8x1xf32> to vector<2x8x4xf32>
    %79 = arith.divf %75, %78 : vector<2x8x4xf32>
    %80 = arith.truncf %79 : vector<2x8x4xf32> to vector<2x8x4xbf16>
    "tpu.trace_start"() <{level = 10 : i32, message = "bqk,bkd->bqd"}> : () -> ()
    %cst_41 = arith.constant dense<0.000000e+00> : vector<2x8x16xf32>
    %81 = tpu.matmul %80, %68, %cst_41 {dimension_numbers = #tpu.dot_dimension_numbers<[2], [1], [1], [2], [0, 0, 0, 1, 1, 2], [0], [0]>} : vector<2x8x4xbf16>, vector<2x4x16xbf16>, vector<2x8x16xf32> -> vector<2x8x16xf32>
    "tpu.trace_stop"() : () -> ()
    %82 = vector.shape_cast %81 : vector<2x8x16xf32> to vector<16x16xf32>
    %83 = arith.truncf %82 : vector<16x16xf32> to vector<16x16xbf16>
    %c0_42 = arith.constant 0 : index
    %c0_43 = arith.constant 0 : index
    %c0_44 = arith.constant 0 : index
    %c0_45 = arith.constant 0 : index
    %84 = vector.load %arg10[%c0_42, %c0_43, %c0_44, %c0_45] : memref<1x2x16x32xbf16, #tpu.memory_space<vmem>>, vector<1x1x16x32xbf16>
    %85 = vector.shape_cast %84 : vector<1x1x16x32xbf16> to vector<16x32xbf16>
    %cst_46 = arith.constant dense<0.000000e+00> : vector<16x32xf32>
    %86 = tpu.matmul %83, %85, %cst_46 {dimension_numbers = #tpu.dot_dimension_numbers<[1], [0], [0], [1], [0, 0, 1, 1], [], []>} : vector<16x16xbf16>, vector<16x32xbf16>, vector<16x32xf32> -> vector<16x32xf32>
    %87 = arith.addf %53, %86 : vector<16x32xf32>
    %c0_47 = arith.constant 0 : index
    %c1_48 = arith.constant 1 : index
    %c0_49 = arith.constant 0 : index
    %c0_50 = arith.constant 0 : index
    %88 = vector.load %arg7[%c0_47, %c1_48, %c0_49, %c0_50] : memref<1x2x32x16xbf16, #tpu.memory_space<vmem>>, vector<1x1x32x16xbf16>
    %89 = vector.shape_cast %88 : vector<1x1x32x16xbf16> to vector<32x16xbf16>
    %cst_51 = arith.constant dense<0.000000e+00> : vector<16x16xf32>
    %90 = tpu.matmul %49, %89, %cst_51 {dimension_numbers = #tpu.dot_dimension_numbers<[1], [0], [0], [1], [0, 0, 1, 1], [], []>} : vector<16x32xbf16>, vector<32x16xbf16>, vector<16x16xf32> -> vector<16x16xf32>
    %c0_52 = arith.constant 0 : index
    %c1_53 = arith.constant 1 : index
    %c0_54 = arith.constant 0 : index
    %c0_55 = arith.constant 0 : index
    %91 = vector.load %arg8[%c0_52, %c1_53, %c0_54, %c0_55] : memref<1x2x32x16xbf16, #tpu.memory_space<vmem>>, vector<1x1x32x16xbf16>
    %92 = vector.shape_cast %91 : vector<1x1x32x16xbf16> to vector<32x16xbf16>
    %cst_56 = arith.constant dense<0.000000e+00> : vector<8x16xf32>
    %93 = tpu.matmul %52, %92, %cst_56 {dimension_numbers = #tpu.dot_dimension_numbers<[1], [0], [0], [1], [0, 0, 1, 1], [], []>} : vector<8x32xbf16>, vector<32x16xbf16>, vector<8x16xf32> -> vector<8x16xf32>
    %c0_57 = arith.constant 0 : index
    %c1_58 = arith.constant 1 : index
    %c0_59 = arith.constant 0 : index
    %c0_60 = arith.constant 0 : index
    %94 = vector.load %arg9[%c0_57, %c1_58, %c0_59, %c0_60] : memref<1x2x32x16xbf16, #tpu.memory_space<vmem>>, vector<1x1x32x16xbf16>
    %95 = vector.shape_cast %94 : vector<1x1x32x16xbf16> to vector<32x16xbf16>
    %cst_61 = arith.constant dense<0.000000e+00> : vector<8x16xf32>
    %96 = tpu.matmul %52, %95, %cst_61 {dimension_numbers = #tpu.dot_dimension_numbers<[1], [0], [0], [1], [0, 0, 1, 1], [], []>} : vector<8x32xbf16>, vector<32x16xbf16>, vector<8x16xf32> -> vector<8x16xf32>
    %97 = vector.shape_cast %90 : vector<16x16xf32> to vector<2x8x16xf32>
    %98 = arith.truncf %97 : vector<2x8x16xf32> to vector<2x8x16xbf16>
    %99 = vector.shape_cast %93 : vector<8x16xf32> to vector<2x4x16xf32>
    %100 = arith.truncf %99 : vector<2x4x16xf32> to vector<2x4x16xbf16>
    %101 = vector.shape_cast %96 : vector<8x16xf32> to vector<2x4x16xf32>
    %102 = arith.truncf %101 : vector<2x4x16xf32> to vector<2x4x16xbf16>
    "tpu.trace_start"() <{level = 10 : i32, message = "bqd,bkd->bqk"}> : () -> ()
    %cst_62 = arith.constant dense<0.000000e+00> : vector<2x8x4xf32>
    %103 = tpu.matmul %98, %100, %cst_62 {dimension_numbers = #tpu.dot_dimension_numbers<[2], [2], [1], [1], [0, 0, 0, 1, 1, 1], [0], [0]>} : vector<2x8x16xbf16>, vector<2x4x16xbf16>, vector<2x8x4xf32> -> vector<2x8x4xf32>
    "tpu.trace_stop"() : () -> ()
    %104 = arith.addf %103, %13 : vector<2x8x4xf32>
    %cst_63 = arith.constant dense<0xFF800000> : vector<2x8xf32>
    %105 = vector.multi_reduction <maximumf>, %104, %cst_63 [2] : vector<2x8x4xf32> to vector<2x8xf32>
    %106 = vector.shape_cast %105 : vector<2x8xf32> to vector<2x8x1xf32>
    %107 = vector.broadcast %106 : vector<2x8x1xf32> to vector<2x8x4xf32>
    %108 = arith.subf %104, %107 : vector<2x8x4xf32>
    %109 = math.exp %108 : vector<2x8x4xf32>
    %cst_64 = arith.constant dense<0.000000e+00> : vector<2x8xf32>
    %110 = vector.multi_reduction <add>, %109, %cst_64 [2] : vector<2x8x4xf32> to vector<2x8xf32>
    %111 = vector.shape_cast %110 : vector<2x8xf32> to vector<2x8x1xf32>
    %112 = vector.broadcast %111 : vector<2x8x1xf32> to vector<2x8x4xf32>
    %113 = arith.divf %109, %112 : vector<2x8x4xf32>
    %114 = arith.truncf %113 : vector<2x8x4xf32> to vector<2x8x4xbf16>
    "tpu.trace_start"() <{level = 10 : i32, message = "bqk,bkd->bqd"}> : () -> ()
    %cst_65 = arith.constant dense<0.000000e+00> : vector<2x8x16xf32>
    %115 = tpu.matmul %114, %102, %cst_65 {dimension_numbers = #tpu.dot_dimension_numbers<[2], [1], [1], [2], [0, 0, 0, 1, 1, 2], [0], [0]>} : vector<2x8x4xbf16>, vector<2x4x16xbf16>, vector<2x8x16xf32> -> vector<2x8x16xf32>
    "tpu.trace_stop"() : () -> ()
    %116 = vector.shape_cast %115 : vector<2x8x16xf32> to vector<16x16xf32>
    %117 = arith.truncf %116 : vector<16x16xf32> to vector<16x16xbf16>
    %c0_66 = arith.constant 0 : index
    %c1_67 = arith.constant 1 : index
    %c0_68 = arith.constant 0 : index
    %c0_69 = arith.constant 0 : index
    %118 = vector.load %arg10[%c0_66, %c1_67, %c0_68, %c0_69] : memref<1x2x16x32xbf16, #tpu.memory_space<vmem>>, vector<1x1x16x32xbf16>
    %119 = vector.shape_cast %118 : vector<1x1x16x32xbf16> to vector<16x32xbf16>
    %cst_70 = arith.constant dense<0.000000e+00> : vector<16x32xf32>
    %120 = tpu.matmul %117, %119, %cst_70 {dimension_numbers = #tpu.dot_dimension_numbers<[1], [0], [0], [1], [0, 0, 1, 1], [], []>} : vector<16x16xbf16>, vector<16x32xbf16>, vector<16x32xf32> -> vector<16x32xf32>
    %121 = arith.addf %87, %120 : vector<16x32xf32>
    %122 = vector.broadcast %18 : vector<16x1xf32> to vector<16x32xf32>
    %123 = arith.mulf %121, %122 : vector<16x32xf32>
    %124 = vector.broadcast %22 : f32 to vector<16x32xf32>
    %125 = arith.mulf %124, %123 : vector<16x32xf32>
    %126 = arith.addf %4, %125 : vector<16x32xf32>
    %127 = vector.extract_strided_slice %20 {offsets = [2, 0], sizes = [1, 32], strides = [1, 1]} : vector<4x32xf32> to vector<1x32xf32>
    %128 = vector.extract_strided_slice %20 {offsets = [3, 0], sizes = [1, 32], strides = [1, 1]} : vector<4x32xf32> to vector<1x32xf32>
    %cst_71 = arith.constant dense<0.000000e+00> : vector<16xf32>
    %129 = vector.multi_reduction <add>, %126, %cst_71 [1] : vector<16x32xf32> to vector<16xf32>
    %130 = vector.shape_cast %129 : vector<16xf32> to vector<16x1xf32>
    %cst_72 = arith.constant 3.200000e+01 : f32
    %131 = vector.broadcast %cst_72 : f32 to vector<16x1xf32>
    %132 = arith.divf %130, %131 : vector<16x1xf32>
    %133 = vector.broadcast %132 : vector<16x1xf32> to vector<16x32xf32>
    %134 = arith.subf %126, %133 : vector<16x32xf32>
    %135 = arith.mulf %134, %134 : vector<16x32xf32>
    %cst_73 = arith.constant dense<0.000000e+00> : vector<16xf32>
    %136 = vector.multi_reduction <add>, %135, %cst_73 [1] : vector<16x32xf32> to vector<16xf32>
    %137 = vector.shape_cast %136 : vector<16xf32> to vector<16x1xf32>
    %cst_74 = arith.constant 3.200000e+01 : f32
    %138 = vector.broadcast %cst_74 : f32 to vector<16x1xf32>
    %139 = arith.divf %137, %138 : vector<16x1xf32>
    %140 = vector.broadcast %132 : vector<16x1xf32> to vector<16x32xf32>
    %141 = arith.subf %126, %140 : vector<16x32xf32>
    %cst_75 = arith.constant 9.99999974E-6 : f32
    %142 = vector.broadcast %cst_75 : f32 to vector<16x1xf32>
    %143 = arith.addf %139, %142 : vector<16x1xf32>
    %144 = math.rsqrt %143 : vector<16x1xf32>
    %145 = vector.broadcast %144 : vector<16x1xf32> to vector<16x32xf32>
    %146 = arith.mulf %141, %145 : vector<16x32xf32>
    %147 = vector.broadcast %127 : vector<1x32xf32> to vector<16x32xf32>
    %148 = arith.mulf %146, %147 : vector<16x32xf32>
    %149 = vector.broadcast %128 : vector<1x32xf32> to vector<16x32xf32>
    %150 = arith.addf %148, %149 : vector<16x32xf32>
    %151 = arith.truncf %150 : vector<16x32xf32> to vector<16x32xbf16>
    %c0_76 = arith.constant 0 : index
    %c0_77 = arith.constant 0 : index
    %c0_78 = arith.constant 0 : index
    %152 = vector.load %arg11[%c0_76, %c0_77, %c0_78] : memref<1x32x128xbf16, #tpu.memory_space<vmem>>, vector<1x32x128xbf16>
    %153 = vector.shape_cast %152 : vector<1x32x128xbf16> to vector<32x128xbf16>
    %cst_79 = arith.constant dense<0.000000e+00> : vector<16x128xf32>
    %154 = tpu.matmul %151, %153, %cst_79 {dimension_numbers = #tpu.dot_dimension_numbers<[1], [0], [0], [1], [0, 0, 1, 1], [], []>} : vector<16x32xbf16>, vector<32x128xbf16>, vector<16x128xf32> -> vector<16x128xf32>
    %155 = arith.mulf %154, %154 : vector<16x128xf32>
    %156 = arith.mulf %154, %155 : vector<16x128xf32>
    %cst_80 = arith.constant 4.471500e-02 : f32
    %157 = vector.broadcast %cst_80 : f32 to vector<16x128xf32>
    %158 = arith.mulf %157, %156 : vector<16x128xf32>
    %159 = arith.addf %154, %158 : vector<16x128xf32>
    %cst_81 = arith.constant 0.797884583 : f32
    %160 = vector.broadcast %cst_81 : f32 to vector<16x128xf32>
    %161 = arith.mulf %160, %159 : vector<16x128xf32>
    %162 = math.tanh %161 : vector<16x128xf32>
    %cst_82 = arith.constant 1.000000e+00 : f32
    %163 = vector.broadcast %cst_82 : f32 to vector<16x128xf32>
    %164 = arith.addf %163, %162 : vector<16x128xf32>
    %cst_83 = arith.constant 5.000000e-01 : f32
    %165 = vector.broadcast %cst_83 : f32 to vector<16x128xf32>
    %166 = arith.mulf %165, %164 : vector<16x128xf32>
    %167 = arith.mulf %154, %166 : vector<16x128xf32>
    %168 = arith.truncf %167 : vector<16x128xf32> to vector<16x128xbf16>
    %c0_84 = arith.constant 0 : index
    %c0_85 = arith.constant 0 : index
    %c0_86 = arith.constant 0 : index
    %169 = vector.load %arg12[%c0_84, %c0_85, %c0_86] : memref<1x128x32xbf16, #tpu.memory_space<vmem>>, vector<1x128x32xbf16>
    %170 = vector.shape_cast %169 : vector<1x128x32xbf16> to vector<128x32xbf16>
    %cst_87 = arith.constant dense<0.000000e+00> : vector<16x32xf32>
    %171 = tpu.matmul %168, %170, %cst_87 {dimension_numbers = #tpu.dot_dimension_numbers<[1], [0], [0], [1], [0, 0, 1, 1], [], []>} : vector<16x128xbf16>, vector<128x32xbf16>, vector<16x32xf32> -> vector<16x32xf32>
    %172 = vector.broadcast %24 : f32 to vector<16x32xf32>
    %173 = arith.mulf %172, %171 : vector<16x32xf32>
    %174 = arith.addf %126, %173 : vector<16x32xf32>
    %c0_88 = arith.constant 0 : index
    %c0_89 = arith.constant 0 : index
    %c0_90 = arith.constant 0 : index
    %175 = vector.load %arg13[%c0_88, %c0_89, %c0_90] : memref<1x6x32xf32, #tpu.memory_space<vmem>>, vector<1x6x32xf32>
    %176 = vector.shape_cast %175 : vector<1x6x32xf32> to vector<6x32xf32>
    %177 = vector.extract_strided_slice %176 {offsets = [0, 0], sizes = [1, 32], strides = [1, 1]} : vector<6x32xf32> to vector<1x32xf32>
    %178 = vector.extract_strided_slice %176 {offsets = [1, 0], sizes = [1, 32], strides = [1, 1]} : vector<6x32xf32> to vector<1x32xf32>
    %cst_91 = arith.constant dense<0.000000e+00> : vector<16xf32>
    %179 = vector.multi_reduction <add>, %174, %cst_91 [1] : vector<16x32xf32> to vector<16xf32>
    %180 = vector.shape_cast %179 : vector<16xf32> to vector<16x1xf32>
    %cst_92 = arith.constant 3.200000e+01 : f32
    %181 = vector.broadcast %cst_92 : f32 to vector<16x1xf32>
    %182 = arith.divf %180, %181 : vector<16x1xf32>
    %183 = vector.broadcast %182 : vector<16x1xf32> to vector<16x32xf32>
    %184 = arith.subf %174, %183 : vector<16x32xf32>
    %185 = arith.mulf %184, %184 : vector<16x32xf32>
    %cst_93 = arith.constant dense<0.000000e+00> : vector<16xf32>
    %186 = vector.multi_reduction <add>, %185, %cst_93 [1] : vector<16x32xf32> to vector<16xf32>
    %187 = vector.shape_cast %186 : vector<16xf32> to vector<16x1xf32>
    %cst_94 = arith.constant 3.200000e+01 : f32
    %188 = vector.broadcast %cst_94 : f32 to vector<16x1xf32>
    %189 = arith.divf %187, %188 : vector<16x1xf32>
    %190 = vector.broadcast %182 : vector<16x1xf32> to vector<16x32xf32>
    %191 = arith.subf %174, %190 : vector<16x32xf32>
    %cst_95 = arith.constant 9.99999974E-6 : f32
    %192 = vector.broadcast %cst_95 : f32 to vector<16x1xf32>
    %193 = arith.addf %189, %192 : vector<16x1xf32>
    %194 = math.rsqrt %193 : vector<16x1xf32>
    %195 = vector.broadcast %194 : vector<16x1xf32> to vector<16x32xf32>
    %196 = arith.mulf %191, %195 : vector<16x32xf32>
    %197 = vector.broadcast %177 : vector<1x32xf32> to vector<16x32xf32>
    %198 = arith.mulf %196, %197 : vector<16x32xf32>
    %199 = vector.broadcast %178 : vector<1x32xf32> to vector<16x32xf32>
    %200 = arith.addf %198, %199 : vector<16x32xf32>
    %201 = arith.truncf %200 : vector<16x32xf32> to vector<16x32xbf16>
    %202 = tpu.iota {dimensions = array<i32: 0>} : vector<8x8xi32>
    %203 = tpu.iota {dimensions = array<i32: 1>} : vector<8x8xi32>
    %204 = arith.cmpi sge, %202, %203 : vector<8x8xi32>
    %cst_96 = arith.constant 0.000000e+00 : f32
    %cst_97 = arith.constant -1.000000e+09 : f32
    %205 = vector.broadcast %cst_96 : f32 to vector<8x8xf32>
    %206 = vector.broadcast %cst_97 : f32 to vector<8x8xf32>
    %207 = arith.select %204, %205, %206 : vector<8x8xi1>, vector<8x8xf32>
    %208 = vector.shape_cast %207 : vector<8x8xf32> to vector<1x8x8xf32>
    %c0_98 = arith.constant 0 : index
    %c0_99 = arith.constant 0 : index
    %c0_100 = arith.constant 0 : index
    %c0_101 = arith.constant 0 : index
    %209 = vector.load %arg17[%c0_98, %c0_99, %c0_100, %c0_101] : memref<1x3x2x16xf32, #tpu.memory_space<vmem>>, vector<1x1x2x16xf32>
    %210 = vector.shape_cast %209 : vector<1x1x2x16xf32> to vector<2x16xf32>
    %c0_102 = arith.constant 0 : index
    %c1_103 = arith.constant 1 : index
    %c0_104 = arith.constant 0 : index
    %c0_105 = arith.constant 0 : index
    %211 = vector.load %arg17[%c0_102, %c1_103, %c0_104, %c0_105] : memref<1x3x2x16xf32, #tpu.memory_space<vmem>>, vector<1x1x2x16xf32>
    %212 = vector.shape_cast %211 : vector<1x1x2x16xf32> to vector<2x16xf32>
    %c0_106 = arith.constant 0 : index
    %c2 = arith.constant 2 : index
    %c0_107 = arith.constant 0 : index
    %c0_108 = arith.constant 0 : index
    %213 = vector.load %arg17[%c0_106, %c2, %c0_107, %c0_108] : memref<1x3x2x16xf32, #tpu.memory_space<vmem>>, vector<1x1x2x16xf32>
    %214 = vector.shape_cast %213 : vector<1x1x2x16xf32> to vector<2x16xf32>
    %cst_109 = arith.constant 0.000000e+00 : f32
    %215 = vector.broadcast %cst_109 : f32 to vector<16x32xf32>
    %c0_110 = arith.constant 0 : index
    %c0_111 = arith.constant 0 : index
    %c0_112 = arith.constant 0 : index
    %c0_113 = arith.constant 0 : index
    %216 = vector.load %arg14[%c0_110, %c0_111, %c0_112, %c0_113] : memref<1x2x32x16xbf16, #tpu.memory_space<vmem>>, vector<1x1x32x16xbf16>
    %217 = vector.shape_cast %216 : vector<1x1x32x16xbf16> to vector<32x16xbf16>
    %cst_114 = arith.constant dense<0.000000e+00> : vector<16x16xf32>
    %218 = tpu.matmul %201, %217, %cst_114 {dimension_numbers = #tpu.dot_dimension_numbers<[1], [0], [0], [1], [0, 0, 1, 1], [], []>} : vector<16x32xbf16>, vector<32x16xbf16>, vector<16x16xf32> -> vector<16x16xf32>
    %c0_115 = arith.constant 0 : index
    %c0_116 = arith.constant 0 : index
    %c0_117 = arith.constant 0 : index
    %c0_118 = arith.constant 0 : index
    %219 = vector.load %arg15[%c0_115, %c0_116, %c0_117, %c0_118] : memref<1x2x32x16xbf16, #tpu.memory_space<vmem>>, vector<1x1x32x16xbf16>
    %220 = vector.shape_cast %219 : vector<1x1x32x16xbf16> to vector<32x16xbf16>
    %cst_119 = arith.constant dense<0.000000e+00> : vector<16x16xf32>
    %221 = tpu.matmul %201, %220, %cst_119 {dimension_numbers = #tpu.dot_dimension_numbers<[1], [0], [0], [1], [0, 0, 1, 1], [], []>} : vector<16x32xbf16>, vector<32x16xbf16>, vector<16x16xf32> -> vector<16x16xf32>
    %c0_120 = arith.constant 0 : index
    %c0_121 = arith.constant 0 : index
    %c0_122 = arith.constant 0 : index
    %c0_123 = arith.constant 0 : index
    %222 = vector.load %arg16[%c0_120, %c0_121, %c0_122, %c0_123] : memref<1x2x32x16xbf16, #tpu.memory_space<vmem>>, vector<1x1x32x16xbf16>
    %223 = vector.shape_cast %222 : vector<1x1x32x16xbf16> to vector<32x16xbf16>
    %cst_124 = arith.constant dense<0.000000e+00> : vector<16x16xf32>
    %224 = tpu.matmul %201, %223, %cst_124 {dimension_numbers = #tpu.dot_dimension_numbers<[1], [0], [0], [1], [0, 0, 1, 1], [], []>} : vector<16x32xbf16>, vector<32x16xbf16>, vector<16x16xf32> -> vector<16x16xf32>
    %225 = vector.extract_strided_slice %210 {offsets = [0, 0], sizes = [1, 16], strides = [1, 1]} : vector<2x16xf32> to vector<1x16xf32>
    %226 = vector.broadcast %225 : vector<1x16xf32> to vector<16x16xf32>
    %227 = arith.addf %218, %226 : vector<16x16xf32>
    %228 = vector.extract_strided_slice %212 {offsets = [0, 0], sizes = [1, 16], strides = [1, 1]} : vector<2x16xf32> to vector<1x16xf32>
    %229 = vector.broadcast %228 : vector<1x16xf32> to vector<16x16xf32>
    %230 = arith.addf %221, %229 : vector<16x16xf32>
    %231 = vector.extract_strided_slice %214 {offsets = [0, 0], sizes = [1, 16], strides = [1, 1]} : vector<2x16xf32> to vector<1x16xf32>
    %232 = vector.broadcast %231 : vector<1x16xf32> to vector<16x16xf32>
    %233 = arith.addf %224, %232 : vector<16x16xf32>
    %234 = vector.shape_cast %227 : vector<16x16xf32> to vector<2x8x16xf32>
    %235 = arith.truncf %234 : vector<2x8x16xf32> to vector<2x8x16xbf16>
    %236 = vector.shape_cast %230 : vector<16x16xf32> to vector<2x8x16xf32>
    %237 = arith.truncf %236 : vector<2x8x16xf32> to vector<2x8x16xbf16>
    %238 = vector.shape_cast %233 : vector<16x16xf32> to vector<2x8x16xf32>
    %239 = arith.truncf %238 : vector<2x8x16xf32> to vector<2x8x16xbf16>
    "tpu.trace_start"() <{level = 10 : i32, message = "bqd,bkd->bqk"}> : () -> ()
    %cst_125 = arith.constant dense<0.000000e+00> : vector<2x8x8xf32>
    %240 = tpu.matmul %235, %237, %cst_125 {dimension_numbers = #tpu.dot_dimension_numbers<[2], [2], [1], [1], [0, 0, 0, 1, 1, 1], [0], [0]>} : vector<2x8x16xbf16>, vector<2x8x16xbf16>, vector<2x8x8xf32> -> vector<2x8x8xf32>
    "tpu.trace_stop"() : () -> ()
    %241 = vector.broadcast %208 : vector<1x8x8xf32> to vector<2x8x8xf32>
    %242 = arith.addf %240, %241 : vector<2x8x8xf32>
    %cst_126 = arith.constant dense<0xFF800000> : vector<2x8xf32>
    %243 = vector.multi_reduction <maximumf>, %242, %cst_126 [2] : vector<2x8x8xf32> to vector<2x8xf32>
    %244 = vector.shape_cast %243 : vector<2x8xf32> to vector<2x8x1xf32>
    %245 = vector.broadcast %244 : vector<2x8x1xf32> to vector<2x8x8xf32>
    %246 = arith.subf %242, %245 : vector<2x8x8xf32>
    %247 = math.exp %246 : vector<2x8x8xf32>
    %cst_127 = arith.constant dense<0.000000e+00> : vector<2x8xf32>
    %248 = vector.multi_reduction <add>, %247, %cst_127 [2] : vector<2x8x8xf32> to vector<2x8xf32>
    %249 = vector.shape_cast %248 : vector<2x8xf32> to vector<2x8x1xf32>
    %250 = vector.broadcast %249 : vector<2x8x1xf32> to vector<2x8x8xf32>
    %251 = arith.divf %247, %250 : vector<2x8x8xf32>
    %252 = arith.truncf %251 : vector<2x8x8xf32> to vector<2x8x8xbf16>
    "tpu.trace_start"() <{level = 10 : i32, message = "bqk,bkd->bqd"}> : () -> ()
    %cst_128 = arith.constant dense<0.000000e+00> : vector<2x8x16xf32>
    %253 = tpu.matmul %252, %239, %cst_128 {dimension_numbers = #tpu.dot_dimension_numbers<[2], [1], [1], [2], [0, 0, 0, 1, 1, 2], [0], [0]>} : vector<2x8x8xbf16>, vector<2x8x16xbf16>, vector<2x8x16xf32> -> vector<2x8x16xf32>
    "tpu.trace_stop"() : () -> ()
    %254 = vector.shape_cast %253 : vector<2x8x16xf32> to vector<16x16xf32>
    %255 = arith.truncf %254 : vector<16x16xf32> to vector<16x16xbf16>
    %c0_129 = arith.constant 0 : index
    %c0_130 = arith.constant 0 : index
    %c0_131 = arith.constant 0 : index
    %c0_132 = arith.constant 0 : index
    %256 = vector.load %arg18[%c0_129, %c0_130, %c0_131, %c0_132] : memref<1x2x16x32xbf16, #tpu.memory_space<vmem>>, vector<1x1x16x32xbf16>
    %257 = vector.shape_cast %256 : vector<1x1x16x32xbf16> to vector<16x32xbf16>
    %cst_133 = arith.constant dense<0.000000e+00> : vector<16x32xf32>
    %258 = tpu.matmul %255, %257, %cst_133 {dimension_numbers = #tpu.dot_dimension_numbers<[1], [0], [0], [1], [0, 0, 1, 1], [], []>} : vector<16x16xbf16>, vector<16x32xbf16>, vector<16x32xf32> -> vector<16x32xf32>
    %259 = arith.addf %215, %258 : vector<16x32xf32>
    %c0_134 = arith.constant 0 : index
    %c1_135 = arith.constant 1 : index
    %c0_136 = arith.constant 0 : index
    %c0_137 = arith.constant 0 : index
    %260 = vector.load %arg14[%c0_134, %c1_135, %c0_136, %c0_137] : memref<1x2x32x16xbf16, #tpu.memory_space<vmem>>, vector<1x1x32x16xbf16>
    %261 = vector.shape_cast %260 : vector<1x1x32x16xbf16> to vector<32x16xbf16>
    %cst_138 = arith.constant dense<0.000000e+00> : vector<16x16xf32>
    %262 = tpu.matmul %201, %261, %cst_138 {dimension_numbers = #tpu.dot_dimension_numbers<[1], [0], [0], [1], [0, 0, 1, 1], [], []>} : vector<16x32xbf16>, vector<32x16xbf16>, vector<16x16xf32> -> vector<16x16xf32>
    %c0_139 = arith.constant 0 : index
    %c1_140 = arith.constant 1 : index
    %c0_141 = arith.constant 0 : index
    %c0_142 = arith.constant 0 : index
    %263 = vector.load %arg15[%c0_139, %c1_140, %c0_141, %c0_142] : memref<1x2x32x16xbf16, #tpu.memory_space<vmem>>, vector<1x1x32x16xbf16>
    %264 = vector.shape_cast %263 : vector<1x1x32x16xbf16> to vector<32x16xbf16>
    %cst_143 = arith.constant dense<0.000000e+00> : vector<16x16xf32>
    %265 = tpu.matmul %201, %264, %cst_143 {dimension_numbers = #tpu.dot_dimension_numbers<[1], [0], [0], [1], [0, 0, 1, 1], [], []>} : vector<16x32xbf16>, vector<32x16xbf16>, vector<16x16xf32> -> vector<16x16xf32>
    %c0_144 = arith.constant 0 : index
    %c1_145 = arith.constant 1 : index
    %c0_146 = arith.constant 0 : index
    %c0_147 = arith.constant 0 : index
    %266 = vector.load %arg16[%c0_144, %c1_145, %c0_146, %c0_147] : memref<1x2x32x16xbf16, #tpu.memory_space<vmem>>, vector<1x1x32x16xbf16>
    %267 = vector.shape_cast %266 : vector<1x1x32x16xbf16> to vector<32x16xbf16>
    %cst_148 = arith.constant dense<0.000000e+00> : vector<16x16xf32>
    %268 = tpu.matmul %201, %267, %cst_148 {dimension_numbers = #tpu.dot_dimension_numbers<[1], [0], [0], [1], [0, 0, 1, 1], [], []>} : vector<16x32xbf16>, vector<32x16xbf16>, vector<16x16xf32> -> vector<16x16xf32>
    %269 = vector.extract_strided_slice %210 {offsets = [1, 0], sizes = [1, 16], strides = [1, 1]} : vector<2x16xf32> to vector<1x16xf32>
    %270 = vector.broadcast %269 : vector<1x16xf32> to vector<16x16xf32>
    %271 = arith.addf %262, %270 : vector<16x16xf32>
    %272 = vector.extract_strided_slice %212 {offsets = [1, 0], sizes = [1, 16], strides = [1, 1]} : vector<2x16xf32> to vector<1x16xf32>
    %273 = vector.broadcast %272 : vector<1x16xf32> to vector<16x16xf32>
    %274 = arith.addf %265, %273 : vector<16x16xf32>
    %275 = vector.extract_strided_slice %214 {offsets = [1, 0], sizes = [1, 16], strides = [1, 1]} : vector<2x16xf32> to vector<1x16xf32>
    %276 = vector.broadcast %275 : vector<1x16xf32> to vector<16x16xf32>
    %277 = arith.addf %268, %276 : vector<16x16xf32>
    %278 = vector.shape_cast %271 : vector<16x16xf32> to vector<2x8x16xf32>
    %279 = arith.truncf %278 : vector<2x8x16xf32> to vector<2x8x16xbf16>
    %280 = vector.shape_cast %274 : vector<16x16xf32> to vector<2x8x16xf32>
    %281 = arith.truncf %280 : vector<2x8x16xf32> to vector<2x8x16xbf16>
    %282 = vector.shape_cast %277 : vector<16x16xf32> to vector<2x8x16xf32>
    %283 = arith.truncf %282 : vector<2x8x16xf32> to vector<2x8x16xbf16>
    "tpu.trace_start"() <{level = 10 : i32, message = "bqd,bkd->bqk"}> : () -> ()
    %cst_149 = arith.constant dense<0.000000e+00> : vector<2x8x8xf32>
    %284 = tpu.matmul %279, %281, %cst_149 {dimension_numbers = #tpu.dot_dimension_numbers<[2], [2], [1], [1], [0, 0, 0, 1, 1, 1], [0], [0]>} : vector<2x8x16xbf16>, vector<2x8x16xbf16>, vector<2x8x8xf32> -> vector<2x8x8xf32>
    "tpu.trace_stop"() : () -> ()
    %285 = vector.broadcast %208 : vector<1x8x8xf32> to vector<2x8x8xf32>
    %286 = arith.addf %284, %285 : vector<2x8x8xf32>
    %cst_150 = arith.constant dense<0xFF800000> : vector<2x8xf32>
    %287 = vector.multi_reduction <maximumf>, %286, %cst_150 [2] : vector<2x8x8xf32> to vector<2x8xf32>
    %288 = vector.shape_cast %287 : vector<2x8xf32> to vector<2x8x1xf32>
    %289 = vector.broadcast %288 : vector<2x8x1xf32> to vector<2x8x8xf32>
    %290 = arith.subf %286, %289 : vector<2x8x8xf32>
    %291 = math.exp %290 : vector<2x8x8xf32>
    %cst_151 = arith.constant dense<0.000000e+00> : vector<2x8xf32>
    %292 = vector.multi_reduction <add>, %291, %cst_151 [2] : vector<2x8x8xf32> to vector<2x8xf32>
    %293 = vector.shape_cast %292 : vector<2x8xf32> to vector<2x8x1xf32>
    %294 = vector.broadcast %293 : vector<2x8x1xf32> to vector<2x8x8xf32>
    %295 = arith.divf %291, %294 : vector<2x8x8xf32>
    %296 = arith.truncf %295 : vector<2x8x8xf32> to vector<2x8x8xbf16>
    "tpu.trace_start"() <{level = 10 : i32, message = "bqk,bkd->bqd"}> : () -> ()
    %cst_152 = arith.constant dense<0.000000e+00> : vector<2x8x16xf32>
    %297 = tpu.matmul %296, %283, %cst_152 {dimension_numbers = #tpu.dot_dimension_numbers<[2], [1], [1], [2], [0, 0, 0, 1, 1, 2], [0], [0]>} : vector<2x8x8xbf16>, vector<2x8x16xbf16>, vector<2x8x16xf32> -> vector<2x8x16xf32>
    "tpu.trace_stop"() : () -> ()
    %298 = vector.shape_cast %297 : vector<2x8x16xf32> to vector<16x16xf32>
    %299 = arith.truncf %298 : vector<16x16xf32> to vector<16x16xbf16>
    %c0_153 = arith.constant 0 : index
    %c1_154 = arith.constant 1 : index
    %c0_155 = arith.constant 0 : index
    %c0_156 = arith.constant 0 : index
    %300 = vector.load %arg18[%c0_153, %c1_154, %c0_155, %c0_156] : memref<1x2x16x32xbf16, #tpu.memory_space<vmem>>, vector<1x1x16x32xbf16>
    %301 = vector.shape_cast %300 : vector<1x1x16x32xbf16> to vector<16x32xbf16>
    %cst_157 = arith.constant dense<0.000000e+00> : vector<16x32xf32>
    %302 = tpu.matmul %299, %301, %cst_157 {dimension_numbers = #tpu.dot_dimension_numbers<[1], [0], [0], [1], [0, 0, 1, 1], [], []>} : vector<16x16xbf16>, vector<16x32xbf16>, vector<16x32xf32> -> vector<16x32xf32>
    %303 = arith.addf %259, %302 : vector<16x32xf32>
    %304 = arith.addf %174, %303 : vector<16x32xf32>
    %305 = vector.extract_strided_slice %176 {offsets = [4, 0], sizes = [1, 32], strides = [1, 1]} : vector<6x32xf32> to vector<1x32xf32>
    %306 = vector.broadcast %305 : vector<1x32xf32> to vector<16x32xf32>
    %307 = arith.addf %304, %306 : vector<16x32xf32>
    %308 = vector.extract_strided_slice %176 {offsets = [2, 0], sizes = [1, 32], strides = [1, 1]} : vector<6x32xf32> to vector<1x32xf32>
    %309 = vector.extract_strided_slice %176 {offsets = [3, 0], sizes = [1, 32], strides = [1, 1]} : vector<6x32xf32> to vector<1x32xf32>
    %cst_158 = arith.constant dense<0.000000e+00> : vector<16xf32>
    %310 = vector.multi_reduction <add>, %307, %cst_158 [1] : vector<16x32xf32> to vector<16xf32>
    %311 = vector.shape_cast %310 : vector<16xf32> to vector<16x1xf32>
    %cst_159 = arith.constant 3.200000e+01 : f32
    %312 = vector.broadcast %cst_159 : f32 to vector<16x1xf32>
    %313 = arith.divf %311, %312 : vector<16x1xf32>
    %314 = vector.broadcast %313 : vector<16x1xf32> to vector<16x32xf32>
    %315 = arith.subf %307, %314 : vector<16x32xf32>
    %316 = arith.mulf %315, %315 : vector<16x32xf32>
    %cst_160 = arith.constant dense<0.000000e+00> : vector<16xf32>
    %317 = vector.multi_reduction <add>, %316, %cst_160 [1] : vector<16x32xf32> to vector<16xf32>
    %318 = vector.shape_cast %317 : vector<16xf32> to vector<16x1xf32>
    %cst_161 = arith.constant 3.200000e+01 : f32
    %319 = vector.broadcast %cst_161 : f32 to vector<16x1xf32>
    %320 = arith.divf %318, %319 : vector<16x1xf32>
    %321 = vector.broadcast %313 : vector<16x1xf32> to vector<16x32xf32>
    %322 = arith.subf %307, %321 : vector<16x32xf32>
    %cst_162 = arith.constant 9.99999974E-6 : f32
    %323 = vector.broadcast %cst_162 : f32 to vector<16x1xf32>
    %324 = arith.addf %320, %323 : vector<16x1xf32>
    %325 = math.rsqrt %324 : vector<16x1xf32>
    %326 = vector.broadcast %325 : vector<16x1xf32> to vector<16x32xf32>
    %327 = arith.mulf %322, %326 : vector<16x32xf32>
    %328 = vector.broadcast %308 : vector<1x32xf32> to vector<16x32xf32>
    %329 = arith.mulf %327, %328 : vector<16x32xf32>
    %330 = vector.broadcast %309 : vector<1x32xf32> to vector<16x32xf32>
    %331 = arith.addf %329, %330 : vector<16x32xf32>
    %332 = arith.truncf %331 : vector<16x32xf32> to vector<16x32xbf16>
    %c0_163 = arith.constant 0 : index
    %c0_164 = arith.constant 0 : index
    %c0_165 = arith.constant 0 : index
    %333 = vector.load %arg19[%c0_163, %c0_164, %c0_165] : memref<1x32x128xbf16, #tpu.memory_space<vmem>>, vector<1x32x128xbf16>
    %334 = vector.shape_cast %333 : vector<1x32x128xbf16> to vector<32x128xbf16>
    %cst_166 = arith.constant dense<0.000000e+00> : vector<16x128xf32>
    %335 = tpu.matmul %332, %334, %cst_166 {dimension_numbers = #tpu.dot_dimension_numbers<[1], [0], [0], [1], [0, 0, 1, 1], [], []>} : vector<16x32xbf16>, vector<32x128xbf16>, vector<16x128xf32> -> vector<16x128xf32>
    %c0_167 = arith.constant 0 : index
    %c0_168 = arith.constant 0 : index
    %c0_169 = arith.constant 0 : index
    %336 = vector.load %arg20[%c0_167, %c0_168, %c0_169] : memref<1x1x128xf32, #tpu.memory_space<vmem>>, vector<1x1x128xf32>
    %337 = vector.shape_cast %336 : vector<1x1x128xf32> to vector<1x128xf32>
    %338 = vector.broadcast %337 : vector<1x128xf32> to vector<16x128xf32>
    %339 = arith.addf %335, %338 : vector<16x128xf32>
    %340 = arith.mulf %339, %339 : vector<16x128xf32>
    %341 = arith.mulf %339, %340 : vector<16x128xf32>
    %cst_170 = arith.constant 4.471500e-02 : f32
    %342 = vector.broadcast %cst_170 : f32 to vector<16x128xf32>
    %343 = arith.mulf %342, %341 : vector<16x128xf32>
    %344 = arith.addf %339, %343 : vector<16x128xf32>
    %cst_171 = arith.constant 0.797884583 : f32
    %345 = vector.broadcast %cst_171 : f32 to vector<16x128xf32>
    %346 = arith.mulf %345, %344 : vector<16x128xf32>
    %347 = math.tanh %346 : vector<16x128xf32>
    %cst_172 = arith.constant 1.000000e+00 : f32
    %348 = vector.broadcast %cst_172 : f32 to vector<16x128xf32>
    %349 = arith.addf %348, %347 : vector<16x128xf32>
    %cst_173 = arith.constant 5.000000e-01 : f32
    %350 = vector.broadcast %cst_173 : f32 to vector<16x128xf32>
    %351 = arith.mulf %350, %349 : vector<16x128xf32>
    %352 = arith.mulf %339, %351 : vector<16x128xf32>
    %353 = arith.truncf %352 : vector<16x128xf32> to vector<16x128xbf16>
    %c0_174 = arith.constant 0 : index
    %c0_175 = arith.constant 0 : index
    %c0_176 = arith.constant 0 : index
    %354 = vector.load %arg21[%c0_174, %c0_175, %c0_176] : memref<1x128x32xbf16, #tpu.memory_space<vmem>>, vector<1x128x32xbf16>
    %355 = vector.shape_cast %354 : vector<1x128x32xbf16> to vector<128x32xbf16>
    %cst_177 = arith.constant dense<0.000000e+00> : vector<16x32xf32>
    %356 = tpu.matmul %353, %355, %cst_177 {dimension_numbers = #tpu.dot_dimension_numbers<[1], [0], [0], [1], [0, 0, 1, 1], [], []>} : vector<16x128xbf16>, vector<128x32xbf16>, vector<16x32xf32> -> vector<16x32xf32>
    %357 = arith.addf %307, %356 : vector<16x32xf32>
    %358 = vector.extract_strided_slice %176 {offsets = [5, 0], sizes = [1, 32], strides = [1, 1]} : vector<6x32xf32> to vector<1x32xf32>
    %359 = vector.broadcast %358 : vector<1x32xf32> to vector<16x32xf32>
    %360 = arith.addf %357, %359 : vector<16x32xf32>
    %361 = vector.shape_cast %360 : vector<16x32xf32> to vector<2x8x32xf32>
    %c0_178 = arith.constant 0 : index
    %c0_179 = arith.constant 0 : index
    %c0_180 = arith.constant 0 : index
    %362 = vector.load %arg27[%c0_178, %c0_179, %c0_180] : memref<2x8x32xf32, #tpu.memory_space<vmem>>, vector<2x8x32xf32>
    tpu.vector_store %arg27[%c0_178, %c0_179, %c0_180], %361 {strides = array<i32>} : memref<2x8x32xf32, #tpu.memory_space<vmem>>, vector<2x8x32xf32>,
    %c1_i32 = arith.constant 1 : i32
    %363 = arith.cmpi eq, %arg0, %c1_i32 : i32
    %364 = arith.extui %363 : i1 to i32
    %c0_i32_181 = arith.constant 0 : i32
    %365 = arith.cmpi ne, %364, %c0_i32_181 : i32
    scf.if %365 {
      %c0_182 = arith.constant 0 : index
      %c0_183 = arith.constant 0 : index
      %366 = vector.load %arg22[%c0_182, %c0_183] : memref<2x32xf32, #tpu.memory_space<vmem>>, vector<2x32xf32>
      %367 = vector.extract_strided_slice %366 {offsets = [0, 0], sizes = [1, 32], strides = [1, 1]} : vector<2x32xf32> to vector<1x32xf32>
      %368 = vector.extract_strided_slice %366 {offsets = [1, 0], sizes = [1, 32], strides = [1, 1]} : vector<2x32xf32> to vector<1x32xf32>
      %cst_184 = arith.constant dense<0.000000e+00> : vector<16xf32>
      %369 = vector.multi_reduction <add>, %360, %cst_184 [1] : vector<16x32xf32> to vector<16xf32>
      %370 = vector.shape_cast %369 : vector<16xf32> to vector<16x1xf32>
      %cst_185 = arith.constant 3.200000e+01 : f32
      %371 = vector.broadcast %cst_185 : f32 to vector<16x1xf32>
      %372 = arith.divf %370, %371 : vector<16x1xf32>
      %373 = vector.broadcast %372 : vector<16x1xf32> to vector<16x32xf32>
      %374 = arith.subf %360, %373 : vector<16x32xf32>
      %375 = arith.mulf %374, %374 : vector<16x32xf32>
      %cst_186 = arith.constant dense<0.000000e+00> : vector<16xf32>
      %376 = vector.multi_reduction <add>, %375, %cst_186 [1] : vector<16x32xf32> to vector<16xf32>
      %377 = vector.shape_cast %376 : vector<16xf32> to vector<16x1xf32>
      %cst_187 = arith.constant 3.200000e+01 : f32
      %378 = vector.broadcast %cst_187 : f32 to vector<16x1xf32>
      %379 = arith.divf %377, %378 : vector<16x1xf32>
      %380 = vector.broadcast %372 : vector<16x1xf32> to vector<16x32xf32>
      %381 = arith.subf %360, %380 : vector<16x32xf32>
      %cst_188 = arith.constant 9.99999974E-6 : f32
      %382 = vector.broadcast %cst_188 : f32 to vector<16x1xf32>
      %383 = arith.addf %379, %382 : vector<16x1xf32>
      %384 = math.rsqrt %383 : vector<16x1xf32>
      %385 = vector.broadcast %384 : vector<16x1xf32> to vector<16x32xf32>
      %386 = arith.mulf %381, %385 : vector<16x32xf32>
      %387 = vector.broadcast %367 : vector<1x32xf32> to vector<16x32xf32>
      %388 = arith.mulf %386, %387 : vector<16x32xf32>
      %389 = vector.broadcast %368 : vector<1x32xf32> to vector<16x32xf32>
      %390 = arith.addf %388, %389 : vector<16x32xf32>
      %391 = vector.shape_cast %390 : vector<16x32xf32> to vector<2x8x32xf32>
      %c0_189 = arith.constant 0 : index
      %c0_190 = arith.constant 0 : index
      %c0_191 = arith.constant 0 : index
      %392 = vector.load %arg25[%c0_189, %c0_190, %c0_191] : memref<2x8x32xf32, #tpu.memory_space<vmem>>, vector<2x8x32xf32>
      tpu.vector_store %arg25[%c0_189, %c0_190, %c0_191], %391 {strides = array<i32>} : memref<2x8x32xf32, #tpu.memory_space<vmem>>, vector<2x8x32xf32>,
      %393 = arith.truncf %390 : vector<16x32xf32> to vector<16x32xbf16>
      %c0_192 = arith.constant 0 : index
      %c0_193 = arith.constant 0 : index
      %394 = vector.load %arg23[%c0_192, %c0_193] : memref<32x128xbf16, #tpu.memory_space<vmem>>, vector<32x128xbf16>
      %cst_194 = arith.constant dense<0.000000e+00> : vector<16x128xf32>
      %395 = tpu.matmul %393, %394, %cst_194 {dimension_numbers = #tpu.dot_dimension_numbers<[1], [0], [0], [1], [0, 0, 1, 1], [], []>} : vector<16x32xbf16>, vector<32x128xbf16>, vector<16x128xf32> -> vector<16x128xf32>
      %c0_195 = arith.constant 0 : index
      %c0_196 = arith.constant 0 : index
      %396 = vector.load %arg24[%c0_195, %c0_196] : memref<1x128xf32, #tpu.memory_space<vmem>>, vector<1x128xf32>
      %397 = vector.broadcast %396 : vector<1x128xf32> to vector<16x128xf32>
      %398 = arith.addf %395, %397 : vector<16x128xf32>
      %399 = vector.shape_cast %398 : vector<16x128xf32> to vector<2x8x128xf32>
      %c0_197 = arith.constant 0 : index
      %c0_198 = arith.constant 0 : index
      %c0_199 = arith.constant 0 : index
      %400 = vector.load %arg26[%c0_197, %c0_198, %c0_199] : memref<2x8x128xf32, #tpu.memory_space<vmem>>, vector<2x8x128xf32>
      tpu.vector_store %arg26[%c0_197, %c0_198, %c0_199], %399 {strides = array<i32>} : memref<2x8x128xf32, #tpu.memory_space<vmem>>, vector<2x8x128xf32>,
    } else {
    }
    return
  }
  func.func @transform_0(%arg0: i32) -> (i32, i32, i32) {
    %c0_i32 = arith.constant 0 : i32
    %c0_i32_0 = arith.constant 0 : i32
    %c0_i32_1 = arith.constant 0 : i32
    %c0_i32_2 = arith.constant 0 : i32
    return %c0_i32, %c0_i32_0, %c0_i32_1 : i32, i32, i32
  }
  func.func @transform_1(%arg0: i32) -> (i32, i32, i32) {
    %c0_i32 = arith.constant 0 : i32
    %c0_i32_0 = arith.constant 0 : i32
    %c0_i32_1 = arith.constant 0 : i32
    %c0_i32_2 = arith.constant 0 : i32
    return %c0_i32, %c0_i32_0, %c0_i32_1 : i32, i32, i32
  }
  func.func @transform_2(%arg0: i32) -> (i32, i32, i32) {
    %c0_i32 = arith.constant 0 : i32
    %c0_i32_0 = arith.constant 0 : i32
    %c0_i32_1 = arith.constant 0 : i32
    %c0_i32_2 = arith.constant 0 : i32
    return %c0_i32, %c0_i32_0, %c0_i32_1 : i32, i32, i32
  }
  func.func @transform_3(%arg0: i32) -> (i32, i32) {
    %c0_i32 = arith.constant 0 : i32
    %c0_i32_0 = arith.constant 0 : i32
    %c0_i32_1 = arith.constant 0 : i32
    return %c0_i32, %c0_i32_0 : i32, i32
  }
  func.func @transform_4(%arg0: i32) -> (i32, i32) {
    %c0_i32 = arith.constant 0 : i32
    %c0_i32_0 = arith.constant 0 : i32
    %c0_i32_1 = arith.constant 0 : i32
    return %c0_i32, %c0_i32_0 : i32, i32
  }
  func.func @transform_5(%arg0: i32) -> (i32, i32, i32) {
    %c0_i32 = arith.constant 0 : i32
    %c0_i32_0 = arith.constant 0 : i32
    %c0_i32_1 = arith.constant 0 : i32
    return %arg0, %c0_i32, %c0_i32_0 : i32, i32, i32
  }
  func.func @transform_6(%arg0: i32) -> (i32, i32, i32, i32) {
    %c0_i32 = arith.constant 0 : i32
    %c0_i32_0 = arith.constant 0 : i32
    %c0_i32_1 = arith.constant 0 : i32
    %c0_i32_2 = arith.constant 0 : i32
    return %arg0, %c0_i32, %c0_i32_0, %c0_i32_1 : i32, i32, i32, i32
  }
  func.func @transform_7(%arg0: i32) -> (i32, i32, i32, i32) {
    %c0_i32 = arith.constant 0 : i32
    %c0_i32_0 = arith.constant 0 : i32
    %c0_i32_1 = arith.constant 0 : i32
    %c0_i32_2 = arith.constant 0 : i32
    return %arg0, %c0_i32, %c0_i32_0, %c0_i32_1 : i32, i32, i32, i32
  }
  func.func @transform_8(%arg0: i32) -> (i32, i32, i32, i32) {
    %c0_i32 = arith.constant 0 : i32
    %c0_i32_0 = arith.constant 0 : i32
    %c0_i32_1 = arith.constant 0 : i32
    %c0_i32_2 = arith.constant 0 : i32
    return %arg0, %c0_i32, %c0_i32_0, %c0_i32_1 : i32, i32, i32, i32
  }
  func.func @transform_9(%arg0: i32) -> (i32, i32, i32, i32) {
    %c0_i32 = arith.constant 0 : i32
    %c0_i32_0 = arith.constant 0 : i32
    %c0_i32_1 = arith.constant 0 : i32
    %c0_i32_2 = arith.constant 0 : i32
    return %arg0, %c0_i32, %c0_i32_0, %c0_i32_1 : i32, i32, i32, i32
  }
  func.func @transform_10(%arg0: i32) -> (i32, i32, i32) {
    %c0_i32 = arith.constant 0 : i32
    %c0_i32_0 = arith.constant 0 : i32
    %c0_i32_1 = arith.constant 0 : i32
    return %arg0, %c0_i32, %c0_i32_0 : i32, i32, i32
  }
  func.func @transform_11(%arg0: i32) -> (i32, i32, i32) {
    %c0_i32 = arith.constant 0 : i32
    %c0_i32_0 = arith.constant 0 : i32
    %c0_i32_1 = arith.constant 0 : i32
    return %arg0, %c0_i32, %c0_i32_0 : i32, i32, i32
  }
  func.func @transform_12(%arg0: i32) -> (i32, i32, i32) {
    %c0_i32 = arith.constant 0 : i32
    %c0_i32_0 = arith.constant 0 : i32
    %c0_i32_1 = arith.constant 0 : i32
    return %arg0, %c0_i32, %c0_i32_0 : i32, i32, i32
  }
  func.func @transform_13(%arg0: i32) -> (i32, i32, i32, i32) {
    %c0_i32 = arith.constant 0 : i32
    %c0_i32_0 = arith.constant 0 : i32
    %c0_i32_1 = arith.constant 0 : i32
    %c0_i32_2 = arith.constant 0 : i32
    return %arg0, %c0_i32, %c0_i32_0, %c0_i32_1 : i32, i32, i32, i32
  }
  func.func @transform_14(%arg0: i32) -> (i32, i32, i32, i32) {
    %c0_i32 = arith.constant 0 : i32
    %c0_i32_0 = arith.constant 0 : i32
    %c0_i32_1 = arith.constant 0 : i32
    %c0_i32_2 = arith.constant 0 : i32
    return %arg0, %c0_i32, %c0_i32_0, %c0_i32_1 : i32, i32, i32, i32
  }
  func.func @transform_15(%arg0: i32) -> (i32, i32, i32, i32) {
    %c0_i32 = arith.constant 0 : i32
    %c0_i32_0 = arith.constant 0 : i32
    %c0_i32_1 = arith.constant 0 : i32
    %c0_i32_2 = arith.constant 0 : i32
    return %arg0, %c0_i32, %c0_i32_0, %c0_i32_1 : i32, i32, i32, i32
  }
  func.func @transform_16(%arg0: i32) -> (i32, i32, i32, i32) {
    %c0_i32 = arith.constant 0 : i32
    %c0_i32_0 = arith.constant 0 : i32
    %c0_i32_1 = arith.constant 0 : i32
    %c0_i32_2 = arith.constant 0 : i32
    return %arg0, %c0_i32, %c0_i32_0, %c0_i32_1 : i32, i32, i32, i32
  }
  func.func @transform_17(%arg0: i32) -> (i32, i32, i32, i32) {
    %c0_i32 = arith.constant 0 : i32
    %c0_i32_0 = arith.constant 0 : i32
    %c0_i32_1 = arith.constant 0 : i32
    %c0_i32_2 = arith.constant 0 : i32
    return %arg0, %c0_i32, %c0_i32_0, %c0_i32_1 : i32, i32, i32, i32
  }
  func.func @transform_18(%arg0: i32) -> (i32, i32, i32) {
    %c0_i32 = arith.constant 0 : i32
    %c0_i32_0 = arith.constant 0 : i32
    %c0_i32_1 = arith.constant 0 : i32
    return %arg0, %c0_i32, %c0_i32_0 : i32, i32, i32
  }
  func.func @transform_19(%arg0: i32) -> (i32, i32, i32) {
    %c0_i32 = arith.constant 0 : i32
    %c0_i32_0 = arith.constant 0 : i32
    %c0_i32_1 = arith.constant 0 : i32
    return %arg0, %c0_i32, %c0_i32_0 : i32, i32, i32
  }
  func.func @transform_20(%arg0: i32) -> (i32, i32, i32) {
    %c0_i32 = arith.constant 0 : i32
    %c0_i32_0 = arith.constant 0 : i32
    %c0_i32_1 = arith.constant 0 : i32
    return %arg0, %c0_i32, %c0_i32_0 : i32, i32, i32
  }
  func.func @transform_21(%arg0: i32) -> (i32, i32) {
    %c0_i32 = arith.constant 0 : i32
    %c0_i32_0 = arith.constant 0 : i32
    %c0_i32_1 = arith.constant 0 : i32
    return %c0_i32, %c0_i32_0 : i32, i32
  }
  func.func @transform_22(%arg0: i32) -> (i32, i32) {
    %c0_i32 = arith.constant 0 : i32
    %c0_i32_0 = arith.constant 0 : i32
    %c0_i32_1 = arith.constant 0 : i32
    return %c0_i32, %c0_i32_0 : i32, i32
  }
  func.func @transform_23(%arg0: i32) -> (i32, i32) {
    %c0_i32 = arith.constant 0 : i32
    %c0_i32_0 = arith.constant 0 : i32
    %c0_i32_1 = arith.constant 0 : i32
    return %c0_i32, %c0_i32_0 : i32, i32
  }
  func.func @transform_24(%arg0: i32) -> (i32, i32, i32) {
    %c0_i32 = arith.constant 0 : i32
    %c0_i32_0 = arith.constant 0 : i32
    %c0_i32_1 = arith.constant 0 : i32
    %c0_i32_2 = arith.constant 0 : i32
    return %c0_i32, %c0_i32_0, %c0_i32_1 : i32, i32, i32
  }
  func.func @transform_25(%arg0: i32) -> (i32, i32, i32) {
    %c0_i32 = arith.constant 0 : i32
    %c0_i32_0 = arith.constant 0 : i32
    %c0_i32_1 = arith.constant 0 : i32
    %c0_i32_2 = arith.constant 0 : i32
    return %c0_i32, %c0_i32_0, %c0_i32_1 : i32, i32, i32
  }
}

module attributes {stable_mosaic.version = 11 : i64} {
  func.func @_cls_heads_kernel(%arg0: i32, %arg1: memref<2x32xf32, #tpu.memory_space<vmem>>, %arg2: memref<2x32xf32, #tpu.memory_space<vmem>>, %arg3: memref<32x128xbf16, #tpu.memory_space<vmem>>, %arg4: memref<1x128xf32, #tpu.memory_space<vmem>>, %arg5: memref<32x128xbf16, #tpu.memory_space<vmem>>, %arg6: memref<1x128xf32, #tpu.memory_space<vmem>>, %arg7: memref<2x128xf32, #tpu.memory_space<vmem>>, %arg8: memref<2x128xf32, #tpu.memory_space<vmem>>) attributes {dimension_semantics = [#tpu.dimension_semantics<arbitrary>], iteration_bounds = array<i64: 1>, scalar_prefetch = 0 : i64, scratch_operands = 0 : i64, tpu.core_type = #tpu.core_type<tc>, window_params = [{pipeline_mode = #tpu.pipeline_mode<synchronous>, transform_indices = @transform_0, window_bounds = array<i64: 2, 32>}, {pipeline_mode = #tpu.pipeline_mode<synchronous>, transform_indices = @transform_1, window_bounds = array<i64: 2, 32>}, {pipeline_mode = #tpu.pipeline_mode<synchronous>, transform_indices = @transform_2, window_bounds = array<i64: 32, 128>}, {pipeline_mode = #tpu.pipeline_mode<synchronous>, transform_indices = @transform_3, window_bounds = array<i64: 1, 128>}, {pipeline_mode = #tpu.pipeline_mode<synchronous>, transform_indices = @transform_4, window_bounds = array<i64: 32, 128>}, {pipeline_mode = #tpu.pipeline_mode<synchronous>, transform_indices = @transform_5, window_bounds = array<i64: 1, 128>}, {pipeline_mode = #tpu.pipeline_mode<synchronous>, transform_indices = @transform_6, window_bounds = array<i64: 2, 128>}, {pipeline_mode = #tpu.pipeline_mode<synchronous>, transform_indices = @transform_7, window_bounds = array<i64: 2, 128>}]} {
    %c0 = arith.constant 0 : index
    %c0_0 = arith.constant 0 : index
    %0 = vector.load %arg1[%c0, %c0_0] : memref<2x32xf32, #tpu.memory_space<vmem>>, vector<2x32xf32>
    %1 = arith.truncf %0 : vector<2x32xf32> to vector<2x32xbf16>
    %c0_1 = arith.constant 0 : index
    %c0_2 = arith.constant 0 : index
    %2 = vector.load %arg3[%c0_1, %c0_2] : memref<32x128xbf16, #tpu.memory_space<vmem>>, vector<32x128xbf16>
    %cst = arith.constant dense<0.000000e+00> : vector<2x128xf32>
    %3 = tpu.matmul %1, %2, %cst {dimension_numbers = #tpu.dot_dimension_numbers<[1], [0], [0], [1], [0, 0, 1, 1], [], []>} : vector<2x32xbf16>, vector<32x128xbf16>, vector<2x128xf32> -> vector<2x128xf32>
    %c0_3 = arith.constant 0 : index
    %c0_4 = arith.constant 0 : index
    %4 = vector.load %arg4[%c0_3, %c0_4] : memref<1x128xf32, #tpu.memory_space<vmem>>, vector<1x128xf32>
    %5 = vector.broadcast %4 : vector<1x128xf32> to vector<2x128xf32>
    %6 = arith.addf %3, %5 : vector<2x128xf32>
    %c0_5 = arith.constant 0 : index
    %c0_6 = arith.constant 0 : index
    %7 = vector.load %arg7[%c0_5, %c0_6] : memref<2x128xf32, #tpu.memory_space<vmem>>, vector<2x128xf32>
    tpu.vector_store %arg7[%c0_5, %c0_6], %6 {strides = array<i32>} : memref<2x128xf32, #tpu.memory_space<vmem>>, vector<2x128xf32>,
    %c0_7 = arith.constant 0 : index
    %c0_8 = arith.constant 0 : index
    %8 = vector.load %arg2[%c0_7, %c0_8] : memref<2x32xf32, #tpu.memory_space<vmem>>, vector<2x32xf32>
    %9 = arith.truncf %8 : vector<2x32xf32> to vector<2x32xbf16>
    %c0_9 = arith.constant 0 : index
    %c0_10 = arith.constant 0 : index
    %10 = vector.load %arg5[%c0_9, %c0_10] : memref<32x128xbf16, #tpu.memory_space<vmem>>, vector<32x128xbf16>
    %cst_11 = arith.constant dense<0.000000e+00> : vector<2x128xf32>
    %11 = tpu.matmul %9, %10, %cst_11 {dimension_numbers = #tpu.dot_dimension_numbers<[1], [0], [0], [1], [0, 0, 1, 1], [], []>} : vector<2x32xbf16>, vector<32x128xbf16>, vector<2x128xf32> -> vector<2x128xf32>
    %c0_12 = arith.constant 0 : index
    %c0_13 = arith.constant 0 : index
    %12 = vector.load %arg6[%c0_12, %c0_13] : memref<1x128xf32, #tpu.memory_space<vmem>>, vector<1x128xf32>
    %13 = vector.broadcast %12 : vector<1x128xf32> to vector<2x128xf32>
    %14 = arith.addf %11, %13 : vector<2x128xf32>
    %c0_14 = arith.constant 0 : index
    %c0_15 = arith.constant 0 : index
    %15 = vector.load %arg8[%c0_14, %c0_15] : memref<2x128xf32, #tpu.memory_space<vmem>>, vector<2x128xf32>
    tpu.vector_store %arg8[%c0_14, %c0_15], %14 {strides = array<i32>} : memref<2x128xf32, #tpu.memory_space<vmem>>, vector<2x128xf32>,
    return
  }
  func.func @transform_0(%arg0: i32) -> (i32, i32) {
    %c0_i32 = arith.constant 0 : i32
    %c0_i32_0 = arith.constant 0 : i32
    %c0_i32_1 = arith.constant 0 : i32
    return %c0_i32, %c0_i32_0 : i32, i32
  }
  func.func @transform_1(%arg0: i32) -> (i32, i32) {
    %c0_i32 = arith.constant 0 : i32
    %c0_i32_0 = arith.constant 0 : i32
    %c0_i32_1 = arith.constant 0 : i32
    return %c0_i32, %c0_i32_0 : i32, i32
  }
  func.func @transform_2(%arg0: i32) -> (i32, i32) {
    %c0_i32 = arith.constant 0 : i32
    %c0_i32_0 = arith.constant 0 : i32
    %c0_i32_1 = arith.constant 0 : i32
    return %c0_i32, %c0_i32_0 : i32, i32
  }
  func.func @transform_3(%arg0: i32) -> (i32, i32) {
    %c0_i32 = arith.constant 0 : i32
    %c0_i32_0 = arith.constant 0 : i32
    %c0_i32_1 = arith.constant 0 : i32
    return %c0_i32, %c0_i32_0 : i32, i32
  }
  func.func @transform_4(%arg0: i32) -> (i32, i32) {
    %c0_i32 = arith.constant 0 : i32
    %c0_i32_0 = arith.constant 0 : i32
    %c0_i32_1 = arith.constant 0 : i32
    return %c0_i32, %c0_i32_0 : i32, i32
  }
  func.func @transform_5(%arg0: i32) -> (i32, i32) {
    %c0_i32 = arith.constant 0 : i32
    %c0_i32_0 = arith.constant 0 : i32
    %c0_i32_1 = arith.constant 0 : i32
    return %c0_i32, %c0_i32_0 : i32, i32
  }
  func.func @transform_6(%arg0: i32) -> (i32, i32) {
    %c0_i32 = arith.constant 0 : i32
    %c0_i32_0 = arith.constant 0 : i32
    %c0_i32_1 = arith.constant 0 : i32
    return %c0_i32, %c0_i32_0 : i32, i32
  }
  func.func @transform_7(%arg0: i32) -> (i32, i32) {
    %c0_i32 = arith.constant 0 : i32
    %c0_i32_0 = arith.constant 0 : i32
    %c0_i32_1 = arith.constant 0 : i32
    return %c0_i32, %c0_i32_0 : i32, i32
  }
}

</mosaic_0001>

<bundles_post_ra>
// kernel: flamingo_forward.5
= control target key start
LH: loop header
LB: loop body
LE: loop exit
PB: predicated region body
PF: predicated region fallthrough
CT: control target
= control target key end

     0   :  { %13 = vsyncpa [#allocation3], 0  ;;  %s289_s0 = inlined_call_operand.vmem [shape: f32[2,32], index: 0, kind: input, shape index: {}]   ;;  %s290_s1 = inlined_call_operand.vmem [shape: f32[2,32], index: 1, kind: input, shape index: {}]   ;;  %s291_s2 = inlined_call_operand.vmem [shape: bf16[32,128], index: 2, kind: input, shape index: {}]   ;;  %s292_s3 = inlined_call_operand.vmem [shape: f32[1,128], index: 3, kind: input, shape index: {}]   ;;  %s293_s4 = inlined_call_operand.vmem [shape: bf16[32,128], index: 4, kind: input, shape index: {}]   ;;  %s294_s5 = inlined_call_operand.vmem [shape: f32[1,128], index: 5, kind: input, shape index: {}]   ;;  %s295_s6 = inlined_call_operand.hbm [shape: f32[2,128], index: 6, kind: output, shape index: {0}]   ;;  %s296_s7 = inlined_call_operand.hbm [shape: f32[2,128], index: 7, kind: output, shape index: {1}]  }
   0x1   :  { %v158_v0 = vld [vmem:[%s291_s2 + $0x8] sm:$0xff]  ;;  %v157_v2 = vld [vmem:[%s291_s2] sm:$0xff] }
   0x2   :  { %v160_v1 = vld [vmem:[%s293_s4 + $0x8] sm:$0xff]  ;;  %v159_v3 = vld [vmem:[%s293_s4] sm:$0xff]  ;;  %60 = vmatpush.bf16.msra.mxu0 %v158_v0 }
   0x3   :  { %v28_v4 = vld [vmem:[%s289_s0] sm:$0x3]  ;;  %99 = vmatpush.bf16.msra.mxu1 %v160_v1 }
   0x4   :  { %v68_v5 = vld [vmem:[%s290_s1] sm:$0x3] }
   0x5   :  { %14 = vsyncpa [#allocation5], 0  ;;  %v29_v6 = vpack.c.bf16 %v28_v4, %v28_v4  ;;  %v69_v7 = vpack.c.bf16 %v68_v5, %v68_v5  ;;  %vm50_vm0 = vcmask 261120   ;;  %v163_v8 = vld [vmem:[%s292_s3] ss:$0 sm:$0xff]  ;;  %s217_s14 = smov [#allocation2]  }
   0x6   :  { %61 = vmatpush.bf16.msra.mxu0 %v157_v2  ;;  %v164_v9 = vld [vmem:[%s294_s5] ss:$0 sm:$0xff]  ;;  %s112_s15 = sshll.u32 %s217_s14, 4  ;;  %s114_s17 = sshll.u32 %s295_s6, 4  ;;  %s113_s15 = int_to_ptr.vmem [resolvable:$true] %s112_s15  ;;  %s115_s17 = int_to_ptr.hbm [resolvable:$true] %s114_s17 }
   0x7   :  { %100 = vmatpush.bf16.msra.mxu1 %v159_v3  ;;  %s218_s18 = smov [#allocation4]   ;;  %s125_s22 = sshll.u32 %s296_s7, 4  ;;  %s126_s22 = int_to_ptr.hbm [resolvable:$true] %s125_s22 }
   0x8   :  { %s123_s19 = sshll.u32 %s218_s18, 4  ;;  %s124_s19 = int_to_ptr.vmem [resolvable:$true] %s123_s19 }
   0x9   :  { %147 = vmatmul.msk.bf16.vlgmr.msra.gmra.mxu0 %vm50_vm0, %v29_v6 }
   0xa   :  { %156 = vmatmul.msk.bf16.vlgmr.msra.gmra.mxu1 %vm50_vm0, %v69_v7 }
  0x86   :  { %v63_v10 = vpop.f32.mrf.mxu0 }
  0x87   :  { %v102_v11 = vpop.f32.mrf.mxu1  ;;  %v64_v12 = vadd.f32 %v163_v8, %v63_v10 }
  0x88   :  { %v103_v13 = vadd.f32 %v164_v9, %v102_v11 }
  0x89   :  { %67 = vst [vmem:[#allocation2] sm:$0x3] %v64_v12 }
  0x8a   :  { %106 = vst [vmem:[#allocation4] sm:$0x3] %v103_v13  ;;  %117 = dma.vmem_to_hbm [thread:$0]  %s113_s15, 32, %s115_s17, [#allocation3]  }
  0x8b   :  { %128 = dma.vmem_to_hbm [thread:$0]  %s124_s19, 32, %s126_s22, [#allocation5]  }
  0x8e   :  { %v65_v14 = vpop.f32.mrf.mxu0 }
  0x8f   :  { %v104_v15 = vpop.f32.mrf.mxu1 }
  0x90   :  { %213 = dma.done.wait [#allocation3], 32  }
  0x91   :  { %214 = vsyncadd [#allocation3], 4294967264 }
  0x92   :  { %215 = dma.done.wait [#allocation5], 32  }
  0x93   :  { %216 = vsyncadd [#allocation5], 4294967264 }
  0x94   :  { %137 = vsyncpa [#allocation3], 1 }
  0x95   :  { %138 = vsyncpa [#allocation5], 1 }

// kernel: flamingo_forward.3
= control target key start
LH: loop header
LB: loop body
LE: loop exit
PB: predicated region body
PF: predicated region fallthrough
CT: control target
= control target key end

     0   :  { %s2136_s13 = smov 0   ;;  %s2406_s0 = inlined_call_operand.vmem [shape: f32[2,4,32], index: 0, kind: input, shape index: {}]   ;;  %s2407_s1 = inlined_call_operand.vmem [shape: f32[4,32], index: 1, kind: input, shape index: {}]   ;;  %s2408_s2 = inlined_call_operand.vmem [shape: f32[2,6,32], index: 2, kind: input, shape index: {}]   ;;  %s2409_s3 = inlined_call_operand.vmem [shape: bf16[2,2,32,16], index: 3, kind: input, shape index: {}]   ;;  %s2410_s4 = inlined_call_operand.vmem [shape: bf16[2,2,32,16], index: 4, kind: input, shape index: {}]   ;;  %s2411_s5 = inlined_call_operand.vmem [shape: bf16[2,2,32,16], index: 5, kind: input, shape index: {}]   ;;  %s2412_s6 = inlined_call_operand.vmem [shape: bf16[2,2,16,32], index: 6, kind: input, shape index: {}]   ;;  %s2413_s7 = inlined_call_operand.vmem [shape: bf16[2,32,128], index: 7, kind: input, shape index: {}]   ;;  %s2414_s8 = inlined_call_operand.vmem [shape: bf16[2,128,32], index: 8, kind: input, shape index: {}]   ;;  %s2415_s9 = inlined_call_operand.vmem [shape: f32[2,32], index: 9, kind: input, shape index: {}]   ;;  %s2416_s10 = inlined_call_operand.vmem [shape: f32[2,4,32], index: 10, kind: output, shape index: {}]  }
   0x1   :  { %2417 = sst [smem:[#allocation3_spill]] %s2408_s2 }
   0x2 LB: > { %s2142_s14 = sadd.s32 4294967295, %s2076_s13   ;;  %p1836_p0 = scmp.ge.s32.totalorder %s2076_s13, 1  ;;  %s2076_s13 = sphi %s2136_s13, %s20_s13  }
   0x3   : > { %p366_p1 = scmp.lt.s32.totalorder %s2076_s13, 3 }
   0x5   : > { %p367_p2 = pnand %p1836_p0, %p366_p1 }
   0x6   : > { %p428_p3 = scmp.lt.s32.totalorder (!%p367_p2), %s2142_s14, 1  ;;  %s2418_s2 = sld [smem:[#allocation3_spill]] (!%p367_p2) }
   0x7   : > { %370 = sbr.rel (%p367_p2) target bundleno = 2623 (0xa3f), region = 60  ;;  %p1850_p4 = scmp.ne.s32.totalorder (!%p367_p2), %s2142_s14, 0 }
   0xc   : > { %s429_s15 = scalar_select %p428_p3, %s2142_s14, 1 }
   0xe   : > { %s1837_s16 = sshll.u32 %s429_s15, 3  ;;  %s1993_s17 = sshll.u32 %s429_s15, 5 }
   0xf   : > { %s2151_s20 = scalar_lea.vmem %s2418_s2, %s1837_s16  ;;  %s2156_s23 = scalar_lea.vmem %s2409_s3, %s1993_s17 }
  0x10   : > { %s2161_s26 = scalar_lea.vmem %s2410_s4, %s1993_s17  ;;  %s2166_s29 = scalar_lea.vmem %s2411_s5, %s1993_s17 }
  0x11   : > { %s1996_s30 = sshll.u32 %s429_s15, 4  ;;  %s1998_s11 = sshll.u32 %s429_s15, 6 }
  0x12   : > { %s2171_s18 = scalar_lea.vmem %s2412_s6, %s1996_s30  ;;  %s2176_s22 = scalar_lea.vmem %s2413_s7, %s1996_s30 }
  0x13   : > { %s2181_s2 = scalar_lea.vmem %s2414_s8, %s1998_s11  ;;  %466 = sbr.rel (%p1850_p4) target bundleno = 27 (0x1b), region = 64 }
  0x18   : > { %v467_v0 = vld [vmem:[%s2407_s1] sm:$0xf]  ;;  %vm468_vm0 = vcmask 257024  }
  0x19   : > { %469 = vst.msk [vmem:[#allocation2] sm:$0xf] %vm468_vm0, %v467_v0 }
  0x1a   : > { %470 = vst.msk [vmem:[#allocation2 + $0x4] sm:$0xf] %vm468_vm0, %v467_v0 }
  0x1b PF: > { %v474_v1 = vld [vmem:[%s2406_s0] sm:$0xf]  ;;  %v475_v2 = vld [vmem:[%s2406_s0 + $0x4] sm:$0xf]  ;;  %vm483_vm1 = vcmask 261120   ;;  %v2078_v5 = vmov 32.0  }
  0x1c   : > { %478 = vst [vmem:[#allocation1] ss:$2 sm:$0xff] %v474_v1  ;;  %2034 = vrcp.f32 %v2078_v5  ;;  %v2079_v11 = vmov 839922192   ;;  %v2080_v13 = vmov 1985246804  }
  0x1d   : > { %480 = vst [vmem:[#allocation1 + $0x1] ss:$2 sm:$0xff] %v475_v2  ;;  %v497_v12 = vunpack.c.l.s4 %v2079_v11  ;;  %v501_v14 = vunpack.c.l.s4 %v2080_v13  ;;  %v2002_v30 = vld [vmem:[%s2161_s26 + $0x8] sm:$0xff]  ;;  %v2001_v32 = vld [vmem:[%s2161_s26] sm:$0xff]  ;;  %vm790_vm6 = vcmask 130048   ;;  %vm910_vm10 = vcmask 1041408  }
  0x1e   : > { %703 = vmatpush.bf16.msra.mxu2 %v2002_v30  ;;  %745 = vmatpush.bf16.msra.mxu3 %v2002_v30  ;;  %v2208_v36 = vld [vmem:[%s2151_s20] sm:$0x3f]  ;;  %v2211_v39 = vld [vmem:[%s2166_s29 + $0x8] sm:$0xff]  ;;  %vm861_vm11 = vcmask 27648   ;;  %vm906_vm12 = vcmask 31744   ;;  %p1990_p5 = scmp.ne.s32.totalorder %s2142_s14, 1 }
  0x1f   : > { %v2196_v16 = vunpack.c.0.s8 %v497_v12  ;;  %v2198_v17 = vunpack.c.0.s8 %v501_v14  ;;  %v545_v40 = vperm.slane %v2208_v36, 0  ;;  %v2003_v42 = vld [vmem:[%s2166_s29] sm:$0xff]  ;;  %v551_v43 = vperm.slane %v2208_v36, 1 }
  0x20   : > { %v2219_v55 = vld [vmem:[#allocation2] sm:$0xf] }
  0x21   : > { %v547_v47 = vrot.slane %v545_v40, 4  ;;  %v553_v50 = vrot.slane %v551_v43, 4  ;;  %v2221_v56 = vld [vmem:[#allocation2 + $0x4] sm:$0xf] }
  0x22   : > { %v2035_v6 = vpop.eup %2034  ;;  %704 = vmatpush.bf16.msra.mxu2 %v2001_v32  ;;  %746 = vmatpush.bf16.msra.mxu3 %v2001_v32 }
  0x23   : > { %v488_v7 = vmul.f32 32.0, %v2035_v6  ;;  %vm492_vm2 = vweird.f32 %v2035_v6 }
  0x24   : > { %v481_v3 = vld.sshfl [vmem:[#allocation1] sm:$0xff pattern:$0x75316420] }
  0x25   : > { %v484_v4 = vsel %vm483_vm1, %v481_v3, 0.0  ;;  %v489_v8 = vsub.f32 1.0, %v488_v7 }
  0x26   : > { %485 = vadd.xlane.f32.xlu0 %v484_v4  ;;  %732 = vmatpush.bf16.msrb.mxu2 %v2211_v39 }
  0x27   : > { %v490_v9 = vmul.f32 %v2035_v6, %v489_v8 }
  0x29   : > { %v491_v10 = vadd.f32 %v2035_v6, %v490_v9 }
  0x2a   : > { %733 = vmatpush.bf16.msrb.mxu2 %v2003_v42 }
  0x2b   : > { %v2194_v15 = vsel %vm492_vm2, %v2035_v6, %v491_v10 }
  0x99   : > { %v486_v18 = vpop.xlane.xlu0 %485 }
  0x9a   : > { %v494_v19 = vmul.f32 %v2194_v15, %v486_v18 }
  0x9c   : > { %v499_v20 = vperm.slane %v494_v19, %v2196_v16  ;;  %v503_v21 = vperm.slane %v494_v19, %v2198_v17 }
  0x9e   : > { %v506_v22 = vsub.f32 %v474_v1, %v499_v20  ;;  %v507_v23 = vsub.f32 %v475_v2, %v503_v21  ;;  %v2000_v20 = vld [vmem:[%s2156_s23 + $0x8] sm:$0xff] }
  0x9f   : > { %671 = vmatpush.bf16.msra.mxu0 %v2000_v20 }
  0xa0   : > { %v508_v24 = vmul.f32 %v506_v22, %v506_v22  ;;  %v509_v25 = vmul.f32 %v507_v23, %v507_v23 }
  0xa2   : > { %512 = vst [vmem:[#allocation1] ss:$2 sm:$0xff] %v508_v24 }
  0xa3   : > { %514 = vst [vmem:[#allocation1 + $0x1] ss:$2 sm:$0xff] %v509_v25 }
  0xaa   : > { %v515_v26 = vld.sshfl [vmem:[#allocation1] sm:$0xff pattern:$0x75316420] }
  0xab   : > { %v517_v27 = vsel %vm483_vm1, %v515_v26, 0.0 }
  0xac   : > { %518 = vadd.xlane.f32.xlu0 %v517_v27 }
 0x11f   : > { %v519_v28 = vpop.xlane.xlu0 %518 }
 0x120   : > { %v520_v29 = vmul.f32 %v519_v28, %v2194_v15 }
 0x122   : > { %v521_v31 = vadd.f32 1e-05, %v520_v29  ;;  %v626_v29 = vperm.slane %v2208_v36, 2 }
 0x124   : > { %2036 = vrsqrt.f32 %v521_v31  ;;  %vm528_vm4 = vweird.f32 %v521_v31 }
 0x12a   : > { %v2037_v33 = vpop.eup %2036 }
 0x12b   : > { %v523_v34 = vmul.f32 %v2037_v33, %v521_v31  ;;  %vm529_vm3 = vweird.f32 %v2037_v33  ;;  %v632_v31 = vperm.slane %v2208_v36, 3 }
 0x12c   : > { %vm530_vm5 = vmor %vm528_vm4, %vm529_vm3 }
 0x12d   : > { %v524_v35 = vmul.f32 %v2037_v33, %v523_v34 }
 0x12f   : > { %v525_v37 = vmul.f32 0.5, %v524_v35 }
 0x131   : > { %v526_v38 = vsub.f32 1.5, %v525_v37  ;;  %v634_v37 = vrot.slane %v632_v31, 4 }
 0x133   : > { %v527_v41 = vmul.f32 %v2037_v33, %v526_v38 }
 0x135   : > { %v531_v44 = vsel %vm530_vm5, %v2037_v33, %v527_v41  ;;  %v628_v33 = vrot.slane %v626_v29, 4 }
 0x136   : > { %v536_v45 = vperm.slane %v531_v44, %v2196_v16  ;;  %v540_v46 = vperm.slane %v531_v44, %v2198_v17 }
 0x138   : > { %v543_v48 = vmul.f32 %v536_v45, %v506_v22  ;;  %v544_v49 = vmul.f32 %v540_v46, %v507_v23  ;;  %v1999_v22 = vld [vmem:[%s2156_s23] sm:$0xff] }
 0x139   : > { %672 = vmatpush.bf16.msra.mxu0 %v1999_v22 }
 0x13a   : > { %v549_v51 = vmul.f32 %v545_v40, %v543_v48  ;;  %v550_v52 = vmul.f32 %v547_v47, %v544_v49 }
 0x13c   : > { %v555_v53 = vadd.f32 %v551_v43, %v549_v51  ;;  %v556_v54 = vadd.f32 %v553_v50, %v550_v52 }
 0x13d   : > { %758 = vmatpush.bf16.msrb.mxu0 %v2211_v39 }
 0x13e   : > { %559 = vst [vmem:[#allocation1] ss:$2 sm:$0xff] %v555_v53 }
 0x13f   : > { %561 = vst [vmem:[#allocation1 + $0x1] ss:$2 sm:$0xff] %v556_v54 }
 0x141   : > { %759 = vmatpush.bf16.msrb.mxu0 %v2003_v42 }
 0x146   : > { %v562_v57 = vld.sshfl [vmem:[#allocation1] sm:$0xff pattern:$0x75316420] }
 0x147   : > { %567 = vst [vmem:[#allocation1] ss:$2 sm:$0xff] %v2219_v55  ;;  %v2224_v58 = vpack.c.bf16 %v562_v57, %v562_v57 }
 0x148   : > { %569 = vst [vmem:[#allocation1 + $0x1] ss:$2 sm:$0xff] %v2221_v56 }
 0x149   : > { %1868 = vmatmul.msk.bf16.vlgmr.msra.gmra.mxu2 %vm483_vm1, %v2224_v58 }
 0x14f   : > { %v570_v59 = vld.sshfl [vmem:[#allocation1] sm:$0xff pattern:$0x75316420] }
 0x150   : > { %v572_v60 = vsel %vm483_vm1, %v570_v59, 0.0 }
 0x151   : > { %573 = vadd.xlane.f32.xlu1 %v572_v60 }
 0x159   : > { %1877 = vmatmul.msk.bf16.vlgmr.msrb.gmra.mxu2 %vm483_vm1, %v2224_v58 }
 0x1c4   : > { %v574_v61 = vpop.xlane.xlu1 %573 }
 0x1c5   : > { %v575_v62 = vmul.f32 %v574_v61, %v2194_v15 }
 0x1c7   : > { %v580_v63 = vperm.slane %v575_v62, %v2196_v16  ;;  %v584_v0 = vperm.slane %v575_v62, %v2198_v17 }
 0x1c9   : > { %v587_v1 = vsub.f32 %v2219_v55, %v580_v63  ;;  %v588_v2 = vsub.f32 %v2221_v56, %v584_v0 }
 0x1cb   : > { %v589_v3 = vmul.f32 %v587_v1, %v587_v1  ;;  %v590_v4 = vmul.f32 %v588_v2, %v588_v2 }
 0x1cc   : > { %v706_v5 = vpop.f32.mrf.mxu2 }
 0x1cd   : > { %593 = vst [vmem:[#allocation1] ss:$2 sm:$0xff] %v589_v3  ;;  %v771_v6 = vrot.slane %v706_v5, 4  ;;  %v773_v7 = vpack.c.bf16 %v706_v5, %v706_v5 }
 0x1ce   : > { %595 = vst [vmem:[#allocation1 + $0x1] ss:$2 sm:$0xff] %v590_v4 }
 0x1cf   : > { %v774_v8 = vpack.c.bf16 %v771_v6, %v771_v6  ;;  %v795_v9 = vsel %vm790_vm6, %v773_v7, 0 }
 0x1d0   : > { %804 = vmatpush.bf16.xpose.msra.mxu1 %v795_v9 }
 0x1d1   : > { %v814_v10 = vsel %vm790_vm6, %v774_v8, 0 }
 0x1d2   : > { %823 = vmatpush.bf16.xpose.msra.mxu2 %v814_v10 }
 0x1d4   : > { %v708_v11 = vpop.f32.mrf.mxu2 }
 0x1d5   : > { %v596_v12 = vld.sshfl [vmem:[#allocation1] sm:$0xff pattern:$0x75316420] }
 0x1d6   : > { %v598_v13 = vsel %vm483_vm1, %v596_v12, 0.0 }
 0x1d7   : > { %599 = vadd.xlane.f32.xlu1 %v598_v13 }
 0x1dc   : > { %v735_v14 = vpop.f32.mrf.mxu2 }
 0x1dd   : > { %v776_v50 = vrot.slane %v735_v14, 4  ;;  %v778_v51 = vpack.c.bf16 %v735_v14, %v735_v14 }
 0x1df   : > { %v779_v57 = vpack.c.bf16 %v776_v50, %v776_v50  ;;  %v950_v62 = vsel %vm910_vm10, %v778_v51, 0 }
 0x1e1   : > { %v969_v0 = vsel %vm910_vm10, %v779_v57, 0 }
 0x1e4   : > { %v737_v18 = vpop.f32.mrf.mxu2 }
 0x24a   : > { %v600_v19 = vpop.xlane.xlu1 %599 }
 0x24b   : > { %v601_v21 = vmul.f32 %v600_v19, %v2194_v15 }
 0x24d   : > { %v602_v23 = vadd.f32 1e-05, %v601_v21 }
 0x24f   : > { %2038 = vrsqrt.f32 %v602_v23  ;;  %vm609_vm8 = vweird.f32 %v602_v23 }
 0x255   : > { %v2039_v24 = vpop.eup %2038 }
 0x256   : > { %v604_v25 = vmul.f32 %v2039_v24, %v602_v23  ;;  %vm610_vm7 = vweird.f32 %v2039_v24 }
 0x257   : > { %vm611_vm9 = vmor %vm609_vm8, %vm610_vm7 }
 0x258   : > { %v605_v26 = vmul.f32 %v2039_v24, %v604_v25  ;;  %v2007_v25 = vld [vmem:[%s2156_s23 + $0x18] sm:$0xff] }
 0x25a   : > { %v606_v27 = vmul.f32 0.5, %v605_v26  ;;  %v2011_v26 = vld [vmem:[%s2166_s29 + $0x18] sm:$0xff] }
 0x25c   : > { %v607_v28 = vsub.f32 1.5, %v606_v27  ;;  %v2008_v27 = vld [vmem:[%s2161_s26 + $0x10] sm:$0xff] }
 0x25e   : > { %v608_v30 = vmul.f32 %v2039_v24, %v607_v28 }
 0x260   : > { %v612_v32 = vsel %vm611_vm9, %v2039_v24, %v608_v30  ;;  %v2009_v24 = vld [vmem:[%s2161_s26 + $0x18] sm:$0xff]  ;;  %v2006_v30 = vld [vmem:[%s2156_s23 + $0x10] sm:$0xff] }
 0x261   : > { %v617_v34 = vperm.slane %v612_v32, %v2196_v16  ;;  %v621_v35 = vperm.slane %v612_v32, %v2198_v17 }
 0x263   : > { %v624_v38 = vmul.f32 %v617_v34, %v587_v1  ;;  %v625_v39 = vmul.f32 %v621_v35, %v588_v2 }
 0x265   : > { %v630_v40 = vmul.f32 %v626_v29, %v624_v38  ;;  %v631_v41 = vmul.f32 %v628_v33, %v625_v39 }
 0x267   : > { %v636_v42 = vadd.f32 %v632_v31, %v630_v40  ;;  %v637_v43 = vadd.f32 %v634_v37, %v631_v41  ;;  %v2010_v31 = vld [vmem:[%s2166_s29 + $0x10] sm:$0xff] }
 0x269   : > { %640 = vst [vmem:[#allocation1] ss:$2 sm:$0xff] %v636_v42 }
 0x26a   : > { %642 = vst [vmem:[#allocation1 + $0x1] ss:$2 sm:$0xff] %v637_v43 }
 0x271   : > { %v643_v44 = vld.sshfl [vmem:[#allocation1] sm:$0xff pattern:$0x75316420] }
 0x272   : > { %v2248_v45 = vpack.c.bf16 %v643_v44, %v643_v44 }
 0x274   : > { %1859 = vmatmul.msk.bf16.vlgmr.msra.gmra.mxu0 %vm483_vm1, %v2248_v45  ;;  %1878 = vmatmul.msk.bf16.vlgmr.msra.gmra.mxu3 %vm483_vm1, %v2248_v45 }
 0x284   : > { %1879 = vmatmul.msk.bf16.vlgmr.msrb.gmra.mxu0 %vm483_vm1, %v2248_v45 }
 0x2f1   : > { %v674_v46 = vpop.f32.mrf.mxu0 }
 0x2f2   : > { %v766_v47 = vrot.slane %v674_v46, 4  ;;  %v768_v48 = vpack.c.bf16 %v674_v46, %v674_v46 }
 0x2f4   : > { %v769_v49 = vpack.c.bf16 %v766_v47, %v766_v47  ;;  %1880 = vmatmul.msk.bf16.vlgmr.msra.gmra.mxu1 %vm790_vm6, %v768_v48 }
 0x2f6   : > { %1881 = vmatmul.msk.bf16.vlgmr.msra.gmra.mxu2 %vm790_vm6, %v769_v49 }
 0x2f7   : > { %v748_v52 = vpop.f32.mrf.mxu3 }
 0x2f8   : > { %v781_v53 = vrot.slane %v748_v52, 4  ;;  %v783_v54 = vpack.c.bf16 %v748_v52, %v748_v52 }
 0x2f9   : > { %v676_v59 = vpop.f32.mrf.mxu0 }
 0x2fa   : > { %v784_v60 = vpack.c.bf16 %v781_v53, %v781_v53  ;;  %v830_v61 = vsel %vm790_vm6, %v783_v54, 0 }
 0x2fb   : > { %839 = vmatpush.bf16.xpose.msrb.mxu3 %v830_v61 }
 0x2fc   : > { %v846_v63 = vsel %vm790_vm6, %v784_v60, 0 }
 0x2fd   : > { %855 = vmatpush.bf16.xpose.msra.mxu0 %v846_v63 }
 0x2ff   : > { %v750_v1 = vpop.f32.mrf.mxu3 }
 0x301   : > { %v761_v2 = vpop.f32.mrf.mxu0 }
 0x302   : > { %v786_v3 = vrot.slane %v761_v2, 4  ;;  %v788_v4 = vpack.c.bf16 %v761_v2, %v761_v2  ;;  %1882 = vmatmul.msk.bf16.vlgmr.msrb.gmra.mxu3 %vm790_vm6, %v768_v48 }
 0x303   : > { %959 = vmatpush.bf16.msra.mxu3 %v950_v62 }
 0x304   : > { %v789_v5 = vpack.c.bf16 %v786_v3, %v786_v3  ;;  %1883 = vmatmul.msk.bf16.vlgmr.msra.gmra.mxu0 %vm790_vm6, %v769_v49  ;;  %v912_v6 = vsel %vm910_vm10, %v788_v4, 0 }
 0x305   : > { %978 = vmatpush.bf16.msrb.mxu0 %v969_v0  ;;  %921 = vmatpush.bf16.msrb.mxu1 %v912_v6 }
 0x306   : > { %v931_v7 = vsel %vm910_vm10, %v789_v5, 0 }
 0x307   : > { %940 = vmatpush.bf16.msrb.mxu2 %v931_v7  ;;  %1107 = vmatpush.bf16.msrb.mxu3 %v2011_v26 }
 0x309   : > { %v763_v8 = vpop.f32.mrf.mxu0  ;;  %1120 = vmatpush.bf16.msra.mxu0 %v2009_v24  ;;  %1047 = vmatpush.bf16.msra.mxu1 %v2007_v25 }
 0x30b   : > { %1077 = vmatpush.bf16.msra.mxu2 %v2009_v24  ;;  %1108 = vmatpush.bf16.msrb.mxu3 %v2010_v31 }
 0x30d   : > { %1121 = vmatpush.bf16.msra.mxu0 %v2008_v27  ;;  %1048 = vmatpush.bf16.msra.mxu1 %v2006_v30 }
 0x30f   : > { %1078 = vmatpush.bf16.msra.mxu2 %v2008_v27 }
 0x371   : > { %v806_v9 = vpop.f32.mrf.mxu1 }
 0x372   : > { %v862_v10 = vsel %vm861_vm11, %v806_v9, -inf }
 0x373   : > { %863 = vmax.xlane.f32.xlu0 %v862_v10 }
 0x379   : > { %v808_v11 = vpop.f32.mrf.mxu1  ;;  %v825_v12 = vpop.f32.mrf.mxu2 }
 0x37a   : > { %v865_v13 = vsel %vm861_vm11, %v825_v12, -inf }
 0x37b   : > { %866 = vmax.xlane.f32.xlu2 %v865_v13 }
 0x381   : > { %v827_v14 = vpop.f32.mrf.mxu2  ;;  %v857_v18 = vpop.f32.mrf.mxu0 }
 0x382   : > { %v871_v19 = vsel %vm861_vm11, %v857_v18, -inf }
 0x383   : > { %872 = vmax.xlane.f32.xlu2 %v871_v19 }
 0x385   : > { %v841_v20 = vpop.f32.mrf.mxu3 }
 0x386   : > { %v868_v21 = vsel %vm861_vm11, %v841_v20, -inf }
 0x387   : > { %869 = vmax.xlane.f32.xlu1 %v868_v21 }
 0x389   : > { %v859_v22 = vpop.f32.mrf.mxu0 }
 0x38d   : > { %v843_v23 = vpop.f32.mrf.mxu3 }
 0x3e6   : > { %v864_v35 = vpop.xlane.xlu0 %863 }
 0x3ee   : > { %v867_v28 = vpop.xlane.xlu2 %866 }
 0x3f6   : > { %v873_v29 = vpop.xlane.xlu2 %872 }
 0x3f7   : > { %v875_v32 = vmax.f32 %v867_v28, %v873_v29 }
 0x3f9   : > { %v877_v33 = vsub.f32 %v825_v12, %v875_v32  ;;  %v883_v34 = vsub.f32 %v857_v18, %v875_v32 }
 0x3fa   : > { %v870_v37 = vpop.xlane.xlu1 %869 }
 0x3fb   : > { %v880_v38 = vmul.f32 1.442695, %v877_v33  ;;  %v886_v39 = vmul.f32 1.442695, %v883_v34  ;;  %v874_v40 = vmax.f32 %v864_v35, %v870_v37 }
 0x3fd   : > { %2040 = vpow2.f32 %v880_v38  ;;  %v876_v41 = vsub.f32 %v806_v9, %v874_v40  ;;  %v882_v42 = vsub.f32 %v841_v20, %v874_v40 }
 0x3fe   : > { %2042 = vpow2.f32 %v886_v39 }
 0x3ff   : > { %v878_v43 = vmul.f32 1.442695, %v876_v41  ;;  %v884_v44 = vmul.f32 1.442695, %v882_v42 }
 0x401   : > { %2044 = vpow2.f32 %v878_v43 }
 0x402   : > { %2046 = vpow2.f32 %v884_v44 }
 0x403   : > { %v2276_v46 = vpop.eup %2040 }
 0x404   : > { %v2278_v47 = vpop.eup %2042  ;;  %v903_v48 = vpack.c.bf16 %v2276_v46, %v2276_v46  ;;  %v891_v42 = vsel %vm861_vm11, %v2276_v46, 0.0 }
 0x405   : > { %v905_v49 = vpack.c.bf16 %v2278_v47, %v2278_v47 }
 0x406   : > { %1887 = vmatmul.msk.bf16.vlgmr.msrb.gmra.mxu0 %vm906_vm12, %v903_v48 }
 0x407   : > { %v2285_v50 = vpop.eup %2044  ;;  %1885 = vmatmul.msk.bf16.vlgmr.msrb.gmra.mxu2 %vm906_vm12, %v905_v49 }
 0x408   : > { %v2288_v51 = vpop.eup %2046  ;;  %v902_v52 = vpack.c.bf16 %v2285_v50, %v2285_v50 }
 0x409   : > { %v904_v53 = vpack.c.bf16 %v2288_v51, %v2288_v51  ;;  %v894_v46 = vsel %vm861_vm11, %v2288_v51, 0.0 }
 0x40a   : > { %1886 = vmatmul.msk.bf16.vlgmr.msra.gmra.mxu3 %vm906_vm12, %v902_v52 }
 0x40b   : > { %1884 = vmatmul.msk.bf16.vlgmr.msrb.gmra.mxu1 %vm906_vm12, %v904_v53 }
 0x40c   : > { %1133 = vmatpush.bf16.msrb.mxu1 %v2011_v26 }
 0x410   : > { %1134 = vmatpush.bf16.msrb.mxu1 %v2010_v31 }
 0x416   : > { %1927 = vmatmul.msk.bf16.vlgmr.msra.gmra.mxu0 %vm483_vm1, %v2248_v45 }
 0x417   : > { %1913 = vmatmul.msk.bf16.vlgmr.msra.gmra.mxu2 %vm483_vm1, %v2224_v58 }
 0x41a   : > { %1926 = vmatmul.msk.bf16.vlgmr.msrb.gmra.mxu3 %vm483_vm1, %v2224_v58 }
 0x41b   : > { %1900 = vmatmul.msk.bf16.vlgmr.msra.gmra.mxu1 %vm483_vm1, %v2248_v45 }
 0x42b   : > { %1928 = vmatmul.msk.bf16.vlgmr.msrb.gmra.mxu1 %vm483_vm1, %v2248_v45 }
 0x483   : > { %v980_v54 = vpop.f32.mrf.mxu0 }
 0x488   : > { %v923_v57 = vpop.f32.mrf.mxu1 }
 0x48a   : > { %v942_v59 = vpop.f32.mrf.mxu2 }
 0x48b   : > { %v2306_v60 = vadd.f32 %v980_v54, %v942_v59  ;;  %v982_v61 = vpop.f32.mrf.mxu0  ;;  %v888_v59 = vsel %vm861_vm11, %v2285_v50, 0.0 }
 0x48c   : > { %v897_v61 = vsel %vm861_vm11, %v2278_v47, 0.0 }
 0x48d   : > { %v961_v62 = vpop.f32.mrf.mxu3 }
 0x48e   : > { %v2308_v63 = vadd.f32 %v961_v62, %v923_v57 }
 0x490   : > { %v925_v0 = vpop.f32.mrf.mxu1 }
 0x492   : > { %v944_v1 = vpop.f32.mrf.mxu2 }
 0x493   : > { %v1123_v2 = vpop.f32.mrf.mxu0 }
 0x494   : > { %v1156_v3 = vrot.slane %v1123_v2, 4  ;;  %v1158_v58 = vpack.c.bf16 %v1123_v2, %v1123_v2 }
 0x495   : > { %v963_v4 = vpop.f32.mrf.mxu3 }
 0x496   : > { %v1159_v5 = vpack.c.bf16 %v1156_v3, %v1156_v3  ;;  %v1204_v6 = vsel %vm790_vm6, %v1158_v58, 0 }
 0x497   : > { %1213 = vmatpush.bf16.xpose.msrb.mxu0 %v1204_v6 }
 0x498   : > { %v1050_v45 = vpop.f32.mrf.mxu1  ;;  %v1220_v7 = vsel %vm790_vm6, %v1159_v5, 0 }
 0x499   : > { %1229 = vmatpush.bf16.xpose.msra.mxu1 %v1220_v7  ;;  %v1141_v8 = vrot.slane %v1050_v45, 4  ;;  %v1143_v13 = vpack.c.bf16 %v1050_v45, %v1050_v45  ;;  %v2005_v45 = vld [vmem:[%s2171_s18] sm:$0xff] }
 0x49a   : > { %v1080_v9 = vpop.f32.mrf.mxu2 }
 0x49b   : > { %v1146_v10 = vrot.slane %v1080_v9, 4  ;;  %v1148_v11 = vpack.c.bf16 %v1080_v9, %v1080_v9  ;;  %v1125_v12 = vpop.f32.mrf.mxu0  ;;  %v1144_v20 = vpack.c.bf16 %v1141_v8, %v1141_v8 }
 0x49d   : > { %v1149_v14 = vpack.c.bf16 %v1146_v10, %v1146_v10  ;;  %v1110_v18 = vpop.f32.mrf.mxu3  ;;  %v1169_v19 = vsel %vm790_vm6, %v1148_v11, 0 }
 0x49e   : > { %v1151_v21 = vrot.slane %v1110_v18, 4  ;;  %v1153_v22 = vpack.c.bf16 %v1110_v18, %v1110_v18  ;;  %1178 = vmatpush.bf16.xpose.msrb.mxu2 %v1169_v19  ;;  %1931 = vmatmul.msk.bf16.vlgmr.msrb.gmra.mxu0 %vm790_vm6, %v1143_v13 }
 0x49f   : > { %v1188_v23 = vsel %vm790_vm6, %v1149_v14, 0 }
 0x4a0   : > { %v1154_v24 = vpack.c.bf16 %v1151_v21, %v1151_v21  ;;  %v1052_v25 = vpop.f32.mrf.mxu1  ;;  %1197 = vmatpush.bf16.xpose.msra.mxu3 %v1188_v23  ;;  %1932 = vmatmul.msk.bf16.vlgmr.msra.gmra.mxu1 %vm790_vm6, %v1144_v20  ;;  %v1321_v26 = vsel %vm910_vm10, %v1153_v22, 0 }
 0x4a1   : > { %1330 = vmatpush.bf16.msra.mxu0 %v1321_v26 }
 0x4a2   : > { %v1082_v27 = vpop.f32.mrf.mxu2  ;;  %v1340_v28 = vsel %vm910_vm10, %v1154_v24, 0 }
 0x4a3   : > { %1349 = vmatpush.bf16.msrb.mxu1 %v1340_v28 }
 0x4a5   : > { %1929 = vmatmul.msk.bf16.vlgmr.msrb.gmra.mxu2 %vm790_vm6, %v1143_v13  ;;  %v1112_v29 = vpop.f32.mrf.mxu3 }
 0x4a7   : > { %1930 = vmatmul.msk.bf16.vlgmr.msra.gmra.mxu3 %vm790_vm6, %v1144_v20 }
 0x4a8   : > { %v1136_v30 = vpop.f32.mrf.mxu1 }
 0x4a9   : > { %v1161_v31 = vrot.slane %v1136_v30, 4  ;;  %v1163_v32 = vpack.c.bf16 %v1136_v30, %v1136_v30 }
 0x4ab   : > { %v1164_v33 = vpack.c.bf16 %v1161_v31, %v1161_v31  ;;  %v1283_v34 = vsel %vm910_vm10, %v1163_v32, 0 }
 0x4ac   : > { %1292 = vmatpush.bf16.msra.mxu2 %v1283_v34 }
 0x4ad   : > { %v1302_v35 = vsel %vm910_vm10, %v1164_v33, 0 }
 0x4ae   : > { %1311 = vmatpush.bf16.msrb.mxu3 %v1302_v35 }
 0x4b0   : > { %v1138_v37 = vpop.f32.mrf.mxu1 }
 0x4b2   : > { %1434 = vmatpush.bf16.msra.mxu3 %v2005_v45 }
 0x51b   : > { %v1215_v38 = vpop.f32.mrf.mxu0 }
 0x51c   : > { %v1241_v39 = vsel %vm861_vm11, %v1215_v38, -inf }
 0x51d   : > { %v1231_v40 = vpop.f32.mrf.mxu1  ;;  %1242 = vmax.xlane.f32.xlu1 %v1241_v39 }
 0x51e   : > { %v1244_v54 = vsel %vm861_vm11, %v1231_v40, -inf }
 0x523   : > { %v1217_v41 = vpop.f32.mrf.mxu0 }
 0x525   : > { %v1233_v43 = vpop.f32.mrf.mxu1  ;;  %892 = vadd.xlane.f32.xlu1 %v891_v42 }
 0x528   : > { %v1180_v44 = vpop.f32.mrf.mxu2 }
 0x529   : > { %v1235_v48 = vsel %vm861_vm11, %v1180_v44, -inf }
 0x52a   : > { %v1199_v49 = vpop.f32.mrf.mxu3  ;;  %1236 = vmax.xlane.f32.xlu2 %v1235_v48 }
 0x52b   : > { %v1238_v52 = vsel %vm861_vm11, %v1199_v49, -inf }
 0x52c   : > { %1239 = vmax.xlane.f32.xlu0 %v1238_v52 }
 0x530   : > { %v1182_v53 = vpop.f32.mrf.mxu2 }
 0x532   : > { %v1201_v57 = vpop.f32.mrf.mxu3  ;;  %1245 = vmax.xlane.f32.xlu2 %v1244_v54 }
 0x534   : > { %889 = vadd.xlane.f32.xlu0 %v888_v59 }
 0x53a   : > { %895 = vadd.xlane.f32.xlu2 %v894_v46 }
 0x53c   : > { %898 = vadd.xlane.f32.xlu0 %v897_v61 }
 0x590   : > { %v1243_v62 = vpop.xlane.xlu1 %1242 }
 0x598   : > { %v893_v22 = vpop.xlane.xlu1 %892 }
 0x59d   : > { %v1237_v0 = vpop.xlane.xlu2 %1236 }
 0x59e   : > { %v1247_v1 = vmax.f32 %v1237_v0, %v1243_v62 }
 0x59f   : > { %v1240_v2 = vpop.xlane.xlu0 %1239 }
 0x5a0   : > { %v1249_v3 = vsub.f32 %v1180_v44, %v1247_v1  ;;  %v1255_v58 = vsub.f32 %v1215_v38, %v1247_v1 }
 0x5a2   : > { %v1251_v4 = vmul.f32 1.442695, %v1249_v3  ;;  %v1257_v5 = vmul.f32 1.442695, %v1255_v58  ;;  %v2012_v3 = vld [vmem:[%s2171_s18 + $0x8] sm:$0xff] }
 0x5a3   : > { %1412 = vmatpush.bf16.msrb.mxu2 %v2012_v3 }
 0x5a4   : > { %2048 = vpow2.f32 %v1251_v4 }
 0x5a5   : > { %2050 = vpow2.f32 %v1257_v5  ;;  %v1246_v50 = vpop.xlane.xlu2 %1245 }
 0x5a6   : > { %v1248_v6 = vmax.f32 %v1240_v2, %v1246_v50 }
 0x5a7   : > { %v890_v51 = vpop.xlane.xlu0 %889 }
 0x5a8   : > { %v1250_v7 = vsub.f32 %v1199_v49, %v1248_v6  ;;  %v1256_v8 = vsub.f32 %v1231_v40, %v1248_v6 }
 0x5aa   : > { %v2049_v9 = vpop.eup %2048  ;;  %v1253_v47 = vmul.f32 1.442695, %v1250_v7  ;;  %v1259_v10 = vmul.f32 1.442695, %v1256_v8 }
 0x5ab   : > { %v2051_v11 = vpop.eup %2050  ;;  %v1275_v12 = vpack.c.bf16 %v2049_v9, %v2049_v9  ;;  %v1261_v13 = vsel %vm861_vm11, %v2049_v9, 0.0 }
 0x5ac   : > { %v1277_v14 = vpack.c.bf16 %v2051_v11, %v2051_v11  ;;  %2052 = vpow2.f32 %v1253_v47  ;;  %v1267_v18 = vsel %vm861_vm11, %v2051_v11, 0.0  ;;  %1262 = vadd.xlane.f32.xlu1 %v1261_v13 }
 0x5ad   : > { %2054 = vpow2.f32 %v1259_v10  ;;  %1268 = vadd.xlane.f32.xlu0 %v1267_v18  ;;  %v896_v19 = vpop.xlane.xlu2 %895  ;;  %1935 = vmatmul.msk.bf16.vlgmr.msra.gmra.mxu0 %vm906_vm12, %v1275_v12 }
 0x5ae   : > { %v900_v20 = vadd.f32 %v896_v19, %v890_v51  ;;  %1933 = vmatmul.msk.bf16.vlgmr.msra.gmra.mxu2 %vm906_vm12, %v1277_v14 }
 0x5af   : > { %v899_v21 = vpop.xlane.xlu0 %898 }
 0x5b0   : > { %2056 = vrcp.f32 %v900_v20  ;;  %v901_v23 = vadd.f32 %v899_v21, %v893_v22  ;;  %v995_v34 = vand.u32 2147483648, %v900_v20  ;;  %v993_v38 = vand.u32 2147483647, %v900_v20 }
 0x5b1   : > { %vm989_vm14 = vweird.f32 %v900_v20 }
 0x5b2   : > { %v2053_v24 = vpop.eup %2052  ;;  %2058 = vrcp.f32 %v901_v23  ;;  %v1010_v41 = vand.u32 2147483648, %v901_v23  ;;  %v996_v42 = vor.u32 1.1754944e-38, %v995_v34  ;;  %v1008_v44 = vand.u32 2147483647, %v901_v23 }
 0x5b3   : > { %v2055_v25 = vpop.eup %2054  ;;  %v1276_v26 = vpack.c.bf16 %v2053_v24, %v2053_v24  ;;  %v1264_v28 = vsel %vm861_vm11, %v2053_v24, 0.0  ;;  %vm994_vm2 = vcmp.eq.f32.partialorder %v993_v38, 8.507059e+37  ;;  %vm1004_vm3 = vweird.f32 %v901_v23 }
 0x5b4   : > { %v1278_v27 = vpack.c.bf16 %v2055_v25, %v2055_v25  ;;  %v1270_v29 = vsel %vm861_vm11, %v2055_v25, 0.0  ;;  %1265 = vadd.xlane.f32.xlu2 %v1264_v28  ;;  %v1011_v54 = vor.u32 1.1754944e-38, %v1010_v41  ;;  %vm1009_vm5 = vcmp.eq.f32.partialorder %v1008_v44, 8.507059e+37 }
 0x5b5   : > { %1271 = vadd.xlane.f32.xlu1 %v1270_v29  ;;  %1936 = vmatmul.msk.bf16.vlgmr.msrb.gmra.mxu1 %vm906_vm12, %v1276_v26 }
 0x5b6   : > { %v2057_v30 = vpop.eup %2056  ;;  %1934 = vmatmul.msk.bf16.vlgmr.msrb.gmra.mxu3 %vm906_vm12, %v1278_v27 }
 0x5b7   : > { %v985_v31 = vmul.f32 %v2057_v30, %v900_v20  ;;  %vm990_vm13 = vweird.f32 %v2057_v30 }
 0x5b8   : > { %v2059_v32 = vpop.eup %2058  ;;  %vm991_vm15 = vmor %vm989_vm14, %vm990_vm13 }
 0x5b9   : > { %v986_v33 = vsub.f32 1.0, %v985_v31  ;;  %v1000_v35 = vmul.f32 %v2059_v32, %v901_v23  ;;  %vm1005_vm0 = vweird.f32 %v2059_v32 }
 0x5ba   : > { %vm1006_vm4 = vmor %vm1004_vm3, %vm1005_vm0 }
 0x5bb   : > { %v987_v37 = vmul.f32 %v2057_v30, %v986_v33  ;;  %v1001_v39 = vsub.f32 1.0, %v1000_v35 }
 0x5bd   : > { %v988_v40 = vadd.f32 %v2057_v30, %v987_v37  ;;  %v1002_v43 = vmul.f32 %v2059_v32, %v1001_v39 }
 0x5bf   : > { %v992_v48 = vsel %vm991_vm15, %v2057_v30, %v988_v40  ;;  %v1003_v52 = vadd.f32 %v2059_v32, %v1002_v43 }
 0x5c0   : > { %v997_v49 = vsel %vm994_vm2, %v996_v42, %v992_v48  ;;  %vm1650_vm2 = vcmask 257024  }
 0x5c1   : > { %v998_v53 = vmul.f32 %v997_v49, %v2308_v63  ;;  %v1007_v57 = vsel %vm1006_vm4, %v2059_v32, %v1003_v52 }
 0x5c2   : > { %v1012_v59 = vsel %vm1009_vm5, %v1011_v54, %v1007_v57 }
 0x5c3   : > { %1016 = vst [vmem:[#allocation1] ss:$2 sm:$0xff] %v998_v53  ;;  %v1013_v46 = vmul.f32 %v1012_v59, %v2306_v60 }
 0x5c5   : > { %1018 = vst [vmem:[#allocation1 + $0x1] ss:$2 sm:$0xff] %v1013_v46 }
 0x5cc   : > { %v1019_v61 = vld.sshfl [vmem:[#allocation1] sm:$0xff pattern:$0x75316420] }
 0x5cd   : > { %v1021_v62 = vpack.c.bf16 %v1019_v61, %v1019_v61 }
 0x5cf   : > { %1948 = vmatmul.msk.bf16.vlgmr.msra.gmra.mxu3 %vm790_vm6, %v1021_v62 }
 0x61f   : > { %v1263_v0 = vpop.xlane.xlu1 %1262 }
 0x620   : > { %v1269_v1 = vpop.xlane.xlu0 %1268 }
 0x621   : > { %v1273_v2 = vadd.f32 %v1269_v1, %v1263_v0 }
 0x623   : > { %2060 = vrcp.f32 %v1273_v2  ;;  %v1366_v60 = vand.u32 2147483648, %v1273_v2  ;;  %v1364_v7 = vand.u32 2147483647, %v1273_v2  ;;  %vm1360_vm8 = vweird.f32 %v1273_v2 }
 0x625   : > { %v1367_v10 = vor.u32 1.1754944e-38, %v1366_v60  ;;  %vm1365_vm10 = vcmp.eq.f32.partialorder %v1364_v7, 8.507059e+37  ;;  %v1506_v7 = vperm.slane %v2208_v36, 4 }
 0x627   : > { %v1266_v63 = vpop.xlane.xlu2 %1265 }
 0x628   : > { %v1272_v58 = vpop.xlane.xlu1 %1271 }
 0x629   : > { %v2061_v4 = vpop.eup %2060  ;;  %v1274_v5 = vadd.f32 %v1272_v58, %v1266_v63  ;;  %v2013_v63 = vld [vmem:[%s2176_s22] sm:$0xff] }
 0x62a   : > { %v1356_v50 = vmul.f32 %v2061_v4, %v1273_v2  ;;  %v1332_v6 = vpop.f32.mrf.mxu0  ;;  %vm1361_vm7 = vweird.f32 %v2061_v4  ;;  %v2014_v2 = vld [vmem:[%s2176_s22 + $0x8] sm:$0xff] }
 0x62b   : > { %2062 = vrcp.f32 %v1274_v5  ;;  %vm1362_vm9 = vmor %vm1360_vm8, %vm1361_vm7  ;;  %v1381_v22 = vand.u32 2147483648, %v1274_v5  ;;  %v1379_v24 = vand.u32 2147483647, %v1274_v5  ;;  %vm1375_vm12 = vweird.f32 %v1274_v5  ;;  %1551 = vmatpush.bf16.msrb.mxu0 %v2014_v2 }
 0x62c   : > { %v1357_v45 = vsub.f32 1.0, %v1356_v50 }
 0x62d   : > { %v1382_v28 = vor.u32 1.1754944e-38, %v1381_v22  ;;  %vm1380_vm14 = vcmp.eq.f32.partialorder %v1379_v24, 8.507059e+37  ;;  %v2020_v24 = vld [vmem:[%s2181_s2 + $0x28] sm:$0xff] }
 0x62e   : > { %v1358_v51 = vmul.f32 %v2061_v4, %v1357_v45 }
 0x62f   : > { %1552 = vmatpush.bf16.msrb.mxu0 %v2013_v63 }
 0x630   : > { %v1359_v8 = vadd.f32 %v2061_v4, %v1358_v51 }
 0x631   : > { %v2063_v9 = vpop.eup %2062  ;;  %v1294_v47 = vpop.f32.mrf.mxu2 }
 0x632   : > { %v1371_v11 = vmul.f32 %v2063_v9, %v1274_v5  ;;  %v1333_v12 = vadd.f32 %v1332_v6, %v1294_v47  ;;  %v1363_v13 = vsel %vm1362_vm9, %v2061_v4, %v1359_v8  ;;  %v1334_v14 = vpop.f32.mrf.mxu0  ;;  %v1351_v19 = vpop.f32.mrf.mxu1  ;;  %vm1376_vm11 = vweird.f32 %v2063_v9  ;;  %v2022_v4 = vld [vmem:[%s2181_s2 + $0x38] sm:$0xff]  ;;  %v2021_v6 = vld [vmem:[%s2181_s2 + $0x30] sm:$0xff] }
 0x633   : > { %v1368_v18 = vsel %vm1365_vm10, %v1367_v10, %v1363_v13  ;;  %vm1377_vm13 = vmor %vm1375_vm12, %vm1376_vm11  ;;  %1632 = vmatpush.bf16.msra.mxu1 %v2022_v4  ;;  %v1508_v10 = vrot.slane %v1506_v7, 4 }
 0x634   : > { %v1372_v20 = vsub.f32 1.0, %v1371_v11  ;;  %v1369_v21 = vmul.f32 %v1368_v18, %v1333_v12 }
 0x636   : > { %1387 = vst [vmem:[#allocation1] ss:$2 sm:$0xff] %v1369_v21  ;;  %v1373_v23 = vmul.f32 %v2063_v9, %v1372_v20 }
 0x637   : > { %1633 = vmatpush.bf16.msra.mxu1 %v2021_v6 }
 0x638   : > { %v1374_v25 = vadd.f32 %v2063_v9, %v1373_v23 }
 0x639   : > { %v1296_v26 = vpop.f32.mrf.mxu2  ;;  %v1313_v27 = vpop.f32.mrf.mxu3 }
 0x63a   : > { %v1352_v29 = vadd.f32 %v1351_v19, %v1313_v27  ;;  %v1378_v30 = vsel %vm1377_vm13, %v2063_v9, %v1374_v25  ;;  %v1353_v32 = vpop.f32.mrf.mxu1  ;;  %v1512_v9 = vperm.slane %v2208_v36, 5  ;;  %v2019_v25 = vld [vmem:[%s2181_s2 + $0x20] sm:$0xff]  ;;  %v2018_v26 = vld [vmem:[%s2181_s2 + $0x18] sm:$0xff]  ;;  %v2017_v27 = vld [vmem:[%s2181_s2 + $0x10] sm:$0xff] }
 0x63b   : > { %v1383_v31 = vsel %vm1380_vm14, %v1382_v28, %v1378_v30  ;;  %1634 = vmatpush.bf16.msra.mxu1 %v2020_v24  ;;  %v2016_v28 = vld [vmem:[%s2181_s2 + $0x8] sm:$0xff] }
 0x63c   : > { %v1384_v33 = vmul.f32 %v1383_v31, %v1352_v29  ;;  %v1514_v13 = vrot.slane %v1512_v9, 4  ;;  %v2015_v29 = vld [vmem:[%s2181_s2] sm:$0xff] }
 0x63e   : > { %1389 = vst [vmem:[#allocation1 + $0x1] ss:$2 sm:$0xff] %v1384_v33 }
 0x63f   : > { %1635 = vmatpush.bf16.msra.mxu1 %v2019_v25 }
 0x641   : > { %v1315_v34 = vpop.f32.mrf.mxu3 }
 0x643   : > { %1636 = vmatpush.bf16.msra.mxu1 %v2018_v26 }
 0x645   : > { %v1390_v35 = vld.sshfl [vmem:[#allocation1] sm:$0xff pattern:$0x75316420] }
 0x646   : > { %v1392_v37 = vpack.c.bf16 %v1390_v35, %v1390_v35 }
 0x647   : > { %1637 = vmatpush.bf16.msra.mxu1 %v2017_v27 }
 0x648   : > { %1943 = vmatmul.msk.bf16.vlgmr.msrb.gmra.mxu2 %vm790_vm6, %v1392_v37 }
 0x64b   : > { %1638 = vmatpush.bf16.msra.mxu1 %v2016_v28 }
 0x64f   : > { %1639 = vmatpush.bf16.msra.mxu1 %v2015_v29 }
 0x652   : > { %v1436_v38 = vpop.f32.mrf.mxu3 }
 0x65a   : > { %v1438_v39 = vpop.f32.mrf.mxu3 }
 0x6cb   : > { %v1414_v40 = vpop.f32.mrf.mxu2 }
 0x6cc   : > { %v1437_v41 = vadd.f32 %v1436_v38, %v1414_v40 }
 0x6ce   : > { %v1441_v42 = vrot.slane %v1437_v41, 4  ;;  %v2349_v43 = vadd.f32 %v1437_v41, %v2219_v55 }
 0x6d0   : > { %v2352_v44 = vadd.f32 %v1441_v42, %v2221_v56  ;;  %1447 = vst [vmem:[#allocation1] ss:$2 sm:$0xff] %v2349_v43 }
 0x6d2   : > { %1449 = vst [vmem:[#allocation1 + $0x1] ss:$2 sm:$0xff] %v2352_v44 }
 0x6d3   : > { %v1416_v48 = vpop.f32.mrf.mxu2 }
 0x6d9   : > { %v1450_v49 = vld.sshfl [vmem:[#allocation1] sm:$0xff pattern:$0x75316420] }
 0x6da   : > { %v1452_v52 = vsel %vm483_vm1, %v1450_v49, 0.0 }
 0x6db   : > { %1453 = vadd.xlane.f32.xlu2 %v1452_v52 }
 0x74e   : > { %v1454_v53 = vpop.xlane.xlu2 %1453 }
 0x74f   : > { %v1455_v54 = vmul.f32 %v1454_v53, %v2194_v15 }
 0x751   : > { %v1460_v55 = vperm.slane %v1455_v54, %v2196_v16  ;;  %v1464_v57 = vperm.slane %v1455_v54, %v2198_v17 }
 0x753   : > { %v1467_v56 = vsub.f32 %v2349_v43, %v1460_v55  ;;  %v1468_v59 = vsub.f32 %v2352_v44, %v1464_v57 }
 0x755   : > { %v1469_v46 = vmul.f32 %v1467_v56, %v1467_v56  ;;  %v1470_v61 = vmul.f32 %v1468_v59, %v1468_v59 }
 0x757   : > { %1473 = vst [vmem:[#allocation1] ss:$2 sm:$0xff] %v1469_v46 }
 0x758   : > { %1475 = vst [vmem:[#allocation1 + $0x1] ss:$2 sm:$0xff] %v1470_v61 }
 0x75f   : > { %v1476_v62 = vld.sshfl [vmem:[#allocation1] sm:$0xff pattern:$0x75316420] }
 0x760   : > { %v1478_v0 = vsel %vm483_vm1, %v1476_v62, 0.0 }
 0x761   : > { %1479 = vadd.xlane.f32.xlu0 %v1478_v0 }
 0x7d4   : > { %v1480_v1 = vpop.xlane.xlu0 %1479 }
 0x7d5   : > { %v1481_v3 = vmul.f32 %v1480_v1, %v2194_v15 }
 0x7d7   : > { %v1482_v58 = vadd.f32 1e-05, %v1481_v3 }
 0x7d9   : > { %2064 = vrsqrt.f32 %v1482_v58  ;;  %vm1489_vm15 = vweird.f32 %v1482_v58 }
 0x7df   : > { %v2065_v5 = vpop.eup %2064 }
 0x7e0   : > { %v1484_v50 = vmul.f32 %v2065_v5, %v1482_v58  ;;  %vm1490_vm6 = vweird.f32 %v2065_v5 }
 0x7e1   : > { %vm1491_vm0 = vmor %vm1489_vm15, %vm1490_vm6 }
 0x7e2   : > { %v1485_v45 = vmul.f32 %v2065_v5, %v1484_v50 }
 0x7e4   : > { %v1486_v60 = vmul.f32 0.5, %v1485_v45 }
 0x7e6   : > { %v1487_v51 = vsub.f32 1.5, %v1486_v60 }
 0x7e8   : > { %v1488_v8 = vmul.f32 %v2065_v5, %v1487_v51 }
 0x7ea   : > { %v1492_v47 = vsel %vm1491_vm0, %v2065_v5, %v1488_v8 }
 0x7eb   : > { %v1497_v11 = vperm.slane %v1492_v47, %v2196_v16  ;;  %v1501_v12 = vperm.slane %v1492_v47, %v2198_v17 }
 0x7ed   : > { %v1504_v14 = vmul.f32 %v1497_v11, %v1467_v56  ;;  %v1505_v18 = vmul.f32 %v1501_v12, %v1468_v59 }
 0x7ef   : > { %v1510_v19 = vmul.f32 %v1506_v7, %v1504_v14  ;;  %v1511_v20 = vmul.f32 %v1508_v10, %v1505_v18 }
 0x7f1   : > { %v1516_v21 = vadd.f32 %v1512_v9, %v1510_v19  ;;  %v1517_v22 = vadd.f32 %v1514_v13, %v1511_v20 }
 0x7f3   : > { %1520 = vst [vmem:[#allocation1] ss:$2 sm:$0xff] %v1516_v21 }
 0x7f4   : > { %1522 = vst [vmem:[#allocation1 + $0x1] ss:$2 sm:$0xff] %v1517_v22 }
 0x7fb   : > { %v1523_v36 = vld.sshfl [vmem:[#allocation1] sm:$0xff pattern:$0x75316420] }
 0x7fc   : > { %v1525_v23 = vpack.c.bf16 %v1523_v36, %v1523_v36 }
 0x7fe   : > { %1957 = vmatmul.msk.bf16.vlgmr.msrb.gmra.mxu0 %vm483_vm1, %v1525_v23 }
 0x87b   : > { %v1554_v30 = vpop.f32.mrf.mxu0 }
 0x87c   : > { %v1558_v31 = vmul.f32 %v1554_v30, %v1554_v30 }
 0x87e   : > { %v1559_v32 = vmul.f32 %v1558_v31, %v1554_v30 }
 0x880   : > { %v1560_v33 = vmul.f32 0.044715, %v1559_v32 }
 0x882   : > { %v1561_v34 = vadd.f32 %v1560_v33, %v1554_v30 }
 0x883   : > { %v1556_v35 = vpop.f32.mrf.mxu0 }
 0x884   : > { %v1562_v37 = vmul.f32 0.7978846, %v1561_v34 }
 0x886   : > { %2066 = vtanh.f32 %v1562_v37 }
 0x88c   : > { %v2067_v38 = vpop.eup %2066 }
 0x88d   : > { %v1564_v39 = vadd.f32 1.0, %v2067_v38 }
 0x88f   : > { %v1565_v40 = vmul.f32 0.5, %v1564_v39 }
 0x891   : > { %v1566_v41 = vmul.f32 %v1565_v40, %v1554_v30 }
 0x893   : > { %v1567_v42 = vpack.c.bf16 %v1566_v41, %v1566_v41 }
 0x895   : > { %1640 = vmatmul.bf16.vlgmr.msra.gmra.mxu1 %v1567_v42 }
 0x912   : > { %v1641_v48 = vpop.f32.mrf.mxu1 }
 0x913   : > { %v1646_v49 = vrot.slane %v1641_v48, 4  ;;  %v1648_v52 = vadd.f32 %v1641_v48, %v2349_v43 }
 0x915   : > { %v1649_v53 = vadd.f32 %v1646_v49, %v2352_v44  ;;  %1651 = vst.msk [vmem:[#allocation2] sm:$0xf] %vm1650_vm2, %v1648_v52 }
 0x916   : > { %1656 = sbr.rel (%p1990_p5) target bundleno = 2623 (0xa3f), region = 68 }
 0x917   : > { %1652 = vst.msk [vmem:[#allocation2 + $0x4] sm:$0xf] %vm1650_vm2, %v1649_v53 }
 0x91a   : > { %v1643_v54 = vpop.f32.mrf.mxu1 }
 0x91b   : > { %1660 = vst [vmem:[#allocation1] ss:$2 sm:$0xff] %v1648_v52  ;;  %v1657_v6 = vld [vmem:[%s2415_s9] sm:$0x3] }
 0x91c   : > { %1662 = vst [vmem:[#allocation1 + $0x1] ss:$2 sm:$0xff] %v1649_v53  ;;  %v1719_v51 = vperm.slane %v1657_v6, 0  ;;  %v1725_v8 = vperm.slane %v1657_v6, 1 }
 0x91e   : > { %v1721_v10 = vrot.slane %v1719_v51, 4  ;;  %v1727_v13 = vrot.slane %v1725_v8, 4 }
 0x923   : > { %v1663_v55 = vld.sshfl [vmem:[#allocation1] sm:$0xff pattern:$0x75316420] }
 0x924   : > { %v1665_v57 = vsel %vm483_vm1, %v1663_v55, 0.0 }
 0x925   : > { %1666 = vadd.xlane.f32.xlu0 %v1665_v57 }
 0x998   : > { %v1667_v56 = vpop.xlane.xlu0 %1666 }
 0x999   : > { %v1668_v59 = vmul.f32 %v1667_v56, %v2194_v15 }
 0x99b   : > { %v1673_v43 = vperm.slane %v1668_v59, %v2196_v16  ;;  %v1677_v44 = vperm.slane %v1668_v59, %v2198_v17 }
 0x99d   : > { %v1680_v46 = vsub.f32 %v1648_v52, %v1673_v43  ;;  %v1681_v61 = vsub.f32 %v1649_v53, %v1677_v44 }
 0x99f   : > { %v1682_v62 = vmul.f32 %v1680_v46, %v1680_v46  ;;  %v1683_v0 = vmul.f32 %v1681_v61, %v1681_v61 }
 0x9a1   : > { %1686 = vst [vmem:[#allocation1] ss:$2 sm:$0xff] %v1682_v62 }
 0x9a2   : > { %1688 = vst [vmem:[#allocation1 + $0x1] ss:$2 sm:$0xff] %v1683_v0 }
 0x9a9   : > { %v1689_v1 = vld.sshfl [vmem:[#allocation1] sm:$0xff pattern:$0x75316420] }
 0x9aa   : > { %v1691_v2 = vsel %vm483_vm1, %v1689_v1, 0.0 }
 0x9ab   : > { %1692 = vadd.xlane.f32.xlu0 %v1691_v2 }
 0xa1e   : > { %v1693_v3 = vpop.xlane.xlu0 %1692 }
 0xa1f   : > { %v1694_v63 = vmul.f32 %v1693_v3, %v2194_v15 }
 0xa21   : > { %v1695_v58 = vadd.f32 1e-05, %v1694_v63 }
 0xa23   : > { %2068 = vrsqrt.f32 %v1695_v58  ;;  %vm1702_vm4 = vweird.f32 %v1695_v58 }
 0xa29   : > { %v2069_v4 = vpop.eup %2068 }
 0xa2a   : > { %v1697_v5 = vmul.f32 %v2069_v4, %v1695_v58  ;;  %vm1703_vm3 = vweird.f32 %v2069_v4 }
 0xa2b   : > { %vm1704_vm1 = vmor %vm1702_vm4, %vm1703_vm3 }
 0xa2c   : > { %v1698_v50 = vmul.f32 %v2069_v4, %v1697_v5 }
 0xa2e   : > { %v1699_v45 = vmul.f32 0.5, %v1698_v50 }
 0xa30   : > { %v1700_v60 = vsub.f32 1.5, %v1699_v45 }
 0xa32   : > { %v1701_v7 = vmul.f32 %v2069_v4, %v1700_v60 }
 0xa34   : > { %v1705_v9 = vsel %vm1704_vm1, %v2069_v4, %v1701_v7 }
 0xa35   : > { %v1710_v15 = vperm.slane %v1705_v9, %v2196_v16  ;;  %v1714_v47 = vperm.slane %v1705_v9, %v2198_v17 }
 0xa37   : > { %v1717_v11 = vmul.f32 %v1710_v15, %v1680_v46  ;;  %v1718_v12 = vmul.f32 %v1714_v47, %v1681_v61 }
 0xa39   : > { %v1723_v14 = vmul.f32 %v1719_v51, %v1717_v11  ;;  %v1724_v18 = vmul.f32 %v1721_v10, %v1718_v12 }
 0xa3b   : > { %v1729_v19 = vadd.f32 %v1725_v8, %v1723_v14  ;;  %v1730_v20 = vadd.f32 %v1727_v13, %v1724_v18 }
 0xa3d   : > { %1731 = vst.msk [vmem:[%s2416_s10] sm:$0xf] %vm1650_vm2, %v1729_v19 }
 0xa3e   : > { %1732 = vst.msk [vmem:[%s2416_s10 + $0x4] sm:$0xf] %vm1650_vm2, %v1730_v20 }
 0xa3f PF: > { %s20_s13 = sadd.s32 1, %s2076_s13  }
 0xa40   : > { %p17_p6 = scmp.ge.s32.totalorder %s20_s13, 4  }
 0xa42   :  { %19 = sbr.rel (!%p17_p6) target bundleno = 2 (0x2), region = 129 }

// kernel: flamingo_forward.4
= control target key start
LH: loop header
LB: loop body
LE: loop exit
PB: predicated region body
PF: predicated region fallthrough
CT: control target
= control target key end

     0   :  { %s4105_s0 = inlined_call_operand.vmem [shape: f32[2,8,32], index: 0, kind: input, shape index: {}]   ;;  %s4106_s1 = inlined_call_operand.vmem [shape: f32[2,4,32], index: 1, kind: input, shape index: {}]   ;;  %s4107_s2 = inlined_call_operand.vmem [shape: s32[2,8,1], index: 2, kind: input, shape index: {}]   ;;  %s4108_s3 = inlined_call_operand.vmem [shape: s32[1,4], index: 3, kind: input, shape index: {}]   ;;  %s4109_s4 = inlined_call_operand.vmem [shape: f32[2,2], index: 4, kind: input, shape index: {}]   ;;  %s4110_s5 = inlined_call_operand.vmem [shape: f32[2,4,32], index: 5, kind: input, shape index: {}]   ;;  %s4111_s6 = inlined_call_operand.vmem [shape: bf16[2,2,32,16], index: 6, kind: input, shape index: {}]   ;;  %s4112_s7 = inlined_call_operand.vmem [shape: bf16[2,2,32,16], index: 7, kind: input, shape index: {}]   ;;  %s4113_s8 = inlined_call_operand.vmem [shape: bf16[2,2,32,16], index: 8, kind: input, shape index: {}]   ;;  %s4114_s9 = inlined_call_operand.vmem [shape: bf16[2,2,16,32], index: 9, kind: input, shape index: {}]   ;;  %s4115_s10 = inlined_call_operand.vmem [shape: bf16[2,32,128], index: 10, kind: input, shape index: {}]   ;;  %s4116_s11 = inlined_call_operand.vmem [shape: bf16[2,128,32], index: 11, kind: input, shape index: {}]   ;;  %s4117_s12 = inlined_call_operand.vmem [shape: f32[2,6,32], index: 12, kind: input, shape index: {}]   ;;  %s4118_s13 = inlined_call_operand.vmem [shape: bf16[2,2,32,16], index: 13, kind: input, shape index: {}]   ;;  %s4119_s14 = inlined_call_operand.vmem [shape: bf16[2,2,32,16], index: 14, kind: input, shape index: {}]   ;;  %s4120_s15 = inlined_call_operand.vmem [shape: bf16[2,2,32,16], index: 15, kind: input, shape index: {}]   ;;  %s4121_s16 = inlined_call_operand.vmem [shape: f32[2,3,2,16], index: 16, kind: input, shape index: {}]   ;;  %s4122_s17 = inlined_call_operand.vmem [shape: bf16[2,2,16,32], index: 17, kind: input, shape index: {}]   ;;  %s4123_s18 = inlined_call_operand.vmem [shape: bf16[2,32,128], index: 18, kind: input, shape index: {}]   ;;  %s4124_s19 = inlined_call_operand.vmem [shape: f32[2,1,128], index: 19, kind: input, shape index: {}]   ;;  %s4125_s20 = inlined_call_operand.vmem [shape: bf16[2,128,32], index: 20, kind: input, shape index: {}]   ;;  %s4126_s21 = inlined_call_operand.vmem [shape: f32[2,32], index: 21, kind: input, shape index: {}]   ;;  %s4127_s22 = inlined_call_operand.vmem [shape: bf16[32,128], index: 22, kind: input, shape index: {}]   ;;  %s4128_s23 = inlined_call_operand.vmem [shape: f32[1,128], index: 23, kind: input, shape index: {}]   ;;  %s4129_s24 = inlined_call_operand.vmem [shape: f32[2,8,32], index: 24, kind: output, shape index: {0}]   ;;  %s4130_s25 = inlined_call_operand.hbm [shape: f32[2,8,128], index: 25, kind: output, shape index: {1}]  }
   0x1   :  { %4142 = sst [smem:[#allocation15_spill]] %s4105_s0 }
   0x2   :  { %4143 = sst [smem:[#allocation16_spill]] %s4106_s1 }
   0x3   :  { %4144 = sst [smem:[#allocation17_spill]] %s4107_s2 }
   0x4   :  { %4145 = sst [smem:[#allocation18_spill]] %s4108_s3 }
   0x5   :  { %4146 = sst [smem:[#allocation19_spill]] %s4109_s4 }
   0x6   :  { %4147 = sst [smem:[#allocation20_spill]] %s4110_s5 }
   0x7   :  { %4148 = sst [smem:[#allocation21_spill]] %s4111_s6 }
   0x8   :  { %4149 = sst [smem:[#allocation22_spill]] %s4112_s7 }
   0x9   :  { %4150 = sst [smem:[#allocation23_spill]] %s4113_s8 }
   0xa   :  { %4151 = sst [smem:[#allocation24_spill]] %s4114_s9 }
   0xb   :  { %4152 = sst [smem:[#allocation25_spill]] %s4115_s10 }
   0xc   :  { %4153 = sst [smem:[#allocation26_spill]] %s4116_s11 }
   0xd   :  { %4154 = sst [smem:[#allocation27_spill]] %s4117_s12 }
   0xe   :  { %4155 = sst [smem:[#allocation28_spill]] %s4118_s13 }
   0xf   :  { %4156 = sst [smem:[#allocation29_spill]] %s4119_s14 }
  0x10   :  { %4157 = sst [smem:[#allocation30_spill]] %s4126_s21 }
  0x11   :  { %4158 = sst [smem:[#allocation31_spill]] %s4127_s22 }
  0x12   :  { %4159 = sst [smem:[#allocation32_spill]] %s4128_s23 }
  0x13   :  { %4160 = sst [smem:[#allocation33_spill]] %s4129_s24 }
  0x14   :  { %4161 = sst [smem:[#allocation34_spill]] %s4130_s25 }
  0x15   :  { %31 = vsyncpa [#allocation5], 0 }
  0x16   :  { %32 = vsyncpa [#allocation4], 0  ;;  %s3662_s29 = smov 0  }
  0x17 LB: > { %4162 = sst [smem:[#allocation9_spill]] %s3522_s29  ;;  %s3668_s2 = sadd.s32 4294967295, %s3522_s29   ;;  %s3522_s29 = sphi %s3662_s29, %s38_s29  }
  0x18   : > { %4163 = sst [smem:[#allocation10_spill]] %s3668_s2  ;;  %p2991_p0 = scmp.ge.s32.totalorder %s3522_s29, 1 }
  0x19   : > { %p669_p1 = scmp.lt.s32.totalorder %s3522_s29, 3  ;;  %p2992_p2 = scmp.ne.s32.totalorder %s3668_s2, 0 }
  0x1a   : > { %s4164_s7 = sld [smem:[#allocation19_spill]]  ;;  %p3372_p4 = scmp.eq.s32.totalorder %s3668_s2, 0 }
  0x1b   : > { %p670_p3 = pnand %p2991_p0, %p669_p1  ;;  %s3524_s26 = smov [#allocation3]  }
  0x1d   : > { %p3368_p5 = pneg %p670_p3  ;;  %839 = sbr.rel (%p670_p3) target bundleno = 4665 (0x1239), region = 116 }
  0x1f   : > { %p3369_p6 = pnand %p3372_p4, %p3368_p5 }
  0x20   : > { %s693_s3 = sshll.u32 %s4164_s7, 4  ;;  %s694_s3 = int_to_ptr.vmem [resolvable:$true] %s693_s3 }
  0x21   : > { %3371 = dma.vmem_to_smem (!%p3369_p6), %s694_s3, 32, %s3524_s26, [#allocation5]  }
  0x22   : > { %3513 = dma.done.wait (%p3372_p4), [#allocation5], 32  }
  0x23   : > { %3515 = vsyncadd (%p3372_p4), [#allocation5], 4294967264 }
  0x24   : > { %846 = sfence }
  0x25   : > { %p975_p7 = scmp.lt.s32.totalorder %s3668_s2, 1  ;;  %s4165_s9 = sld [smem:[#allocation20_spill]] }
  0x26   : > { %s4167_s30 = sld [smem:[#allocation21_spill]] }
  0x27   : > { %s3679_s1 = scalar_select %p975_p7, %s3668_s2, 1 }
  0x28   : > { %s4168_s29 = sld [smem:[#allocation22_spill]] }
  0x29   : > { %s2996_s8 = sshll.u32 %s3679_s1, 2  ;;  %s3297_s27 = sshll.u32 %s3679_s1, 5 }
  0x2a   : > { %s4170_s21 = sld [smem:[#allocation23_spill]]  ;;  %s3300_s2 = sshll.u32 %s3679_s1, 4 }
  0x2b   : > { %s3686_s5 = scalar_lea.vmem %s4165_s9, %s2996_s8  ;;  %s3302_s4 = sshll.u32 %s3679_s1, 6 }
  0x2c   : > { %4166 = sst [smem:[#allocation11_spill]] %s3686_s5  ;;  %s3691_s7 = scalar_lea.vmem %s4167_s30, %s3297_s27 }
  0x2d   : > { %s4172_s9 = sld [smem:[#allocation24_spill]]  ;;  %s3009_s23 = sshll.u32 %s3679_s1, 3 }
  0x2e   : > { %s3696_s25 = scalar_lea.vmem %s4168_s29, %s3297_s27  ;;  %s4173_s10 = sld [smem:[#allocation25_spill]] }
  0x2f   : > { %4169 = sst [smem:[#allocation12_spill]] %s3696_s25  ;;  %s3739_s29 = scalar_lea.vmem %s4120_s15, %s3297_s27 }
  0x30   : > { %s3701_s22 = scalar_lea.vmem %s4170_s21, %s3297_s27  ;;  %s4174_s11 = sld [smem:[#allocation26_spill]] }
  0x31   : > { %4171 = sst [smem:[#allocation13_spill]] %s3701_s22  ;;  %s3750_s8 = scalar_lea.vmem %s4123_s18, %s3300_s2 }
  0x32   : > { %s4176_s12 = sld [smem:[#allocation27_spill]]  ;;  %s1045_s0 = scalar_lea.vmem %s4124_s19, %s3679_s1 }
  0x33   : > { %s3708_s5 = scalar_lea.vmem %s4172_s9, %s3300_s2  ;;  %s4177_s13 = sld [smem:[#allocation28_spill]] }
  0x34   : > { %s3713_s30 = scalar_lea.vmem %s4173_s10, %s3300_s2  ;;  %s4178_s14 = sld [smem:[#allocation29_spill]] }
  0x35   : > { %s4180_s25 = sld [smem:[#allocation15_spill]] (!%p2992_p2) }
  0x36   : > { %s3718_s26 = scalar_lea.vmem %s4174_s11, %s3302_s4  ;;  %s3359_s11 = smul.u32 6, %s3679_s1 }
  0x37   : > { %4175 = sst [smem:[#allocation14_spill]] %s3718_s26  ;;  %s3764_s26 = scalar_lea.vmem %s4125_s20, %s3302_s4 }
  0x38   : > { %s3724_s22 = scalar_lea.vmem %s4176_s12, %s3009_s23  ;;  %s3745_s23 = scalar_lea.vmem %s4122_s17, %s3300_s2 }
  0x39   : > { %s3729_s28 = scalar_lea.vmem %s4177_s13, %s3297_s27  ;;  %s3759_s10 = scalar_lea.vmem %s4121_s16, %s3359_s11 }
  0x3a   : > { %s3734_s6 = scalar_lea.vmem %s4178_s14, %s3297_s27  ;;  %1055 = sbr.rel (%p2992_p2) target bundleno = 66 (0x42), region = 124 }
  0x3f   : > { %v1056_v0 = vld [vmem:[%s4180_s25] sm:$0xff]  ;;  %vm1058_vm0 = vcmask 261120   ;;  %v1057_v1 = vld [vmem:[%s4180_s25 + $0x8] sm:$0xff] }
  0x40   : > { %1059 = vst.msk [vmem:[#allocation2] sm:$0xff] %vm1058_vm0, %v1056_v0 }
  0x41   : > { %1060 = vst.msk [vmem:[#allocation2 + $0x8] sm:$0xff] %vm1058_vm0, %v1057_v1 }
  0x42 PF: > { %vm1088_vm1 = vcmask 261120   ;;  %v3525_v6 = vmov 32.0   ;;  %s4181_s11 = sld [smem:[#allocation12_spill]]  ;;  %v3310_v23 = vld [vmem:[%s3691_s7 + $0x8] sm:$0xff]  ;;  %v3309_v25 = vld [vmem:[%s3691_s7] sm:$0xff]  ;;  %v3526_v61 = vmov 0  }
  0x43   : > { %3402 = vrcp.f32 %v3525_v6  ;;  %1182 = vmatpush.bf16.msra.mxu1 %v3310_v23  ;;  %s4182_s4 = sld [smem:[#allocation16_spill]]  ;;  %3393 = vset.pattern.permute.xlu1 %v3526_v61  ;;  %vm1263_vm11 = vcmask 130048   ;;  %vm1302_vm13 = vcmask 31744   ;;  %vm1356_vm15 = vcmask 1041408  }
  0x44   : > { %s4183_s21 = sld [smem:[#allocation11_spill]]  ;;  %3392 = vset.pattern.permute.xlu2 %v3526_v61  ;;  %3394 = vset.pattern.permute.xlu0 %v3526_v61 }
  0x45   : > { %s4184_s12 = sld [smem:[#allocation17_spill]] }
  0x46   : > { %s4185_s14 = sld [smem:[#allocation13_spill]] }
  0x47   : > { %v3774_v2 = vld [vmem:[#allocation2] sm:$0xff]  ;;  %1183 = vmatpush.bf16.msra.mxu1 %v3309_v25  ;;  %s4186_s3 = sld [smem:[#allocation18_spill]] }
  0x48   : > { %v1089_v3 = vsel %vm1088_vm1, %v3774_v2, 0.0  ;;  %v3778_v4 = vld [vmem:[#allocation2 + $0x8] sm:$0xff]  ;;  %v3312_v28 = vld [vmem:[%s4181_s11 + $0x8] sm:$0xff]  ;;  %v3311_v33 = vld [vmem:[%s4181_s11] sm:$0xff] }
  0x49   : > { %1090 = vadd.xlane.f32.xlu0 %v1089_v3  ;;  %v1092_v5 = vsel %vm1088_vm1, %v3778_v4, 0.0  ;;  %v3403_v7 = vpop.eup %3402  ;;  %v1147_v29 = vld [vmem:[%s4182_s4] sm:$0xf]  ;;  %v1148_v31 = vld [vmem:[%s4182_s4 + $0x4] sm:$0xf]  ;;  %v3527_v3 = vmov 0.0  }
  0x4a   : > { %v1096_v8 = vmul.f32 32.0, %v3403_v7  ;;  %vm1100_vm2 = vweird.f32 %v3403_v7  ;;  %1151 = vst [vmem:[#allocation1] ss:$2 sm:$0xff] %v1147_v29  ;;  %v3803_v46 = vld [vmem:[%s4183_s21] sm:$0xf] }
  0x4b   : > { %1215 = vmatpush.bf16.msrb.mxu1 %v3312_v28  ;;  %1153 = vst [vmem:[#allocation1 + $0x1] ss:$2 sm:$0xff] %v1148_v31  ;;  %v1140_v49 = vperm.slane %v3803_v46, 0  ;;  %v1143_v54 = vperm.slane %v3803_v46, 1  ;;  %v1063_v62 = vld [vmem:[%s4184_s12] sm:$0xff]  ;;  %v1064_v1 = vld [vmem:[%s4184_s12 + $0x8] sm:$0xff] }
  0x4c   : > { %v1097_v9 = vsub.f32 1.0, %v1096_v8  ;;  %vm1077_vm9 = vcmp.gt.s32.totalorder %v1063_v62, 0  ;;  %1070 = vperm.xlu2 %3392, %v1064_v1   ;;  %vm1078_vm10 = vcmp.gt.s32.totalorder %v1064_v1, 0  ;;  %v3313_v29 = vld [vmem:[%s4185_s14] sm:$0xff] }
  0x4d   : > { %v3820_v6 = vsel %vm1078_vm10, 1.0, %v3527_v3 }
  0x4e   : > { %v1098_v10 = vmul.f32 %v3403_v7, %v1097_v9 }
  0x4f   : > { %1216 = vmatpush.bf16.msrb.mxu1 %v3311_v33 }
  0x50   : > { %v1099_v11 = vadd.f32 %v3403_v7, %v1098_v10 }
  0x51   : > { %1093 = vadd.xlane.f32.xlu0 %v1092_v5  ;;  %v3818_v5 = vsel %vm1077_vm9, 1.0, %v3527_v3 }
  0x52   : > { %v3782_v12 = vsel %vm1100_vm2, %v3403_v7, %v1099_v11  ;;  %v1154_v59 = vld.sshfl [vmem:[#allocation1] sm:$0xff pattern:$0x75316420]  ;;  %v3395_v8 = vpack.i.bf16 %v3820_v6, %v3818_v5  ;;  %v3317_v11 = vld [vmem:[%s3691_s7 + $0x18] sm:$0xff] }
  0x53   : > { %v3808_v60 = vpack.c.bf16 %v1154_v59, %v1154_v59 }
  0xa6   : > { %v1071_v23 = vpop.permute.xlu2 %1070 }
  0xbc   : > { %v1091_v13 = vpop.xlane.xlu0 %1090 }
  0xbd   : > { %v1102_v14 = vmul.f32 %v3782_v12, %v1091_v13 }
  0xbf   : > { %v1104_v15 = vsub.f32 %v3774_v2, %v1102_v14 }
  0xc1   : > { %v1106_v16 = vmul.f32 %v1104_v15, %v1104_v15 }
  0xc3   : > { %v1108_v17 = vsel %vm1088_vm1, %v1106_v16, 0.0 }
  0xc4   : > { %1109 = vadd.xlane.f32.xlu1 %v1108_v17  ;;  %v1094_v18 = vpop.xlane.xlu0 %1093  ;;  %v3316_v17 = vld [vmem:[%s3691_s7 + $0x10] sm:$0xff] }
  0xc5   : > { %v1103_v19 = vmul.f32 %v3782_v12, %v1094_v18  ;;  %v3318_v18 = vld [vmem:[%s4181_s11 + $0x10] sm:$0xff] }
  0xc7   : > { %v1105_v20 = vsub.f32 %v3778_v4, %v1103_v19 }
  0xc9   : > { %v1107_v21 = vmul.f32 %v1105_v20, %v1105_v20 }
  0xcb   : > { %v1111_v22 = vsel %vm1088_vm1, %v1107_v21, 0.0 }
  0xcc   : > { %1112 = vadd.xlane.f32.xlu1 %v1111_v22  ;;  %v3400_v22 = vld [vmem:[%s4186_s3] ss:$0 sm:$0xff] }
  0xcd   : > { %vm1074_vm12 = vcmp.eq.s32.totalorder %v1071_v23, %v3400_v22 }
  0xe5   : > { %1067 = vperm.xlu1 %3393, %v1063_v62  }
 0x137   : > { %v1110_v24 = vpop.xlane.xlu1 %1109 }
 0x138   : > { %v1114_v26 = vmul.f32 %v1110_v24, %v3782_v12  ;;  %v3528_v24 = vmov -1e+09  }
 0x139   : > { %v1076_v25 = vsel %vm1074_vm12, 0.0, %v3528_v24 }
 0x13a   : > { %v1116_v27 = vadd.f32 1e-05, %v1114_v26  ;;  %v3314_v26 = vld [vmem:[%s4185_s14 + $0x8] sm:$0xff] }
 0x13b   : > { %1244 = vmatpush.bf16.msra.mxu2 %v3314_v26 }
 0x13c   : > { %3404 = vrsqrt.f32 %v1116_v27  ;;  %vm1124_vm4 = vweird.f32 %v1116_v27 }
 0x13f   : > { %v1113_v30 = vpop.xlane.xlu1 %1112  ;;  %1245 = vmatpush.bf16.msra.mxu2 %v3313_v29 }
 0x140   : > { %v1115_v32 = vmul.f32 %v1113_v30, %v3782_v12 }
 0x142   : > { %v3405_v34 = vpop.eup %3404  ;;  %v1117_v35 = vadd.f32 1e-05, %v1115_v32  ;;  %3053 = vmatmul.msk.bf16.vlgmr.msra.gmra.mxu2 %vm1088_vm1, %v3808_v60 }
 0x143   : > { %v1119_v36 = vmul.f32 %v3405_v34, %v1116_v27  ;;  %vm1125_vm3 = vweird.f32 %v3405_v34 }
 0x144   : > { %3406 = vrsqrt.f32 %v1117_v35  ;;  %vm1126_vm5 = vmor %vm1124_vm4, %vm1125_vm3  ;;  %vm1134_vm7 = vweird.f32 %v1117_v35 }
 0x145   : > { %v1120_v37 = vmul.f32 %v3405_v34, %v1119_v36 }
 0x147   : > { %v1121_v38 = vmul.f32 0.5, %v1120_v37 }
 0x149   : > { %v1122_v39 = vsub.f32 1.5, %v1121_v38 }
 0x14a   : > { %v3407_v40 = vpop.eup %3406 }
 0x14b   : > { %v1123_v41 = vmul.f32 %v3405_v34, %v1122_v39  ;;  %v1129_v42 = vmul.f32 %v3407_v40, %v1117_v35  ;;  %vm1135_vm6 = vweird.f32 %v3407_v40 }
 0x14c   : > { %vm1136_vm8 = vmor %vm1134_vm7, %vm1135_vm6 }
 0x14d   : > { %v1130_v43 = vmul.f32 %v3407_v40, %v1129_v42  ;;  %v1127_v44 = vsel %vm1126_vm5, %v3405_v34, %v1123_v41 }
 0x14e   : > { %v1138_v48 = vmul.f32 %v1127_v44, %v1104_v15  ;;  %v3319_v15 = vld [vmem:[%s4181_s11 + $0x18] sm:$0xff]  ;;  %s4187_s11 = sld [smem:[#allocation10_spill]] }
 0x14f   : > { %v1131_v45 = vmul.f32 0.5, %v1130_v43 }
 0x150   : > { %v1141_v53 = vmul.f32 %v1140_v49, %v1138_v48 }
 0x151   : > { %v1132_v47 = vsub.f32 1.5, %v1131_v45 }
 0x152   : > { %v1144_v56 = vadd.f32 %v1143_v54, %v1141_v53 }
 0x153   : > { %v1133_v50 = vmul.f32 %v3407_v40, %v1132_v47 }
 0x154   : > { %p3283_p8 = scmp.ne.s32.totalorder %s4187_s11, 1 }
 0x155   : > { %v1137_v51 = vsel %vm1136_vm8, %v3407_v40, %v1133_v50  ;;  %s4191_s9 = sld [smem:[#allocation30_spill]] (!%p3283_p8) }
 0x156   : > { %v1139_v52 = vmul.f32 %v1137_v51, %v1105_v20  ;;  %s4192_s7 = sld [smem:[#allocation33_spill]] (!%p3283_p8) }
 0x157   : > { %v1068_v45 = vpop.permute.xlu1 %1067 }
 0x158   : > { %v1142_v55 = vmul.f32 %v1140_v49, %v1139_v52  ;;  %vm1073_vm14 = vcmp.eq.s32.totalorder %v1068_v45, %v3400_v22 }
 0x159   : > { %v3850_v49 = vsel %vm1073_vm14, 0.0, %v3528_v24 }
 0x15a   : > { %v1145_v57 = vadd.f32 %v1143_v54, %v1142_v55 }
 0x15c   : > { %v1146_v58 = vpack.c.bf16 %v1145_v57, %v1144_v56 }
 0x15e   : > { %3035 = vmatmul.msk.bf16.vlgmr.msra.gmra.mxu1 %vm1088_vm1, %v1146_v58 }
 0x16e   : > { %3044 = vmatmul.msk.bf16.vlgmr.msrb.gmra.mxu1 %vm1088_vm1, %v3808_v60 }
 0x1c5   : > { %v1247_v56 = vpop.f32.mrf.mxu2 }
 0x1c6   : > { %v1261_v59 = vpack.c.bf16 %v1247_v56, %v1247_v56 }
 0x1c8   : > { %v1358_v62 = vsel %vm1356_vm15, %v1261_v59, 0 }
 0x1c9   : > { %1367 = vmatpush.bf16.msra.mxu1 %v1358_v62 }
 0x1cd   : > { %v1249_v57 = vpop.f32.mrf.mxu2 }
 0x1db   : > { %v1185_v63 = vpop.f32.mrf.mxu1 }
 0x1dc   : > { %v1251_v20 = vpack.c.bf16 %v1185_v63, %v1185_v63 }
 0x1e3   : > { %v1187_v0 = vpop.f32.mrf.mxu1 }
 0x1e4   : > { %v1252_v21 = vpack.c.bf16 %v1187_v0, %v1187_v0 }
 0x1eb   : > { %v1218_v7 = vpop.f32.mrf.mxu1 }
 0x1ec   : > { %v1254_v9 = vrot.slane %v1218_v7, 4  ;;  %v1256_v10 = vpack.c.bf16 %v1218_v7, %v1218_v7 }
 0x1ee   : > { %v1268_v13 = vsel %vm1263_vm11, %v1256_v10, 0  ;;  %v1257_v14 = vpack.c.bf16 %v1254_v9, %v1254_v9 }
 0x1ef   : > { %1277 = vmatpush.bf16.xpose.msra.mxu3 %v1268_v13 }
 0x1f0   : > { %v1287_v16 = vsel %vm1263_vm11, %v1257_v14, 0 }
 0x1f1   : > { %1296 = vmatpush.bf16.xpose.msra.mxu0 %v1287_v16 }
 0x1f3   : > { %v1220_v19 = vpop.f32.mrf.mxu1 }
 0x1f6   : > { %3054 = vmatmul.msk.bf16.vlgmr.msra.gmra.mxu3 %vm1263_vm11, %v1251_v20 }
 0x1f7   : > { %1418 = vmatpush.bf16.msrb.mxu3 %v3317_v11 }
 0x1f8   : > { %3055 = vmatmul.msk.bf16.vlgmr.msra.gmra.mxu0 %vm1263_vm11, %v1252_v21 }
 0x1f9   : > { %1449 = vmatpush.bf16.msrb.mxu0 %v3319_v15 }
 0x1fb   : > { %1419 = vmatpush.bf16.msrb.mxu3 %v3316_v17 }
 0x1fd   : > { %1450 = vmatpush.bf16.msrb.mxu0 %v3318_v18 }
 0x206   : > { %3070 = vmatmul.msk.bf16.vlgmr.msrb.gmra.mxu3 %vm1088_vm1, %v1146_v58  ;;  %v1259_v58 = vrot.slane %v1247_v56, 4  ;;  %v3315_v56 = vld [vmem:[%s3708_s5] sm:$0xff] }
 0x208   : > { %3083 = vmatmul.msk.bf16.vlgmr.msrb.gmra.mxu0 %vm1088_vm1, %v3808_v60  ;;  %v1262_v61 = vpack.c.bf16 %v1259_v58, %v1259_v58 }
 0x20a   : > { %v1377_v0 = vsel %vm1356_vm15, %v1262_v61, 0 }
 0x20b   : > { %1386 = vmatpush.bf16.msrb.mxu2 %v1377_v0 }
 0x275   : > { %v1298_v27 = vpop.f32.mrf.mxu0 }
 0x276   : > { %v1299_v28 = vadd.f32 %v1298_v27, %v1076_v25 }
 0x278   : > { %v1306_v30 = vsel %vm1302_vm13, %v1299_v28, -inf }
 0x279   : > { %v1279_v31 = vpop.f32.mrf.mxu3  ;;  %1307 = vmax.xlane.f32.xlu2 %v1306_v30 }
 0x27a   : > { %v1280_v50 = vadd.f32 %v1279_v31, %v3850_v49 }
 0x27c   : > { %v1303_v51 = vsel %vm1302_vm13, %v1280_v50, -inf }
 0x27d   : > { %v1300_v32 = vpop.f32.mrf.mxu0 }
 0x281   : > { %v1281_v33 = vpop.f32.mrf.mxu3 }
 0x282   : > { %v3321_v33 = vld [vmem:[%s4185_s14 + $0x18] sm:$0xff] }
 0x283   : > { %1479 = vmatpush.bf16.msrb.mxu1 %v3321_v33 }
 0x285   : > { %v1452_v34 = vpop.f32.mrf.mxu0 }
 0x286   : > { %v1489_v35 = vrot.slane %v1452_v34, 4  ;;  %v1491_v63 = vpack.c.bf16 %v1452_v34, %v1452_v34 }
 0x288   : > { %v1492_v36 = vpack.c.bf16 %v1489_v35, %v1489_v35  ;;  %v1502_v1 = vsel %vm1263_vm11, %v1491_v63, 0  ;;  %v3320_v35 = vld [vmem:[%s4185_s14 + $0x10] sm:$0xff] }
 0x289   : > { %v3844_v37 = vpop.f32.mrf.mxu3  ;;  %1511 = vmatpush.bf16.xpose.msra.mxu2 %v1502_v1  ;;  %1480 = vmatpush.bf16.msrb.mxu1 %v3320_v35 }
 0x28a   : > { %v1521_v38 = vsel %vm1263_vm11, %v1492_v36, 0  ;;  %v1486_v29 = vpack.c.bf16 %v3844_v37, %v3844_v37 }
 0x28b   : > { %1530 = vmatpush.bf16.xpose.msra.mxu3 %v1521_v38 }
 0x28d   : > { %v1454_v39 = vpop.f32.mrf.mxu0 }
 0x291   : > { %v1423_v40 = vpop.f32.mrf.mxu3 }
 0x292   : > { %v1487_v41 = vpack.c.bf16 %v1423_v40, %v1423_v40 }
 0x293   : > { %1667 = vmatpush.bf16.msrb.mxu3 %v3315_v56 }
 0x294   : > { %3098 = vmatmul.msk.bf16.vlgmr.msra.gmra.mxu3 %vm1263_vm11, %v1487_v41 }
 0x2ec   : > { %v1308_v42 = vpop.xlane.xlu2 %1307 }
 0x2ed   : > { %v1310_v43 = vsub.f32 %v1299_v28, %v1308_v42 }
 0x2ef   : > { %v1313_v44 = vmul.f32 1.442695, %v1310_v43 }
 0x2f1   : > { %3408 = vpow2.f32 %v1313_v44 }
 0x2f7   : > { %v3409_v47 = vpop.eup %3408 }
 0x2f8   : > { %v1318_v48 = vsel %vm1302_vm13, %v3409_v47, 0.0 }
 0x2f9   : > { %1319 = vadd.xlane.f32.xlu0 %v1318_v48 }
 0x301   : > { %1304 = vmax.xlane.f32.xlu0 %v1303_v51 }
 0x317   : > { %v1532_v52 = vpop.f32.mrf.mxu3 }
 0x318   : > { %v1533_v53 = vadd.f32 %v1532_v52, %v1076_v25 }
 0x31a   : > { %v1539_v54 = vsel %vm1302_vm13, %v1533_v53, -inf }
 0x31b   : > { %1540 = vmax.xlane.f32.xlu1 %v1539_v54 }
 0x31f   : > { %v1534_v55 = vpop.f32.mrf.mxu3 }
 0x36c   : > { %v1320_v3 = vpop.xlane.xlu0 %1319 }
 0x36d   : > { %3410 = vrcp.f32 %v1320_v3  ;;  %v1347_v14 = vand.u32 2147483648, %v1320_v3  ;;  %v1345_v17 = vand.u32 2147483647, %v1320_v3  ;;  %vm1341_vm2 = vweird.f32 %v1320_v3 }
 0x36f   : > { %v1348_v19 = vor.u32 1.1754944e-38, %v1347_v14  ;;  %vm1346_vm4 = vcmp.eq.f32.partialorder %v1345_v17, 8.507059e+37 }
 0x373   : > { %v3411_v7 = vpop.eup %3410 }
 0x374   : > { %v1337_v9 = vmul.f32 %v3411_v7, %v1320_v3  ;;  %v1305_v10 = vpop.xlane.xlu0 %1304  ;;  %vm1342_vm0 = vweird.f32 %v3411_v7 }
 0x375   : > { %v1309_v11 = vsub.f32 %v1280_v50, %v1305_v10  ;;  %vm1343_vm3 = vmor %vm1341_vm2, %vm1342_vm0 }
 0x376   : > { %v1338_v13 = vsub.f32 1.0, %v1337_v9 }
 0x377   : > { %v1311_v15 = vmul.f32 1.442695, %v1309_v11 }
 0x378   : > { %v1339_v16 = vmul.f32 %v3411_v7, %v1338_v13 }
 0x379   : > { %3412 = vpow2.f32 %v1311_v15 }
 0x37a   : > { %v1340_v18 = vadd.f32 %v3411_v7, %v1339_v16 }
 0x37c   : > { %v1344_v20 = vsel %vm1343_vm3, %v3411_v7, %v1340_v18 }
 0x37d   : > { %v1349_v21 = vsel %vm1346_vm4, %v1348_v19, %v1344_v20 }
 0x37e   : > { %v1350_v22 = vmul.f32 %v3409_v47, %v1349_v21 }
 0x37f   : > { %v3413_v23 = vpop.eup %3412 }
 0x380   : > { %v1315_v25 = vsel %vm1302_vm13, %v3413_v23, 0.0  ;;  %v1352_v26 = vpack.c.bf16 %v1350_v22, %v1350_v22 }
 0x381   : > { %1316 = vadd.xlane.f32.xlu0 %v1315_v25 }
 0x382   : > { %3057 = vmatmul.msk.bf16.vlgmr.msrb.gmra.mxu2 %vm1302_vm13, %v1352_v26 }
 0x38e   : > { %v1541_v27 = vpop.xlane.xlu1 %1540 }
 0x38f   : > { %v1543_v28 = vsub.f32 %v1533_v53, %v1541_v27  ;;  %v3322_v27 = vld [vmem:[%s3708_s5 + $0x8] sm:$0xff]  ;;  %s3026_s5 = sshll.u32 %s4187_s11, 7 }
 0x390   : > { %1644 = vmatpush.bf16.msrb.mxu2 %v3322_v27  ;;  %s1085_s21 = sld [smem:[#allocation3 + %s3026_s5]]  ;;  %s1086_s24 = sadd.s32 1, %s3026_s5 }
 0x391   : > { %v1546_v30 = vmul.f32 1.442695, %v1543_v28  ;;  %s1087_s2 = sld [smem:[#allocation3 + %s1086_s24]] }
 0x392   : > { %3097 = vmatmul.msk.bf16.vlgmr.msra.gmra.mxu2 %vm1263_vm11, %v1486_v29 }
 0x393   : > { %3414 = vpow2.f32 %v1546_v30 }
 0x399   : > { %v3863_v31 = vpop.eup %3414 }
 0x39a   : > { %v1551_v32 = vsel %vm1302_vm13, %v3863_v31, 0.0 }
 0x39b   : > { %1552 = vadd.xlane.f32.xlu2 %v1551_v32 }
 0x3f4   : > { %v1317_v34 = vpop.xlane.xlu0 %1316 }
 0x3f5   : > { %3416 = vrcp.f32 %v1317_v34  ;;  %v1332_v37 = vand.u32 2147483648, %v1317_v34  ;;  %v1330_v41 = vand.u32 2147483647, %v1317_v34  ;;  %vm1326_vm6 = vweird.f32 %v1317_v34 }
 0x3f7   : > { %v1333_v43 = vor.u32 1.1754944e-38, %v1332_v37  ;;  %vm1331_vm8 = vcmp.eq.f32.partialorder %v1330_v41, 8.507059e+37 }
 0x3fb   : > { %v3417_v36 = vpop.eup %3416 }
 0x3fc   : > { %v1322_v38 = vmul.f32 %v3417_v36, %v1317_v34  ;;  %vm1327_vm5 = vweird.f32 %v3417_v36 }
 0x3fd   : > { %vm1328_vm7 = vmor %vm1326_vm6, %vm1327_vm5 }
 0x3fe   : > { %v1323_v39 = vsub.f32 1.0, %v1322_v38 }
 0x400   : > { %v1324_v40 = vmul.f32 %v3417_v36, %v1323_v39 }
 0x402   : > { %v1325_v42 = vadd.f32 %v3417_v36, %v1324_v40 }
 0x404   : > { %v1329_v44 = vsel %vm1328_vm7, %v3417_v36, %v1325_v42 }
 0x405   : > { %v1334_v45 = vsel %vm1331_vm8, %v1333_v43, %v1329_v44  ;;  %v1388_v47 = vpop.f32.mrf.mxu2 }
 0x406   : > { %v1335_v48 = vmul.f32 %v3413_v23, %v1334_v45 }
 0x408   : > { %v1351_v50 = vpack.c.bf16 %v1335_v48, %v1335_v48 }
 0x40a   : > { %3056 = vmatmul.msk.bf16.vlgmr.msra.gmra.mxu1 %vm1302_vm13, %v1351_v50  ;;  %v1686_v50 = vstv %s1085_s21  ;;  %s4193_s21 = sld [smem:[#allocation32_spill]] (!%p3283_p8) }
 0x40d   : > { %v1390_v51 = vpop.f32.mrf.mxu2 }
 0x40e   : > { %v1553_v57 = vpop.xlane.xlu2 %1552 }
 0x40f   : > { %3418 = vrcp.f32 %v1553_v57  ;;  %vm1574_vm10 = vweird.f32 %v1553_v57  ;;  %v1578_v10 = vand.u32 2147483647, %v1553_v57 }
 0x411   : > { %vm1579_vm14 = vcmp.eq.f32.partialorder %v1578_v10, 8.507059e+37 }
 0x415   : > { %v1513_v52 = vpop.f32.mrf.mxu2  ;;  %v3419_v58 = vpop.eup %3418 }
 0x416   : > { %v1514_v53 = vadd.f32 %v1513_v52, %v3850_v49  ;;  %v1570_v59 = vmul.f32 %v3419_v58, %v1553_v57  ;;  %vm1575_vm9 = vweird.f32 %v3419_v58 }
 0x417   : > { %vm1576_vm12 = vmor %vm1574_vm10, %vm1575_vm9 }
 0x418   : > { %v1536_v54 = vsel %vm1302_vm13, %v1514_v53, -inf  ;;  %v1571_v62 = vsub.f32 1.0, %v1570_v59 }
 0x419   : > { %1537 = vmax.xlane.f32.xlu0 %v1536_v54 }
 0x41a   : > { %3096 = vmatmul.msk.bf16.vlgmr.msrb.gmra.mxu1 %vm1088_vm1, %v3808_v60  ;;  %v1572_v0 = vmul.f32 %v3419_v58, %v1571_v62  ;;  %v1580_v60 = vand.u32 2147483648, %v1553_v57 }
 0x41c   : > { %v1573_v9 = vadd.f32 %v3419_v58, %v1572_v0  ;;  %v1581_v13 = vor.u32 1.1754944e-38, %v1580_v60 }
 0x41d   : > { %v1515_v55 = vpop.f32.mrf.mxu2 }
 0x41e   : > { %v1577_v11 = vsel %vm1576_vm12, %v3419_v58, %v1573_v9 }
 0x41f   : > { %v1582_v15 = vsel %vm1579_vm14, %v1581_v13, %v1577_v11  ;;  %v3324_v11 = vld [vmem:[%s3713_s30 + $0x8] sm:$0xff] }
 0x420   : > { %v1583_v19 = vmul.f32 %v3863_v31, %v1582_v15  ;;  %v3323_v15 = vld [vmem:[%s3713_s30] sm:$0xff]  ;;  %s4188_s30 = sld [smem:[#allocation14_spill]] }
 0x422   : > { %v1585_v22 = vpack.c.bf16 %v1583_v19, %v1583_v19 }
 0x487   : > { %v1369_v61 = vpop.f32.mrf.mxu1 }
 0x488   : > { %v1392_v63 = vpack.c.bf16 %v1388_v47, %v1369_v61 }
 0x48a   : > { %3112 = vmatmul.msk.bf16.vlgmr.msrb.gmra.mxu3 %vm1263_vm11, %v1392_v63 }
 0x48c   : > { %v1538_v49 = vpop.xlane.xlu0 %1537 }
 0x48d   : > { %v1542_v1 = vsub.f32 %v1514_v53, %v1538_v49 }
 0x48f   : > { %v1544_v3 = vmul.f32 1.442695, %v1542_v1  ;;  %v1371_v7 = vpop.f32.mrf.mxu1 }
 0x491   : > { %3420 = vpow2.f32 %v1544_v3 }
 0x497   : > { %v3421_v14 = vpop.eup %3420  ;;  %v1482_v16 = vpop.f32.mrf.mxu1 }
 0x498   : > { %v1494_v17 = vrot.slane %v1482_v16, 4  ;;  %v1548_v18 = vsel %vm1302_vm13, %v3421_v14, 0.0  ;;  %v1496_v25 = vpack.c.bf16 %v1482_v16, %v1482_v16 }
 0x499   : > { %1549 = vadd.xlane.f32.xlu0 %v1548_v18 }
 0x49a   : > { %v1497_v20 = vpack.c.bf16 %v1494_v17, %v1494_v17  ;;  %v1590_v26 = vsel %vm1356_vm15, %v1496_v25, 0 }
 0x49b   : > { %1599 = vmatpush.bf16.msra.mxu0 %v1590_v26 }
 0x49c   : > { %v1609_v21 = vsel %vm1356_vm15, %v1497_v20, 0 }
 0x49d   : > { %1618 = vmatpush.bf16.msra.mxu1 %v1609_v21 }
 0x49f   : > { %v1484_v23 = vpop.f32.mrf.mxu1  ;;  %1767 = vmatpush.bf16.msrb.mxu0 %v3324_v11  ;;  %v1872_v11 = vstv %s1087_s2 }
 0x4a0   : > { %3100 = vmatmul.msk.bf16.vlgmr.msra.gmra.mxu1 %vm1302_vm13, %v1585_v22 }
 0x4a3   : > { %1768 = vmatpush.bf16.msrb.mxu0 %v3323_v15 }
 0x4ad   : > { %3396 = vperm.xlu0 %3394, %v3395_v8  }
 0x50c   : > { %v1550_v28 = vpop.xlane.xlu0 %1549 }
 0x50d   : > { %3422 = vrcp.f32 %v1550_v28  ;;  %v1565_v32 = vand.u32 2147483648, %v1550_v28  ;;  %v1563_v34 = vand.u32 2147483647, %v1550_v28  ;;  %vm1559_vm2 = vweird.f32 %v1550_v28  ;;  %v1669_v44 = vpop.f32.mrf.mxu3 }
 0x50f   : > { %v1566_v5 = vor.u32 1.1754944e-38, %v1565_v32  ;;  %vm1564_vm15 = vcmp.eq.f32.partialorder %v1563_v34, 8.507059e+37 }
 0x513   : > { %v3423_v29 = vpop.eup %3422 }
 0x514   : > { %v1555_v30 = vmul.f32 %v3423_v29, %v1550_v28  ;;  %vm1560_vm0 = vweird.f32 %v3423_v29 }
 0x515   : > { %vm1561_vm3 = vmor %vm1559_vm2, %vm1560_vm0  ;;  %v1671_v54 = vpop.f32.mrf.mxu3 }
 0x516   : > { %v1556_v31 = vsub.f32 1.0, %v1555_v30 }
 0x518   : > { %v1557_v33 = vmul.f32 %v3423_v29, %v1556_v31 }
 0x51a   : > { %v1558_v35 = vadd.f32 %v3423_v29, %v1557_v33  ;;  %v1735_v33 = vperm.slane %v3803_v46, 2 }
 0x51c   : > { %v1562_v6 = vsel %vm1561_vm3, %v3423_v29, %v1558_v35  ;;  %vm2134_vm3 = vcmask 1043456  }
 0x51d   : > { %v1567_v8 = vsel %vm1564_vm15, %v1566_v5, %v1562_v6  ;;  %v1620_v36 = vpop.f32.mrf.mxu1  ;;  %v1738_v6 = vperm.slane %v3803_v46, 3  ;;  %v3328_v46 = vld [vmem:[%s4188_s30 + $0x18] sm:$0xff] }
 0x51e   : > { %v1568_v38 = vmul.f32 %v3421_v14, %v1567_v8 }
 0x51f   : > { %v3397_v43 = vpop.permute.xlu0 %3396 }
 0x520   : > { %v1584_v39 = vpack.c.bf16 %v1568_v38, %v1568_v38  ;;  %v3398_v45 = vunpack.i.l.bf16 %v3397_v43  ;;  %v3399_v56 = vunpack.i.h.bf16 %v3397_v43  ;;  %v3330_v43 = vld [vmem:[%s4188_s30 + $0x28] sm:$0xff] }
 0x522   : > { %3099 = vmatmul.msk.bf16.vlgmr.msra.gmra.mxu0 %vm1302_vm13, %v1584_v39 }
 0x525   : > { %v1622_v37 = vpop.f32.mrf.mxu1 }
 0x59f   : > { %v1601_v40 = vpop.f32.mrf.mxu0 }
 0x5a0   : > { %v1624_v41 = vpack.c.bf16 %v1620_v36, %v1601_v40 }
 0x5a2   : > { %3107 = vmatmul.msk.bf16.vlgmr.msrb.gmra.mxu2 %vm1263_vm11, %v1624_v41  ;;  %v3332_v41 = vld [vmem:[%s4188_s30 + $0x38] sm:$0xff] }
 0x5a3   : > { %1858 = vmatpush.bf16.msrb.mxu1 %v3332_v41 }
 0x5a7   : > { %v1603_v42 = vpop.f32.mrf.mxu0 }
 0x5a8   : > { %v3331_v42 = vld [vmem:[%s4188_s30 + $0x30] sm:$0xff] }
 0x5a9   : > { %1859 = vmatpush.bf16.msrb.mxu1 %v3331_v42 }
 0x5ad   : > { %1860 = vmatpush.bf16.msrb.mxu1 %v3330_v43 }
 0x625   : > { %v1646_v47 = vpop.f32.mrf.mxu2 }
 0x626   : > { %v1670_v48 = vadd.f32 %v1669_v44, %v1646_v47  ;;  %v3329_v44 = vld [vmem:[%s4188_s30 + $0x20] sm:$0xff]  ;;  %v3326_v47 = vld [vmem:[%s4188_s30 + $0x8] sm:$0xff] }
 0x627   : > { %1861 = vmatpush.bf16.msrb.mxu1 %v3329_v44 }
 0x628   : > { %v1684_v51 = vmul.f32 %v3398_v45, %v1670_v48  ;;  %v3327_v45 = vld [vmem:[%s4188_s30 + $0x10] sm:$0xff]  ;;  %v3325_v48 = vld [vmem:[%s4188_s30] sm:$0xff] }
 0x62a   : > { %v1687_v52 = vmul.f32 %v1686_v50, %v1684_v51 }
 0x62b   : > { %1862 = vmatpush.bf16.msrb.mxu1 %v3328_v46 }
 0x62c   : > { %v3891_v53 = vadd.f32 %v1687_v52, %v3774_v2 }
 0x62d   : > { %v1648_v55 = vpop.f32.mrf.mxu2 }
 0x62e   : > { %v1672_v57 = vadd.f32 %v1671_v54, %v1648_v55  ;;  %v1691_v58 = vsel %vm1088_vm1, %v3891_v53, 0.0 }
 0x62f   : > { %1692 = vadd.xlane.f32.xlu2 %v1691_v58  ;;  %1863 = vmatpush.bf16.msrb.mxu1 %v3327_v45 }
 0x630   : > { %v1685_v59 = vmul.f32 %v3399_v56, %v1672_v57 }
 0x632   : > { %v1688_v61 = vmul.f32 %v1686_v50, %v1685_v59 }
 0x633   : > { %1864 = vmatpush.bf16.msrb.mxu1 %v3326_v47 }
 0x634   : > { %v3896_v62 = vadd.f32 %v1688_v61, %v3778_v4 }
 0x636   : > { %v1694_v63 = vsel %vm1088_vm1, %v3896_v62, 0.0 }
 0x637   : > { %1695 = vadd.xlane.f32.xlu2 %v1694_v63  ;;  %1865 = vmatpush.bf16.msrb.mxu1 %v3325_v48  ;;  %v3948_v48 = vld [vmem:[%s3724_s22] sm:$0x3f] }
 0x6a2   : > { %v1693_v2 = vpop.xlane.xlu2 %1692 }
 0x6a3   : > { %v1697_v0 = vmul.f32 %v1693_v2, %v3782_v12 }
 0x6a5   : > { %v1699_v49 = vsub.f32 %v3891_v53, %v1697_v0 }
 0x6a7   : > { %v1701_v1 = vmul.f32 %v1699_v49, %v1699_v49 }
 0x6a9   : > { %v1703_v3 = vsel %vm1088_vm1, %v1701_v1, 0.0 }
 0x6aa   : > { %1704 = vadd.xlane.f32.xlu2 %v1703_v3  ;;  %v1696_v7 = vpop.xlane.xlu2 %1695 }
 0x6ab   : > { %v1698_v9 = vmul.f32 %v1696_v7, %v3782_v12 }
 0x6ad   : > { %v1700_v4 = vsub.f32 %v3896_v62, %v1698_v9 }
 0x6af   : > { %v1702_v60 = vmul.f32 %v1700_v4, %v1700_v4 }
 0x6b1   : > { %v1706_v10 = vsel %vm1088_vm1, %v1702_v60, 0.0 }
 0x6b2   : > { %1707 = vadd.xlane.f32.xlu2 %v1706_v10 }
 0x71d   : > { %v1705_v13 = vpop.xlane.xlu2 %1704 }
 0x71e   : > { %v1709_v14 = vmul.f32 %v1705_v13, %v3782_v12 }
 0x720   : > { %v1711_v16 = vadd.f32 1e-05, %v1709_v14 }
 0x722   : > { %3424 = vrsqrt.f32 %v1711_v16  ;;  %vm1719_vm4 = vweird.f32 %v1711_v16 }
 0x725   : > { %v1708_v17 = vpop.xlane.xlu2 %1707 }
 0x726   : > { %v1710_v18 = vmul.f32 %v1708_v17, %v3782_v12 }
 0x728   : > { %v3425_v19 = vpop.eup %3424  ;;  %v1712_v20 = vadd.f32 1e-05, %v1710_v18 }
 0x729   : > { %v1714_v21 = vmul.f32 %v3425_v19, %v1711_v16  ;;  %vm1720_vm13 = vweird.f32 %v3425_v19 }
 0x72a   : > { %3426 = vrsqrt.f32 %v1712_v20  ;;  %vm1721_vm5 = vmor %vm1719_vm4, %vm1720_vm13  ;;  %vm1729_vm7 = vweird.f32 %v1712_v20  ;;  %vm2080_vm13 = vcmask 64512  }
 0x72b   : > { %v1715_v22 = vmul.f32 %v3425_v19, %v1714_v21 }
 0x72d   : > { %v1716_v23 = vmul.f32 0.5, %v1715_v22 }
 0x72f   : > { %v1717_v25 = vsub.f32 1.5, %v1716_v23 }
 0x730   : > { %v3427_v26 = vpop.eup %3426 }
 0x731   : > { %v1718_v27 = vmul.f32 %v3425_v19, %v1717_v25  ;;  %v1724_v28 = vmul.f32 %v3427_v26, %v1712_v20  ;;  %vm1730_vm6 = vweird.f32 %v3427_v26 }
 0x732   : > { %vm1731_vm8 = vmor %vm1729_vm7, %vm1730_vm6 }
 0x733   : > { %v1725_v29 = vmul.f32 %v3427_v26, %v1724_v28  ;;  %v1722_v30 = vsel %vm1721_vm5, %v3425_v19, %v1718_v27 }
 0x734   : > { %v1733_v34 = vmul.f32 %v1722_v30, %v1699_v49  ;;  %v3334_v30 = vld [vmem:[%s3729_s28 + $0x8] sm:$0xff] }
 0x735   : > { %v1726_v31 = vmul.f32 0.5, %v1725_v29  ;;  %1974 = vmatpush.bf16.msra.mxu2 %v3334_v30 }
 0x736   : > { %v1736_v8 = vmul.f32 %v1735_v33, %v1733_v34 }
 0x737   : > { %v1727_v32 = vsub.f32 1.5, %v1726_v31  ;;  %v3336_v31 = vld [vmem:[%s3734_s6 + $0x8] sm:$0xff] }
 0x738   : > { %v1739_v39 = vadd.f32 %v1738_v6, %v1736_v8  ;;  %2001 = vmatpush.bf16.msra.mxu3 %v3336_v31 }
 0x739   : > { %v1728_v35 = vmul.f32 %v3427_v26, %v1727_v32  ;;  %v3338_v32 = vld [vmem:[%s3739_s29 + $0x8] sm:$0xff] }
 0x73a   : > { %2028 = vmatpush.bf16.msra.mxu0 %v3338_v32  ;;  %v3343_v32 = vld [vmem:[%s3734_s6 + $0x18] sm:$0xff] }
 0x73b   : > { %v1732_v5 = vsel %vm1731_vm8, %v3427_v26, %v1728_v35  ;;  %v3333_v35 = vld [vmem:[%s3729_s28] sm:$0xff] }
 0x73c   : > { %v1734_v36 = vmul.f32 %v1732_v5, %v1700_v4  ;;  %v3335_v5 = vld [vmem:[%s3734_s6] sm:$0xff]  ;;  %1975 = vmatpush.bf16.msra.mxu2 %v3333_v35 }
 0x73d   : > { %2002 = vmatpush.bf16.msra.mxu3 %v3335_v5  ;;  %v3342_v5 = vld [vmem:[%s3734_s6 + $0x10] sm:$0xff] }
 0x73e   : > { %v1737_v38 = vmul.f32 %v1735_v33, %v1734_v36 }
 0x740   : > { %v1740_v37 = vadd.f32 %v1738_v6, %v1737_v38  ;;  %v3337_v6 = vld [vmem:[%s3739_s29] sm:$0xff] }
 0x741   : > { %2029 = vmatpush.bf16.msra.mxu0 %v3337_v6 }
 0x742   : > { %v1741_v40 = vpack.c.bf16 %v1740_v37, %v1739_v39 }
 0x744   : > { %3121 = vmatmul.msk.bf16.vlgmr.msrb.gmra.mxu0 %vm1088_vm1, %v1741_v40 }
 0x7c1   : > { %v1770_v50 = vpop.f32.mrf.mxu0 }
 0x7c2   : > { %v1775_v51 = vmul.f32 %v1770_v50, %v1770_v50 }
 0x7c4   : > { %v1777_v52 = vmul.f32 %v1775_v51, %v1770_v50 }
 0x7c6   : > { %v1779_v54 = vmul.f32 0.044715, %v1777_v52 }
 0x7c8   : > { %v1781_v55 = vadd.f32 %v1779_v54, %v1770_v50  ;;  %v1922_v54 = vperm.slane %v3948_v48, 0 }
 0x7c9   : > { %v1772_v56 = vpop.f32.mrf.mxu0 }
 0x7ca   : > { %v1783_v57 = vmul.f32 0.7978846, %v1781_v55  ;;  %v1776_v58 = vmul.f32 %v1772_v56, %v1772_v56 }
 0x7cc   : > { %v1778_v59 = vmul.f32 %v1776_v58, %v1772_v56  ;;  %3428 = vtanh.f32 %v1783_v57  ;;  %v1925_v58 = vperm.slane %v3948_v48, 1 }
 0x7ce   : > { %v1780_v61 = vmul.f32 0.044715, %v1778_v59 }
 0x7d0   : > { %v1782_v63 = vadd.f32 %v1780_v61, %v1772_v56 }
 0x7d2   : > { %v1784_v2 = vmul.f32 0.7978846, %v1782_v63  ;;  %v3429_v0 = vpop.eup %3428 }
 0x7d3   : > { %v1787_v49 = vadd.f32 1.0, %v3429_v0 }
 0x7d4   : > { %3430 = vtanh.f32 %v1784_v2 }
 0x7d5   : > { %v1789_v3 = vmul.f32 0.5, %v1787_v49 }
 0x7d7   : > { %v1791_v4 = vmul.f32 %v1789_v3, %v1770_v50 }
 0x7da   : > { %v3431_v1 = vpop.eup %3430 }
 0x7db   : > { %v1788_v7 = vadd.f32 1.0, %v3431_v1  ;;  %v3961_v1 = vld [vmem:[%s3759_s10 + $0x4] sm:$0x3] }
 0x7dc   : > { %v2009_v3 = vperm.slane %v3961_v1, 0 }
 0x7dd   : > { %v1790_v9 = vmul.f32 0.5, %v1788_v7  ;;  %v3965_v7 = vld [vmem:[%s3759_s10 + $0x2] sm:$0x3] }
 0x7df   : > { %v1792_v60 = vmul.f32 %v1790_v9, %v1772_v56 }
 0x7e1   : > { %v1793_v10 = vpack.c.bf16 %v1792_v60, %v1791_v4  ;;  %v1982_v60 = vperm.slane %v3965_v7, 0 }
 0x7e3   : > { %1866 = vmatmul.bf16.vlgmr.msrb.gmra.mxu1 %v1793_v10 }
 0x860   : > { %v1867_v13 = vpop.f32.mrf.mxu1 }
 0x861   : > { %v1873_v14 = vmul.f32 %v1872_v11, %v1867_v13  ;;  %v3970_v13 = vld [vmem:[%s3759_s10] sm:$0x3] }
 0x863   : > { %v3924_v15 = vadd.f32 %v1873_v14, %v3891_v53 }
 0x865   : > { %v1878_v16 = vsel %vm1088_vm1, %v3924_v15, 0.0 }
 0x866   : > { %1879 = vadd.xlane.f32.xlu1 %v1878_v16 }
 0x868   : > { %v1869_v17 = vpop.f32.mrf.mxu1 }
 0x869   : > { %v1874_v18 = vmul.f32 %v1872_v11, %v1869_v17 }
 0x86b   : > { %v3929_v19 = vadd.f32 %v1874_v18, %v3896_v62  ;;  %v1952_v18 = vperm.slane %v3970_v13, 0 }
 0x86d   : > { %v1881_v20 = vsel %vm1088_vm1, %v3929_v19, 0.0 }
 0x86e   : > { %1882 = vadd.xlane.f32.xlu2 %v1881_v20 }
 0x8d9   : > { %v1880_v21 = vpop.xlane.xlu1 %1879 }
 0x8da   : > { %v1884_v53 = vmul.f32 %v1880_v21, %v3782_v12 }
 0x8dc   : > { %v1886_v22 = vsub.f32 %v3924_v15, %v1884_v53  ;;  %v3341_v53 = vld [vmem:[%s3729_s28 + $0x18] sm:$0xff] }
 0x8de   : > { %v1888_v23 = vmul.f32 %v1886_v22, %v1886_v22 }
 0x8e0   : > { %v1890_v25 = vsel %vm1088_vm1, %v1888_v23, 0.0 }
 0x8e1   : > { %1891 = vadd.xlane.f32.xlu1 %v1890_v25  ;;  %v1883_v26 = vpop.xlane.xlu2 %1882 }
 0x8e2   : > { %v1885_v62 = vmul.f32 %v1883_v26, %v3782_v12 }
 0x8e4   : > { %v1887_v27 = vsub.f32 %v3929_v19, %v1885_v62  ;;  %v3340_v62 = vld [vmem:[%s3729_s28 + $0x10] sm:$0xff] }
 0x8e6   : > { %v1889_v28 = vmul.f32 %v1887_v27, %v1887_v27 }
 0x8e8   : > { %v1893_v29 = vsel %vm1088_vm1, %v1889_v28, 0.0 }
 0x8e9   : > { %1894 = vadd.xlane.f32.xlu0 %v1893_v29 }
 0x954   : > { %v1892_v33 = vpop.xlane.xlu1 %1891 }
 0x955   : > { %v1896_v34 = vmul.f32 %v1892_v33, %v3782_v12 }
 0x957   : > { %v1898_v8 = vadd.f32 1e-05, %v1896_v34 }
 0x959   : > { %3432 = vrsqrt.f32 %v1898_v8  ;;  %vm1906_vm10 = vweird.f32 %v1898_v8 }
 0x95c   : > { %v1895_v36 = vpop.xlane.xlu0 %1894 }
 0x95d   : > { %v1897_v38 = vmul.f32 %v1895_v36, %v3782_v12 }
 0x95f   : > { %v3433_v39 = vpop.eup %3432  ;;  %v1899_v37 = vadd.f32 1e-05, %v1897_v38 }
 0x960   : > { %v1901_v40 = vmul.f32 %v3433_v39, %v1898_v8  ;;  %vm1907_vm9 = vweird.f32 %v3433_v39  ;;  %v1929_v8 = vlaneseq }
 0x961   : > { %3434 = vrsqrt.f32 %v1899_v37  ;;  %vm1908_vm12 = vmor %vm1906_vm10, %vm1907_vm9  ;;  %vm1916_vm0 = vweird.f32 %v1899_v37 }
 0x962   : > { %v1902_v41 = vmul.f32 %v3433_v39, %v1901_v40  ;;  %v1930_v38 = vshrl.u32 %v1929_v8, 7 }
 0x964   : > { %v1903_v42 = vmul.f32 0.5, %v1902_v41 }
 0x966   : > { %v1904_v43 = vsub.f32 1.5, %v1903_v42 }
 0x967   : > { %v3435_v44 = vpop.eup %3434 }
 0x968   : > { %v1905_v46 = vmul.f32 %v3433_v39, %v1904_v43  ;;  %v1911_v45 = vmul.f32 %v3435_v44, %v1899_v37  ;;  %vm1917_vm14 = vweird.f32 %v3435_v44 }
 0x969   : > { %vm1918_vm2 = vmor %vm1916_vm0, %vm1917_vm14 }
 0x96a   : > { %v1912_v47 = vmul.f32 %v3435_v44, %v1911_v45  ;;  %v1909_v50 = vsel %vm1908_vm12, %v3433_v39, %v1905_v46  ;;  %v1932_v39 = vand.u32 127, %v1929_v8 }
 0x96b   : > { %v1920_v55 = vmul.f32 %v1909_v50, %v1886_v22 }
 0x96c   : > { %v1913_v51 = vmul.f32 0.5, %v1912_v47  ;;  %vm1933_vm15 = vcmp.ge.s32.totalorder %v1930_v38, %v1932_v39 }
 0x96d   : > { %v1923_v59 = vmul.f32 %v1922_v54, %v1920_v55  ;;  %v3987_v37 = vsel %vm1933_vm15, 0.0, %v3528_v24  ;;  %v2215_v24 = vperm.slane %v3965_v7, 1 }
 0x96e   : > { %v1914_v52 = vsub.f32 1.5, %v1913_v51 }
 0x96f   : > { %v1926_v2 = vadd.f32 %v1925_v58, %v1923_v59 }
 0x970   : > { %v1915_v56 = vmul.f32 %v3435_v44, %v1914_v52 }
 0x972   : > { %v1919_v57 = vsel %vm1918_vm2, %v3435_v44, %v1915_v56  ;;  %v2188_v44 = vperm.slane %v3970_v13, 1 }
 0x973   : > { %v1921_v61 = vmul.f32 %v1919_v57, %v1887_v27 }
 0x975   : > { %v1924_v63 = vmul.f32 %v1922_v54, %v1921_v61 }
 0x977   : > { %v1927_v0 = vadd.f32 %v1925_v58, %v1924_v63 }
 0x979   : > { %v3952_v49 = vpack.c.bf16 %v1927_v0, %v1926_v2 }
 0x97b   : > { %3164 = vmatmul.msk.bf16.vlgmr.msra.gmra.mxu2 %vm1088_vm1, %v3952_v49  ;;  %3173 = vmatmul.msk.bf16.vlgmr.msra.gmra.mxu3 %vm1088_vm1, %v3952_v49 }
 0x97c   : > { %3182 = vmatmul.msk.bf16.vlgmr.msra.gmra.mxu0 %vm1088_vm1, %v3952_v49 }
 0x9f9   : > { %v2031_v9 = vpop.f32.mrf.mxu0 }
 0x9fa   : > { %v2032_v4 = vadd.f32 %v2031_v9, %v2009_v3 }
 0x9fc   : > { %v2040_v10 = vpack.c.bf16 %v2032_v4, %v2032_v4 }
 0x9fe   : > { %v2136_v11 = vsel %vm2134_vm3, %v2040_v10, 0  ;;  %v2004_v14 = vpop.f32.mrf.mxu3  ;;  %v1977_v17 = vpop.f32.mrf.mxu2 }
 0x9ff   : > { %v2005_v16 = vadd.f32 %v2004_v14, %v1982_v60  ;;  %2145 = vmatpush.bf16.msrb.mxu0 %v2136_v11  ;;  %v1978_v26 = vadd.f32 %v1977_v17, %v1952_v18 }
 0xa01   : > { %v2038_v20 = vpack.c.bf16 %v2005_v16, %v2005_v16  ;;  %v2033_v21 = vpop.f32.mrf.mxu0  ;;  %v2036_v30 = vpack.c.bf16 %v1978_v26, %v1978_v26 }
 0xa02   : > { %v2034_v22 = vadd.f32 %v2033_v21, %v2009_v3 }
 0xa03   : > { %v2046_v23 = vsel %vm1263_vm11, %v2038_v20, 0 }
 0xa04   : > { %v2041_v25 = vpack.c.bf16 %v2034_v22, %v2034_v22  ;;  %2055 = vmatpush.bf16.xpose.msrb.mxu2 %v2046_v23  ;;  %v3345_v22 = vld [vmem:[%s3739_s29 + $0x18] sm:$0xff] }
 0xa05   : > { %2261 = vmatpush.bf16.msra.mxu0 %v3345_v22 }
 0xa06   : > { %v2155_v27 = vsel %vm2134_vm3, %v2041_v25, 0  ;;  %v2006_v28 = vpop.f32.mrf.mxu3  ;;  %v1979_v33 = vpop.f32.mrf.mxu2 }
 0xa07   : > { %v2007_v29 = vadd.f32 %v2006_v28, %v1982_v60  ;;  %2164 = vmatpush.bf16.msra.mxu1 %v2155_v27  ;;  %v1980_v35 = vadd.f32 %v1979_v33, %v1952_v18  ;;  %v3344_v27 = vld [vmem:[%s3739_s29 + $0x10] sm:$0xff]  ;;  %s4189_s29 = sld [smem:[#allocation31_spill]] (!%p3283_p8) }
 0xa09   : > { %v2039_v31 = vpack.c.bf16 %v2007_v29, %v2007_v29  ;;  %v2037_v6 = vpack.c.bf16 %v1980_v35, %v1980_v35  ;;  %2262 = vmatpush.bf16.msra.mxu0 %v3344_v27 }
 0xa0b   : > { %v2065_v34 = vsel %vm1263_vm11, %v2039_v31, 0  ;;  %3183 = vmatmul.msk.bf16.vlgmr.msrb.gmra.mxu2 %vm1263_vm11, %v2036_v30 }
 0xa0c   : > { %2207 = vmatpush.bf16.msra.mxu2 %v3341_v53  ;;  %2074 = vmatpush.bf16.xpose.msrb.mxu3 %v2065_v34 }
 0xa10   : > { %2208 = vmatpush.bf16.msra.mxu2 %v3340_v62 }
 0xa13   : > { %3184 = vmatmul.msk.bf16.vlgmr.msrb.gmra.mxu3 %vm1263_vm11, %v2037_v6 }
 0xa14   : > { %2234 = vmatpush.bf16.msra.mxu3 %v3343_v32 }
 0xa18   : > { %2235 = vmatpush.bf16.msra.mxu3 %v3342_v5 }
 0xa1b   : > { %3207 = vmatmul.msk.bf16.vlgmr.msra.gmra.mxu2 %vm1088_vm1, %v3952_v49 }
 0xa23   : > { %3216 = vmatmul.msk.bf16.vlgmr.msra.gmra.mxu3 %vm1088_vm1, %v3952_v49 }
 0xa8e   : > { %v2057_v36 = vpop.f32.mrf.mxu2 }
 0xa8f   : > { %v2058_v46 = vadd.f32 %v2057_v36, %v3987_v37 }
 0xa91   : > { %v2081_v51 = vsel %vm2080_vm13, %v2058_v46, -inf }
 0xa96   : > { %v2059_v40 = vpop.f32.mrf.mxu2  ;;  %v2076_v41 = vpop.f32.mrf.mxu3 }
 0xa97   : > { %v2077_v42 = vadd.f32 %v2076_v41, %v3987_v37 }
 0xa99   : > { %v2084_v43 = vsel %vm2080_vm13, %v2077_v42, -inf }
 0xa9a   : > { %2085 = vmax.xlane.f32.xlu2 %v2084_v43 }
 0xa9e   : > { %v2078_v45 = vpop.f32.mrf.mxu3  ;;  %v2210_v47 = vpop.f32.mrf.mxu2 }
 0xa9f   : > { %v3993_v50 = vadd.f32 %v2210_v47, %v2188_v44 }
 0xaa1   : > { %v2269_v47 = vpack.c.bf16 %v3993_v50, %v3993_v50 }
 0xaa2   : > { %2082 = vmax.xlane.f32.xlu2 %v2081_v51 }
 0xaa6   : > { %v2237_v52 = vpop.f32.mrf.mxu3  ;;  %v2212_v61 = vpop.f32.mrf.mxu2 }
 0xaa7   : > { %v2238_v54 = vadd.f32 %v2237_v52, %v2215_v24  ;;  %v2213_v2 = vadd.f32 %v2212_v61, %v2188_v44 }
 0xaa9   : > { %v2271_v55 = vpack.c.bf16 %v2238_v54, %v2238_v54  ;;  %v2270_v0 = vpack.c.bf16 %v2213_v2, %v2213_v2 }
 0xaab   : > { %v2279_v56 = vsel %vm1263_vm11, %v2271_v55, 0 }
 0xaac   : > { %2288 = vmatpush.bf16.xpose.msrb.mxu1 %v2279_v56  ;;  %v3339_v56 = vld [vmem:[%s3745_s23] sm:$0xff] }
 0xaae   : > { %v2239_v57 = vpop.f32.mrf.mxu3 }
 0xaaf   : > { %v2240_v58 = vadd.f32 %v2239_v57, %v2215_v24 }
 0xab1   : > { %v2272_v59 = vpack.c.bf16 %v2240_v58, %v2240_v58 }
 0xab3   : > { %v2298_v63 = vsel %vm1263_vm11, %v2272_v59, 0 }
 0xab4   : > { %2307 = vmatpush.bf16.xpose.msrb.mxu2 %v2298_v63 }
 0xabb   : > { %3227 = vmatmul.msk.bf16.vlgmr.msrb.gmra.mxu2 %vm1263_vm11, %v2270_v0 }
 0xabc   : > { %2444 = vmatpush.bf16.msra.mxu2 %v3339_v56 }
 0xb0d   : > { %v2086_v3 = vpop.xlane.xlu2 %2085 }
 0xb0e   : > { %v2088_v9 = vsub.f32 %v2077_v42, %v2086_v3  ;;  %v2242_v3 = vperm.slane %v3961_v1, 1 }
 0xb10   : > { %v2091_v7 = vmul.f32 1.442695, %v2088_v9 }
 0xb12   : > { %3436 = vpow2.f32 %v2091_v7 }
 0xb15   : > { %v2083_v4 = vpop.xlane.xlu2 %2082 }
 0xb16   : > { %v2087_v60 = vsub.f32 %v2058_v46, %v2083_v4 }
 0xb18   : > { %v3437_v10 = vpop.eup %3436  ;;  %v2089_v11 = vmul.f32 1.442695, %v2087_v60 }
 0xb19   : > { %v2096_v13 = vsel %vm2080_vm13, %v3437_v10, 0.0 }
 0xb1a   : > { %3438 = vpow2.f32 %v2089_v11  ;;  %2097 = vadd.xlane.f32.xlu1 %v2096_v13 }
 0xb20   : > { %v3439_v14 = vpop.eup %3438 }
 0xb21   : > { %v2093_v16 = vsel %vm2080_vm13, %v3439_v14, 0.0 }
 0xb22   : > { %2094 = vadd.xlane.f32.xlu1 %v2093_v16 }
 0xb3e   : > { %v2309_v17 = vpop.f32.mrf.mxu2 }
 0xb3f   : > { %v2310_v18 = vadd.f32 %v2309_v17, %v3987_v37 }
 0xb41   : > { %v2316_v20 = vsel %vm2080_vm13, %v2310_v18, -inf }
 0xb42   : > { %2317 = vmax.xlane.f32.xlu1 %v2316_v20 }
 0xb46   : > { %v2311_v21 = vpop.f32.mrf.mxu2 }
 0xb8d   : > { %v2098_v53 = vpop.xlane.xlu1 %2097 }
 0xb8e   : > { %3440 = vrcp.f32 %v2098_v53  ;;  %v2125_v28 = vand.u32 2147483648, %v2098_v53  ;;  %v2123_v30 = vand.u32 2147483647, %v2098_v53  ;;  %vm2119_vm5 = vweird.f32 %v2098_v53 }
 0xb90   : > { %v2126_v33 = vor.u32 1.1754944e-38, %v2125_v28  ;;  %vm2124_vm7 = vcmp.eq.f32.partialorder %v2123_v30, 8.507059e+37 }
 0xb94   : > { %v3441_v23 = vpop.eup %3440 }
 0xb95   : > { %v2115_v25 = vmul.f32 %v3441_v23, %v2098_v53  ;;  %v2095_v26 = vpop.xlane.xlu1 %2094  ;;  %vm2120_vm4 = vweird.f32 %v3441_v23 }
 0xb96   : > { %3442 = vrcp.f32 %v2095_v26  ;;  %vm2121_vm6 = vmor %vm2119_vm5, %vm2120_vm4  ;;  %v2110_v36 = vand.u32 2147483648, %v2095_v26  ;;  %v2108_v39 = vand.u32 2147483647, %v2095_v26  ;;  %vm2104_vm9 = vweird.f32 %v2095_v26 }
 0xb97   : > { %v2116_v62 = vsub.f32 1.0, %v2115_v25 }
 0xb98   : > { %v2111_v42 = vor.u32 1.1754944e-38, %v2110_v36  ;;  %vm2109_vm12 = vcmp.eq.f32.partialorder %v2108_v39, 8.507059e+37 }
 0xb99   : > { %v2117_v29 = vmul.f32 %v3441_v23, %v2116_v62 }
 0xb9b   : > { %v2118_v31 = vadd.f32 %v3441_v23, %v2117_v29 }
 0xb9c   : > { %v3443_v32 = vpop.eup %3442 }
 0xb9d   : > { %v2122_v34 = vsel %vm2121_vm6, %v3441_v23, %v2118_v31  ;;  %v2100_v35 = vmul.f32 %v3443_v32, %v2095_v26  ;;  %vm2105_vm8 = vweird.f32 %v3443_v32 }
 0xb9e   : > { %v2127_v5 = vsel %vm2124_vm7, %v2126_v33, %v2122_v34  ;;  %vm2106_vm10 = vmor %vm2104_vm9, %vm2105_vm8  ;;  %v3346_v34 = vld [vmem:[%s3745_s23 + $0x8] sm:$0xff]  ;;  %s4190_s23 = smov (!%p3283_p8), %s4189_s29 }
 0xb9f   : > { %v2128_v6 = vmul.f32 %v3437_v10, %v2127_v5  ;;  %v2101_v8 = vsub.f32 1.0, %v2100_v35 }
 0xba1   : > { %v2102_v38 = vmul.f32 %v3443_v32, %v2101_v8  ;;  %v2130_v40 = vpack.c.bf16 %v2128_v6, %v2128_v6 }
 0xba3   : > { %v2103_v41 = vadd.f32 %v3443_v32, %v2102_v38  ;;  %3186 = vmatmul.msk.bf16.vlgmr.msra.gmra.mxu1 %vm2080_vm13, %v2130_v40 }
 0xba4   : > { %2421 = vmatpush.bf16.msra.mxu1 %v3346_v34 }
 0xba5   : > { %v2107_v43 = vsel %vm2106_vm10, %v3443_v32, %v2103_v41 }
 0xba6   : > { %v2112_v44 = vsel %vm2109_vm12, %v2111_v42, %v2107_v43 }
 0xba7   : > { %v2113_v46 = vmul.f32 %v3439_v14, %v2112_v44 }
 0xba9   : > { %v2129_v45 = vpack.c.bf16 %v2113_v46, %v2113_v46 }
 0xbab   : > { %3185 = vmatmul.msk.bf16.vlgmr.msrb.gmra.mxu0 %vm2080_vm13, %v2129_v45 }
 0xbb3   : > { %3226 = vmatmul.msk.bf16.vlgmr.msrb.gmra.mxu1 %vm1263_vm11, %v2269_v47 }
 0xbb5   : > { %v2318_v51 = vpop.xlane.xlu1 %2317 }
 0xbb6   : > { %v2320_v24 = vsub.f32 %v2310_v18, %v2318_v51 }
 0xbb8   : > { %v2323_v52 = vmul.f32 1.442695, %v2320_v24 }
 0xbba   : > { %3444 = vpow2.f32 %v2323_v52 }
 0xbbb   : > { %3225 = vmatmul.msk.bf16.vlgmr.msra.gmra.mxu0 %vm1088_vm1, %v3952_v49 }
 0xbc0   : > { %v3445_v54 = vpop.eup %3444 }
 0xbc1   : > { %v2328_v55 = vsel %vm2080_vm13, %v3445_v54, 0.0 }
 0xbc2   : > { %2329 = vadd.xlane.f32.xlu1 %v2328_v55  ;;  %v2453_v55 = vperm.slane %v3948_v48, 4 }
 0xc20   : > { %v2166_v57 = vpop.f32.mrf.mxu1 }
 0xc28   : > { %v2147_v58 = vpop.f32.mrf.mxu0  ;;  %v2168_v59 = vpop.f32.mrf.mxu1 }
 0xc29   : > { %v2170_v61 = vpack.c.bf16 %v2166_v57, %v2147_v58 }
 0xc2b   : > { %3241 = vmatmul.msk.bf16.vlgmr.msra.gmra.mxu2 %vm1263_vm11, %v2170_v61 }
 0xc30   : > { %v2149_v50 = vpop.f32.mrf.mxu0  ;;  %v2290_v63 = vpop.f32.mrf.mxu1 }
 0xc31   : > { %v2291_v2 = vadd.f32 %v2290_v63, %v3987_v37 }
 0xc33   : > { %v2313_v0 = vsel %vm2080_vm13, %v2291_v2, -inf }
 0xc34   : > { %2314 = vmax.xlane.f32.xlu2 %v2313_v0 }
 0xc35   : > { %v2330_v49 = vpop.xlane.xlu1 %2329 }
 0xc36   : > { %3446 = vrcp.f32 %v2330_v49  ;;  %v2357_v16 = vand.u32 2147483648, %v2330_v49  ;;  %v2355_v18 = vand.u32 2147483647, %v2330_v49  ;;  %vm2351_vm0 = vweird.f32 %v2330_v49 }
 0xc38   : > { %v2264_v9 = vpop.f32.mrf.mxu0  ;;  %v2292_v7 = vpop.f32.mrf.mxu1  ;;  %v2358_v53 = vor.u32 1.1754944e-38, %v2357_v16  ;;  %vm2356_vm15 = vcmp.eq.f32.partialorder %v2355_v18, 8.507059e+37 }
 0xc39   : > { %v2265_v4 = vadd.f32 %v2264_v9, %v2242_v3 }
 0xc3b   : > { %v2273_v60 = vpack.c.bf16 %v2265_v4, %v2265_v4 }
 0xc3c   : > { %v3447_v10 = vpop.eup %3446 }
 0xc3d   : > { %v2347_v11 = vmul.f32 %v3447_v10, %v2330_v49  ;;  %v2367_v13 = vsel %vm2134_vm3, %v2273_v60, 0  ;;  %vm2352_vm14 = vweird.f32 %v3447_v10 }
 0xc3e   : > { %2376 = vmatpush.bf16.msrb.mxu3 %v2367_v13  ;;  %vm2353_vm2 = vmor %vm2351_vm0, %vm2352_vm14  ;;  %v3348_v13 = vld [vmem:[%s3750_s8 + $0x8] sm:$0xff] }
 0xc3f   : > { %v2348_v14 = vsub.f32 1.0, %v2347_v11 }
 0xc40   : > { %v2266_v17 = vpop.f32.mrf.mxu0 }
 0xc41   : > { %v2349_v37 = vmul.f32 %v3447_v10, %v2348_v14  ;;  %v2267_v20 = vadd.f32 %v2266_v17, %v2242_v3 }
 0xc42   : > { %2536 = vmatpush.bf16.msra.mxu3 %v3348_v13 }
 0xc43   : > { %v2350_v21 = vadd.f32 %v3447_v10, %v2349_v37  ;;  %v2274_v1 = vpack.c.bf16 %v2267_v20, %v2267_v20  ;;  %v3347_v37 = vld [vmem:[%s3750_s8] sm:$0xff] }
 0xc45   : > { %v2354_v22 = vsel %vm2353_vm2, %v3447_v10, %v2350_v21  ;;  %v2386_v23 = vsel %vm2134_vm3, %v2274_v1, 0 }
 0xc46   : > { %v2359_v25 = vsel %vm2356_vm15, %v2358_v53, %v2354_v22  ;;  %2395 = vmatpush.bf16.msrb.mxu0 %v2386_v23  ;;  %2537 = vmatpush.bf16.msra.mxu3 %v3347_v37 }
 0xc47   : > { %v2360_v26 = vmul.f32 %v3445_v54, %v2359_v25 }
 0xc49   : > { %v2362_v62 = vpack.c.bf16 %v2360_v26, %v2360_v26 }
 0xc4b   : > { %3229 = vmatmul.msk.bf16.vlgmr.msrb.gmra.mxu0 %vm2080_vm13, %v2362_v62 }
 0xca7   : > { %v2315_v27 = vpop.xlane.xlu2 %2314 }
 0xca8   : > { %v2319_v28 = vsub.f32 %v2291_v2, %v2315_v27 }
 0xcaa   : > { %v2321_v29 = vmul.f32 1.442695, %v2319_v28 }
 0xcac   : > { %3448 = vpow2.f32 %v2321_v29 }
 0xcae   : > { %v2446_v24 = vpop.f32.mrf.mxu2 }
 0xcb2   : > { %v3449_v30 = vpop.eup %3448 }
 0xcb3   : > { %v2325_v31 = vsel %vm2080_vm13, %v3449_v30, 0.0 }
 0xcb4   : > { %2326 = vadd.xlane.f32.xlu2 %v2325_v31 }
 0xcb6   : > { %v2448_v59 = vpop.f32.mrf.mxu2 }
 0xcc8   : > { %v2397_v32 = vpop.f32.mrf.mxu0 }
 0xcd0   : > { %v2399_v33 = vpop.f32.mrf.mxu0 }
 0xd27   : > { %v2327_v35 = vpop.xlane.xlu2 %2326 }
 0xd28   : > { %3450 = vrcp.f32 %v2327_v35  ;;  %v2342_v36 = vand.u32 2147483648, %v2327_v35  ;;  %v2340_v39 = vand.u32 2147483647, %v2327_v35  ;;  %vm2336_vm4 = vweird.f32 %v2327_v35 }
 0xd2a   : > { %v2343_v41 = vor.u32 1.1754944e-38, %v2342_v36  ;;  %vm2341_vm6 = vcmp.eq.f32.partialorder %v2340_v39, 8.507059e+37 }
 0xd2e   : > { %v3451_v5 = vpop.eup %3450 }
 0xd2f   : > { %v2332_v6 = vmul.f32 %v3451_v5, %v2327_v35  ;;  %vm2337_vm3 = vweird.f32 %v3451_v5 }
 0xd30   : > { %vm2338_vm5 = vmor %vm2336_vm4, %vm2337_vm3 }
 0xd31   : > { %v2333_v8 = vsub.f32 1.0, %v2332_v6 }
 0xd33   : > { %v2334_v38 = vmul.f32 %v3451_v5, %v2333_v8 }
 0xd35   : > { %v2335_v40 = vadd.f32 %v3451_v5, %v2334_v38 }
 0xd37   : > { %v2339_v42 = vsel %vm2338_vm5, %v3451_v5, %v2335_v40  ;;  %v2503_v5 = vperm.slane %v3948_v48, 3 }
 0xd38   : > { %v2344_v43 = vsel %vm2341_vm6, %v2343_v41, %v2339_v42  ;;  %v3356_v41 = vld [vmem:[%s3764_s26 + $0x38] sm:$0xff]  ;;  %v3355_v42 = vld [vmem:[%s3764_s26 + $0x30] sm:$0xff] }
 0xd39   : > { %v2345_v44 = vmul.f32 %v3449_v30, %v2344_v43  ;;  %2627 = vmatpush.bf16.msra.mxu0 %v3356_v41  ;;  %v3354_v43 = vld [vmem:[%s3764_s26 + $0x28] sm:$0xff] }
 0xd3b   : > { %v2361_v46 = vpack.c.bf16 %v2345_v44, %v2345_v44  ;;  %v3353_v44 = vld [vmem:[%s3764_s26 + $0x20] sm:$0xff] }
 0xd3d   : > { %3228 = vmatmul.msk.bf16.vlgmr.msrb.gmra.mxu3 %vm2080_vm13, %v2361_v46  ;;  %2628 = vmatpush.bf16.msra.mxu0 %v3355_v42  ;;  %v3352_v46 = vld [vmem:[%s3764_s26 + $0x18] sm:$0xff] }
 0xd41   : > { %2629 = vmatpush.bf16.msra.mxu0 %v3354_v43 }
 0xd45   : > { %2630 = vmatpush.bf16.msra.mxu0 %v3353_v44 }
 0xd49   : > { %2631 = vmatpush.bf16.msra.mxu0 %v3352_v46 }
 0xdc0   : > { %v2378_v45 = vpop.f32.mrf.mxu3 }
 0xdc1   : > { %v2401_v47 = vpack.c.bf16 %v2397_v32, %v2378_v45  ;;  %v2500_v32 = vperm.slane %v3948_v48, 2  ;;  %v3351_v45 = vld [vmem:[%s3764_s26 + $0x10] sm:$0xff] }
 0xdc2   : > { %2632 = vmatpush.bf16.msra.mxu0 %v3351_v45 }
 0xdc3   : > { %3236 = vmatmul.msk.bf16.vlgmr.msra.gmra.mxu1 %vm1263_vm11, %v2401_v47  ;;  %v3350_v47 = vld [vmem:[%s3764_s26 + $0x8] sm:$0xff] }
 0xdc6   : > { %2633 = vmatpush.bf16.msra.mxu0 %v3350_v47 }
 0xdc8   : > { %v2380_v51 = vpop.f32.mrf.mxu3 }
 0xdc9   : > { %v3401_v51 = vld [vmem:[%s1045_s0] ss:$0 sm:$0xff] }
 0xe40   : > { %v2423_v52 = vpop.f32.mrf.mxu1 }
 0xe41   : > { %v2447_v54 = vadd.f32 %v2446_v24, %v2423_v52  ;;  %v3349_v52 = vld [vmem:[%s3764_s26] sm:$0xff] }
 0xe42   : > { %2634 = vmatpush.bf16.msra.mxu0 %v3349_v52 }
 0xe43   : > { %v2451_v56 = vadd.f32 %v2447_v54, %v3924_v15 }
 0xe45   : > { %v4028_v57 = vadd.f32 %v2453_v55, %v2451_v56 }
 0xe47   : > { %v2456_v58 = vsel %vm1088_vm1, %v4028_v57, 0.0 }
 0xe48   : > { %2457 = vadd.xlane.f32.xlu2 %v2456_v58  ;;  %v2425_v61 = vpop.f32.mrf.mxu1 }
 0xe49   : > { %v2449_v50 = vadd.f32 %v2448_v59, %v2425_v61 }
 0xe4b   : > { %v2452_v63 = vadd.f32 %v2449_v50, %v3929_v19 }
 0xe4d   : > { %v4033_v2 = vadd.f32 %v2453_v55, %v2452_v63 }
 0xe4f   : > { %v2459_v0 = vsel %vm1088_vm1, %v4033_v2, 0.0 }
 0xe50   : > { %2460 = vadd.xlane.f32.xlu1 %v2459_v0 }
 0xebb   : > { %v2458_v49 = vpop.xlane.xlu2 %2457 }
 0xebc   : > { %v2462_v15 = vmul.f32 %v2458_v49, %v3782_v12 }
 0xebe   : > { %v2464_v3 = vsub.f32 %v4028_v57, %v2462_v15 }
 0xec0   : > { %v2466_v9 = vmul.f32 %v2464_v3, %v2464_v3 }
 0xec2   : > { %v2468_v7 = vsel %vm1088_vm1, %v2466_v9, 0.0 }
 0xec3   : > { %2469 = vadd.xlane.f32.xlu2 %v2468_v7  ;;  %v2461_v4 = vpop.xlane.xlu1 %2460 }
 0xec4   : > { %v2463_v19 = vmul.f32 %v2461_v4, %v3782_v12 }
 0xec6   : > { %v2465_v60 = vsub.f32 %v4033_v2, %v2463_v19 }
 0xec8   : > { %v2467_v10 = vmul.f32 %v2465_v60, %v2465_v60 }
 0xeca   : > { %v2471_v11 = vsel %vm1088_vm1, %v2467_v10, 0.0 }
 0xecb   : > { %2472 = vadd.xlane.f32.xlu0 %v2471_v11 }
 0xf36   : > { %v2470_v14 = vpop.xlane.xlu2 %2469 }
 0xf37   : > { %v2474_v16 = vmul.f32 %v2470_v14, %v3782_v12 }
 0xf39   : > { %v2476_v17 = vadd.f32 1e-05, %v2474_v16 }
 0xf3b   : > { %3452 = vrsqrt.f32 %v2476_v17  ;;  %vm2484_vm13 = vweird.f32 %v2476_v17 }
 0xf3e   : > { %v2473_v18 = vpop.xlane.xlu0 %2472 }
 0xf3f   : > { %v2475_v20 = vmul.f32 %v2473_v18, %v3782_v12 }
 0xf41   : > { %v3453_v21 = vpop.eup %3452  ;;  %v2477_v1 = vadd.f32 1e-05, %v2475_v20 }
 0xf42   : > { %v2479_v53 = vmul.f32 %v3453_v21, %v2476_v17  ;;  %vm2485_vm11 = vweird.f32 %v3453_v21  ;;  %v2643_v17 = vperm.slane %v3948_v48, 5 }
 0xf43   : > { %3454 = vrsqrt.f32 %v2477_v1  ;;  %vm2486_vm7 = vmor %vm2484_vm13, %vm2485_vm11  ;;  %vm2494_vm9 = vweird.f32 %v2477_v1 }
 0xf44   : > { %v2480_v22 = vmul.f32 %v3453_v21, %v2479_v53 }
 0xf46   : > { %v2481_v23 = vmul.f32 0.5, %v2480_v22 }
 0xf48   : > { %v2482_v25 = vsub.f32 1.5, %v2481_v23 }
 0xf49   : > { %v3455_v26 = vpop.eup %3454 }
 0xf4a   : > { %v2483_v62 = vmul.f32 %v3453_v21, %v2482_v25  ;;  %v2489_v27 = vmul.f32 %v3455_v26, %v2477_v1  ;;  %vm2495_vm8 = vweird.f32 %v3455_v26 }
 0xf4b   : > { %vm2496_vm10 = vmor %vm2494_vm9, %vm2495_vm8 }
 0xf4c   : > { %v2490_v28 = vmul.f32 %v3455_v26, %v2489_v27  ;;  %v2487_v29 = vsel %vm2486_vm7, %v3453_v21, %v2483_v62 }
 0xf4d   : > { %v2498_v33 = vmul.f32 %v2487_v29, %v2464_v3 }
 0xf4e   : > { %v2491_v30 = vmul.f32 0.5, %v2490_v28 }
 0xf4f   : > { %v2501_v6 = vmul.f32 %v2500_v32, %v2498_v33 }
 0xf50   : > { %v2492_v31 = vsub.f32 1.5, %v2491_v30 }
 0xf51   : > { %v2504_v38 = vadd.f32 %v2503_v5, %v2501_v6 }
 0xf52   : > { %v2493_v34 = vmul.f32 %v3455_v26, %v2492_v31 }
 0xf54   : > { %v2497_v35 = vsel %vm2496_vm10, %v3455_v26, %v2493_v34 }
 0xf55   : > { %v2499_v8 = vmul.f32 %v2497_v35, %v2465_v60 }
 0xf57   : > { %v2502_v36 = vmul.f32 %v2500_v32, %v2499_v8 }
 0xf59   : > { %v2505_v39 = vadd.f32 %v2503_v5, %v2502_v36 }
 0xf5b   : > { %v2506_v40 = vpack.c.bf16 %v2505_v39, %v2504_v38 }
 0xf5d   : > { %3250 = vmatmul.msk.bf16.vlgmr.msra.gmra.mxu3 %vm1088_vm1, %v2506_v40 }
 0xfe0   : > { %v2539_v24 = vpop.f32.mrf.mxu3 }
 0xfe1   : > { %v2540_v54 = vadd.f32 %v3401_v51, %v2539_v24 }
 0xfe3   : > { %v2544_v55 = vmul.f32 %v2540_v54, %v2540_v54 }
 0xfe5   : > { %v2546_v56 = vmul.f32 %v2544_v55, %v2540_v54 }
 0xfe7   : > { %v2548_v58 = vmul.f32 0.044715, %v2546_v56 }
 0xfe8   : > { %v2541_v59 = vpop.f32.mrf.mxu3 }
 0xfe9   : > { %v2550_v61 = vadd.f32 %v2548_v58, %v2540_v54  ;;  %v2542_v50 = vadd.f32 %v3401_v51, %v2541_v59 }
 0xfeb   : > { %v2552_v63 = vmul.f32 0.7978846, %v2550_v61  ;;  %v2545_v0 = vmul.f32 %v2542_v50, %v2542_v50 }
 0xfed   : > { %v2547_v49 = vmul.f32 %v2545_v0, %v2542_v50  ;;  %3456 = vtanh.f32 %v2552_v63 }
 0xfef   : > { %v2549_v15 = vmul.f32 0.044715, %v2547_v49 }
 0xff1   : > { %v2551_v3 = vadd.f32 %v2549_v15, %v2542_v50 }
 0xff3   : > { %v2553_v9 = vmul.f32 0.7978846, %v2551_v3  ;;  %v3457_v7 = vpop.eup %3456 }
 0xff4   : > { %v2556_v4 = vadd.f32 1.0, %v3457_v7 }
 0xff5   : > { %3458 = vtanh.f32 %v2553_v9 }
 0xff6   : > { %v2558_v60 = vmul.f32 0.5, %v2556_v4 }
 0xff8   : > { %v2560_v13 = vmul.f32 %v2558_v60, %v2540_v54 }
 0xffb   : > { %v3459_v19 = vpop.eup %3458 }
 0xffc   : > { %v2557_v10 = vadd.f32 1.0, %v3459_v19 }
 0xffe   : > { %v2559_v11 = vmul.f32 0.5, %v2557_v10 }
0x1000   : > { %v2561_v14 = vmul.f32 %v2559_v11, %v2542_v50 }
0x1002   : > { %v2562_v16 = vpack.c.bf16 %v2561_v14, %v2560_v13 }
0x1004   : > { %2635 = vmatmul.bf16.vlgmr.msra.gmra.mxu0 %v2562_v16 }
0x1081   : > { %v2636_v37 = vpop.f32.mrf.mxu0 }
0x1082   : > { %v2641_v18 = vadd.f32 %v2636_v37, %v4028_v57 }
0x1084   : > { %v2644_v20 = vadd.f32 %v2643_v17, %v2641_v18 }
0x1086   : > { %2646 = vst.msk [vmem:[#allocation2] sm:$0xff] %vm1088_vm1, %v2644_v20 }
0x1089   : > { %v2638_v21 = vpop.f32.mrf.mxu0 }
0x108a   : > { %v2642_v1 = vadd.f32 %v2638_v21, %v4033_v2  ;;  %2651 = sbr.rel (%p3283_p8) target bundleno = 4654 (0x122e), region = 128 }
0x108c   : > { %v2645_v53 = vadd.f32 %v2643_v17, %v2642_v1 }
0x108e   : > { %2647 = vst.msk [vmem:[#allocation2 + $0x8] sm:$0xff] %vm1088_vm1, %v2645_v53 }
0x108f   : > { %v2653_v22 = vsel %vm1088_vm1, %v2644_v20, 0.0  ;;  %v2656_v48 = vsel %vm1088_vm1, %v2645_v53, 0.0  ;;  %v3358_v31 = vld [vmem:[%s4189_s29 + $0x8] sm:$0xff]  ;;  %v3357_v33 = vld [vmem:[%s4190_s23] sm:$0xff] }
0x1090   : > { %2654 = vadd.xlane.f32.xlu0 %v2653_v22  ;;  %2735 = vmatpush.bf16.msra.mxu0 %v3358_v31  ;;  %v2652_v42 = vld [vmem:[%s4191_s9] sm:$0x3] }
0x1091   : > { %v2697_v45 = vperm.slane %v2652_v42, 0  ;;  %v2700_v24 = vperm.slane %v2652_v42, 1  ;;  %v3460_v49 = vld [vmem:[%s4193_s21] ss:$0 sm:$0xff] }
0x1094   : > { %2736 = vmatpush.bf16.msra.mxu0 %v3357_v33 }
0x1098   : > { %2657 = vadd.xlane.f32.xlu0 %v2656_v48 }
0x1103   : > { %v2655_v23 = vpop.xlane.xlu0 %2654 }
0x1104   : > { %v2659_v57 = vmul.f32 %v2655_v23, %v3782_v12 }
0x1106   : > { %v2661_v25 = vsub.f32 %v2644_v20, %v2659_v57 }
0x1108   : > { %v2663_v26 = vmul.f32 %v2661_v25, %v2661_v25 }
0x110a   : > { %v2665_v62 = vsel %vm1088_vm1, %v2663_v26, 0.0 }
0x110b   : > { %2666 = vadd.xlane.f32.xlu1 %v2665_v62  ;;  %v2658_v2 = vpop.xlane.xlu0 %2657 }
0x110c   : > { %v2660_v27 = vmul.f32 %v2658_v2, %v3782_v12 }
0x110e   : > { %v2662_v28 = vsub.f32 %v2645_v53, %v2660_v27 }
0x1110   : > { %v2664_v29 = vmul.f32 %v2662_v28, %v2662_v28 }
0x1112   : > { %v2668_v30 = vsel %vm1088_vm1, %v2664_v29, 0.0 }
0x1113   : > { %2669 = vadd.xlane.f32.xlu1 %v2668_v30 }
0x117e   : > { %v2667_v32 = vpop.xlane.xlu1 %2666 }
0x117f   : > { %v2671_v34 = vmul.f32 %v2667_v32, %v3782_v12 }
0x1181   : > { %v2673_v35 = vadd.f32 1e-05, %v2671_v34 }
0x1183   : > { %3461 = vrsqrt.f32 %v2673_v35  ;;  %vm2681_vm14 = vweird.f32 %v2673_v35 }
0x1186   : > { %v2670_v5 = vpop.xlane.xlu1 %2669 }
0x1187   : > { %v2672_v6 = vmul.f32 %v2670_v5, %v3782_v12 }
0x1189   : > { %v3462_v8 = vpop.eup %3461  ;;  %v2674_v36 = vadd.f32 1e-05, %v2672_v6 }
0x118a   : > { %v2676_v38 = vmul.f32 %v3462_v8, %v2673_v35  ;;  %vm2682_vm12 = vweird.f32 %v3462_v8 }
0x118b   : > { %3463 = vrsqrt.f32 %v2674_v36  ;;  %vm2683_vm0 = vmor %vm2681_vm14, %vm2682_vm12  ;;  %vm2691_vm15 = vweird.f32 %v2674_v36 }
0x118c   : > { %v2677_v39 = vmul.f32 %v3462_v8, %v2676_v38 }
0x118e   : > { %v2678_v40 = vmul.f32 0.5, %v2677_v39 }
0x1190   : > { %v2679_v41 = vsub.f32 1.5, %v2678_v40 }
0x1191   : > { %v3464_v43 = vpop.eup %3463 }
0x1192   : > { %v2680_v44 = vmul.f32 %v3462_v8, %v2679_v41  ;;  %v2686_v46 = vmul.f32 %v3464_v43, %v2674_v36  ;;  %vm2692_vm2 = vweird.f32 %v3464_v43 }
0x1193   : > { %vm2693_vm3 = vmor %vm2691_vm15, %vm2692_vm2 }
0x1194   : > { %v2687_v47 = vmul.f32 %v3464_v43, %v2686_v46  ;;  %v2684_v12 = vsel %vm2683_vm0, %v3462_v8, %v2680_v44 }
0x1195   : > { %v2695_v51 = vmul.f32 %v2684_v12, %v2661_v25 }
0x1196   : > { %v2688_v52 = vmul.f32 0.5, %v2687_v47 }
0x1197   : > { %v2698_v54 = vmul.f32 %v2697_v45, %v2695_v51 }
0x1198   : > { %v2689_v55 = vsub.f32 1.5, %v2688_v52 }
0x1199   : > { %v2701_v56 = vadd.f32 %v2700_v24, %v2698_v54 }
0x119a   : > { %v2690_v58 = vmul.f32 %v3464_v43, %v2689_v55 }
0x119b   : > { %2703 = vst.msk [vmem:[%s4192_s7] sm:$0xff] %vm1088_vm1, %v2701_v56 }
0x119c   : > { %v2694_v59 = vsel %vm2693_vm3, %v3464_v43, %v2690_v58 }
0x119d   : > { %v2696_v61 = vmul.f32 %v2694_v59, %v2662_v28 }
0x119f   : > { %v2699_v50 = vmul.f32 %v2697_v45, %v2696_v61 }
0x11a1   : > { %v2702_v63 = vadd.f32 %v2700_v24, %v2699_v50 }
0x11a3   : > { %2704 = vst.msk [vmem:[%s4192_s7 + $0x8] sm:$0xff] %vm1088_vm1, %v2702_v63  ;;  %v2705_v0 = vpack.c.bf16 %v2702_v63, %v2701_v56 }
0x11a5   : > { %3292 = vmatmul.msk.bf16.vlgmr.msra.gmra.mxu0 %vm1088_vm1, %v2705_v0 }
0x1222   : > { %v2738_v15 = vpop.f32.mrf.mxu0 }
0x1223   : > { %v2739_v3 = vadd.f32 %v3460_v49, %v2738_v15 }
0x1225   : > { %2743 = vst [vmem:[#allocation6] sm:$0xff] %v2739_v3 }
0x122a   : > { %v2740_v9 = vpop.f32.mrf.mxu0 }
0x122b   : > { %v2741_v7 = vadd.f32 %v3460_v49, %v2740_v9 }
0x122d   : > { %2744 = vst [vmem:[#allocation6 + $0x8] sm:$0xff] %v2741_v7 }
0x122e PF: > { %s4194_s30 = sld [smem:[#allocation10_spill]]  ;;  %s3529_s24 = smov [#allocation6]  }
0x122f   : > { %s2753_s2 = sshll.u32 %s3529_s24, 4  ;;  %s4195_s1 = sld [smem:[#allocation34_spill]]  ;;  %s2754_s2 = int_to_ptr.vmem [resolvable:$true] %s2753_s2 }
0x1230   : > { %s3530_s29 = smov 128   ;;  %s3531_s8 = smov 8  }
0x1234   : > { %p3374_p9 = scmp.eq.s32.totalorder %s4194_s30, 1 }
0x1235   : > { %s2755_s6 = sshll.u32 %s4195_s1, 4  ;;  %s2756_s6 = int_to_ptr.hbm [resolvable:$true] %s2755_s6 }
0x1236   : > { %3365 = dma.vmem_to_hbm [thread:$0]  (%p3374_p9), %s2754_s2, 256, %s2756_s6, [#allocation4], %s3530_s29, %s3530_s29, %s3531_s8  }
0x1237   : > { %3517 = dma.done.wait (%p3374_p9), [#allocation4], 256  }
0x1238   : > { %3519 = vsyncadd (%p3374_p9), [#allocation4], 4294967040 }
0x1239 PF: > { %s4196_s0 = sld [smem:[#allocation9_spill]] }
0x123f   : > { %s38_s29 = sadd.s32 1, %s4196_s0  }
0x1240   : > { %p35_p10 = scmp.ge.s32.totalorder %s38_s29, 4  }
0x1242   :  { %37 = sbr.rel (!%p35_p10) target bundleno = 23 (0x17), region = 220 }
0x1247   :  { %2775 = vsyncpa [#allocation4], 1 }
0x1248   :  { %2777 = vsyncpa [#allocation4 + $0x1], 1 }
0x1249   :  { %2778 = vsyncpa [#allocation5], 1 }
0x124a   :  { %2780 = vsyncpa [#allocation5 + $0x1], 1 }

</bundles_post_ra>
